<compile_context>
chip_gen: v6e
topology: v6e:2x2x1
jax: 0.10.0
libtpu: 0.0.40
codegen_flags: <defaults>
</compile_context>

<pallas_src>
import functools

import jax
import jax.numpy as jnp
from jax.experimental import pallas as pl
from jax.experimental.pallas import tpu as pltpu


def _round_up(x, m):
    return ((x + m - 1) // m) * m


def _custom_loss_kernel(x_ref, lab_ref, loss_ref, acc_ref, *,
                        n_valid, n_classes, n_rem, p, scale_wrong, scale_true, tile_n):
    i = pl.program_id(0)
    c = n_classes

    @pl.when(i == 0)
    def _init():
        acc_ref[...] = jnp.zeros_like(acc_ref)

    x = x_ref[...].astype(jnp.float32)          # (Tn, C): batch on sublanes, classes on lanes
    lab = lab_ref[...]                          # (Tn, 1) int32

    # One-hot along the class (lane) axis via iota compare (no gather).
    col = jax.lax.broadcasted_iota(jnp.int32, (tile_n, c), 1)
    onehot = col == lab                         # (Tn, C)

    # --- per-example quantities; class reductions are lane (XLU) reductions ---
    temp_out = jnp.where(x > 0, x * scale_wrong, 0.0)                     # (Tn, C), >= 0
    sum_temp_out = jnp.sum(temp_out, axis=1, keepdims=True)               # (Tn, 1)
    row_mean = jnp.sum(x, axis=1, keepdims=True) * (1.0 / c)              # (Tn, 1)
    x_at_lab = jnp.sum(jnp.where(onehot, x, 0.0), axis=1, keepdims=True)  # (Tn, 1)
    val = jnp.maximum(jnp.abs(row_mean), jnp.abs(x_at_lab)) * scale_true
    t_out_at_lab = jnp.where(x_at_lab > 0, x_at_lab * scale_wrong, 0.0)

    # L1 numerator per example (tempLabels never materialized; needs temp_out >= 0).
    l1_col = sum_temp_out - t_out_at_lab + jnp.abs(t_out_at_lab - val)    # (Tn, 1)

    # CrossEntropy: the "-1" shift is a softmax no-op, so compute directly on x.
    m = jnp.max(x, axis=1, keepdims=True)
    lse = jnp.log(jnp.sum(jnp.exp(x - m), axis=1, keepdims=True))
    ce_col = (m + lse) - x_at_lab                                         # (Tn, 1)

    # Fused, pre-weighted accumulator: p * mean_{N*C}(L1) + (1-p) * mean_N(CE).
    combined = (p / (n_valid * c)) * l1_col + ((1.0 - p) / n_valid) * ce_col

    if n_rem == 0:
        # All tiles are full: no mask work anywhere.
        acc_ref[...] += combined
    else:
        last = pl.num_programs(0) - 1

        @pl.when(i < last)
        def _full_tile():
            acc_ref[...] += combined

        @pl.when(i == last)                 # only the last tile is ragged
        def _ragged_tile():
            row = jax.lax.broadcasted_iota(jnp.int32, (tile_n, 1), 0)
            # Padded rows hold undefined data; the select keeps NaN/Inf out.
            acc_ref[...] += jnp.where(row < n_rem, combined, 0.0)

    @pl.when(i == pl.num_programs(0) - 1)
    def _finalize():
        loss_ref[0, 0] = jnp.sum(acc_ref[...])


def custom_loss(output, labels, p=0.5, scale_wrong=2.0, scale_true=2.0, tile_n=None):
    """output: (N, C) logits (any float dtype); labels: (N,) int class ids. Scalar f32 loss."""
    n, c = output.shape
    assert scale_wrong >= 0, "L1 simplification assumes scale_wrong >= 0 (so tempOut >= 0)"

    # Whole batch in a single block whenever reasonable; otherwise 4096-row tiles keep
    # double-buffered inputs + scratch well under every generation's scoped VMEM default.
    cap = 4096
    if tile_n is None:
        tile_n = n if n <= cap else cap
    tile_n = int(tile_n)
    if tile_n >= n:
        tile_n = n                        # single block == full dim (any size allowed)
    else:
        tile_n = min(_round_up(tile_n, 8), n)   # strict tiles must be sublane-aligned
    n_tiles = (n + tile_n - 1) // tile_n
    n_rem = n % tile_n                    # ragged tail handled in-kernel (no jnp.pad)

    # No transpose / pad / upcast in the wrapper: logits go straight to the kernel in
    # their native dtype and (N, C) layout; the labels reshape to (N, 1) is free.
    lab = labels.astype(jnp.int32).reshape(n, 1)

    kernel = functools.partial(
        _custom_loss_kernel,
        n_valid=int(n),
        n_classes=int(c),
        n_rem=int(n_rem),
        p=float(p),
        scale_wrong=float(scale_wrong),
        scale_true=float(scale_true),
        tile_n=int(tile_n),
    )

    loss = pl.pallas_call(
        kernel,
        out_shape=jax.ShapeDtypeStruct((1, 1), jnp.float32),
        grid_spec=pltpu.PrefetchScalarGridSpec(
            num_scalar_prefetch=0,
            grid=(n_tiles,),
            in_specs=[
                pl.BlockSpec((tile_n, c), lambda i: (i, 0)),   # logits tile (Tn, C)
                pl.BlockSpec((tile_n, 1), lambda i: (i, 0)),   # labels tile (Tn, 1)
            ],
            out_specs=pl.BlockSpec(memory_space=pltpu.SMEM),   # scalar loss, resident
            scratch_shapes=[
                pltpu.VMEM((tile_n, 1), jnp.float32),          # fused weighted partial sums
            ],
        ),
        compiler_params=pltpu.CompilerParams(
            dimension_semantics=("arbitrary",),                # carried accumulator
        ),
    )(output, lab)
    return loss[0, 0]


def _reference_loss(output, labels, p=0.5, scale_wrong=2.0, scale_true=2.0):
    """Pure-JAX reference mirroring the PyTorch forward, for a sanity check."""
    temp_out = jnp.where(output > 0, output * scale_wrong, 0.0)
    onehot = jax.nn.one_hot(labels, output.shape[1], dtype=bool)
    row_mean = jnp.mean(output, axis=1, keepdims=True)
    x_j = jnp.take_along_axis(output, labels[:, None], axis=1)
    val = jnp.maximum(jnp.abs(row_mean), jnp.abs(x_j)) * scale_true
    temp_labels = jnp.where(onehot, val, 0.0)
    l1 = jnp.mean(jnp.abs(temp_out - temp_labels))
    logits = output - 1.0
    logp = jax.nn.log_softmax(logits, axis=1)
    ce = -jnp.mean(jnp.take_along_axis(logp, labels[:, None], axis=1))
    return p * l1 + (1.0 - p) * ce


if __name__ == "__main__":
    key = jax.random.PRNGKey(0)
    k1, k2 = jax.random.split(key)

    # MNIST-style logits: 10 classes, modest batch.
    N, C = 300, 10
    output = jax.random.normal(k1, (N, C), dtype=jnp.float32)
    labels = jax.random.randint(k2, (N,), 0, C, dtype=jnp.int32)

    ref = _reference_loss(output, labels)

    # Default path: whole batch in a single block (grid == 1, no mask, no wrapper ops).
    loss = jax.block_until_ready(custom_loss(output, labels))
    assert jnp.allclose(loss, ref, rtol=1e-5, atol=1e-5), (loss, ref)

    # Multi-tile path with a ragged last tile (300 = 2*128 + 44): exercises the carried
    # accumulator and the last-tile-only masking.
    loss_tiled = jax.block_until_ready(custom_loss(output, labels, tile_n=128))
    assert jnp.allclose(loss_tiled, ref, rtol=1e-5, atol=1e-5), (loss_tiled, ref)

    print("KERNEL_OK")
</pallas_src>

<mosaic_0001>
module attributes {stable_mosaic.version = 11 : i64} {
  func.func @_custom_loss_kernel(%arg0: i32, %arg1: memref<300x10xf32, #tpu.memory_space<vmem>>, %arg2: memref<300x1xi32, #tpu.memory_space<vmem>>, %arg3: memref<1x1xf32, #tpu.memory_space<smem>>, %arg4: memref<300x1xf32, #tpu.memory_space<vmem>>) attributes {dimension_semantics = [#tpu.dimension_semantics<arbitrary>], iteration_bounds = array<i64: 1>, scalar_prefetch = 0 : i64, scratch_operands = 1 : i64, tpu.core_type = #tpu.core_type<tc>, window_params = [{transform_indices = @transform_0, window_bounds = array<i64: 300, 10>}, {transform_indices = @transform_1, window_bounds = array<i64: 300, 1>}, {transform_indices = @transform_2, window_bounds = array<i64: 1, 1>}]} {
    %c0_i32 = arith.constant 0 : i32
    %0 = arith.cmpi eq, %arg0, %c0_i32 : i32
    %1 = arith.extui %0 : i1 to i32
    %c0_i32_0 = arith.constant 0 : i32
    %2 = arith.cmpi ne, %1, %c0_i32_0 : i32
    scf.if %2 {
      %cst_25 = arith.constant 0.000000e+00 : f32
      %60 = vector.broadcast %cst_25 : f32 to vector<300x1xf32>
      %c0_26 = arith.constant 0 : index
      %c0_27 = arith.constant 0 : index
      %61 = vector.load %arg4[%c0_26, %c0_27] : memref<300x1xf32, #tpu.memory_space<vmem>>, vector<300x1xf32>
      tpu.vector_store %arg4[%c0_26, %c0_27], %60 {strides = array<i32>} : memref<300x1xf32, #tpu.memory_space<vmem>>, vector<300x1xf32>,
    } else {
    }
    %c0 = arith.constant 0 : index
    %c0_1 = arith.constant 0 : index
    %3 = vector.load %arg1[%c0, %c0_1] : memref<300x10xf32, #tpu.memory_space<vmem>>, vector<300x10xf32>
    %c0_2 = arith.constant 0 : index
    %c0_3 = arith.constant 0 : index
    %4 = vector.load %arg2[%c0_2, %c0_3] : memref<300x1xi32, #tpu.memory_space<vmem>>, vector<300x1xi32>
    %5 = tpu.iota {dimensions = array<i32: 1>} : vector<300x10xi32>
    %6 = vector.broadcast %4 : vector<300x1xi32> to vector<300x10xi32>
    %7 = arith.cmpi eq, %5, %6 : vector<300x10xi32>
    %cst = arith.constant 0.000000e+00 : f32
    %8 = vector.broadcast %cst : f32 to vector<300x10xf32>
    %9 = arith.cmpf ogt, %3, %8 : vector<300x10xf32>
    %cst_4 = arith.constant 2.000000e+00 : f32
    %10 = vector.broadcast %cst_4 : f32 to vector<300x10xf32>
    %11 = arith.mulf %3, %10 : vector<300x10xf32>
    %cst_5 = arith.constant 0.000000e+00 : f32
    %12 = vector.broadcast %cst_5 : f32 to vector<300x10xf32>
    %13 = arith.select %9, %11, %12 : vector<300x10xi1>, vector<300x10xf32>
    %cst_6 = arith.constant dense<0.000000e+00> : vector<300xf32>
    %14 = vector.multi_reduction <add>, %13, %cst_6 [1] : vector<300x10xf32> to vector<300xf32>
    %15 = vector.shape_cast %14 : vector<300xf32> to vector<300x1xf32>
    %cst_7 = arith.constant dense<0.000000e+00> : vector<300xf32>
    %16 = vector.multi_reduction <add>, %3, %cst_7 [1] : vector<300x10xf32> to vector<300xf32>
    %17 = vector.shape_cast %16 : vector<300xf32> to vector<300x1xf32>
    %cst_8 = arith.constant 1.000000e-01 : f32
    %18 = vector.broadcast %cst_8 : f32 to vector<300x1xf32>
    %19 = arith.mulf %17, %18 : vector<300x1xf32>
    %cst_9 = arith.constant 0.000000e+00 : f32
    %20 = vector.broadcast %cst_9 : f32 to vector<300x10xf32>
    %21 = arith.select %7, %3, %20 : vector<300x10xi1>, vector<300x10xf32>
    %cst_10 = arith.constant dense<0.000000e+00> : vector<300xf32>
    %22 = vector.multi_reduction <add>, %21, %cst_10 [1] : vector<300x10xf32> to vector<300xf32>
    %23 = vector.shape_cast %22 : vector<300xf32> to vector<300x1xf32>
    %24 = math.absf %19 : vector<300x1xf32>
    %25 = math.absf %23 : vector<300x1xf32>
    %26 = arith.maximumf %24, %25 : vector<300x1xf32>
    %cst_11 = arith.constant 2.000000e+00 : f32
    %27 = vector.broadcast %cst_11 : f32 to vector<300x1xf32>
    %28 = arith.mulf %26, %27 : vector<300x1xf32>
    %cst_12 = arith.constant 0.000000e+00 : f32
    %29 = vector.broadcast %cst_12 : f32 to vector<300x1xf32>
    %30 = arith.cmpf ogt, %23, %29 : vector<300x1xf32>
    %cst_13 = arith.constant 2.000000e+00 : f32
    %31 = vector.broadcast %cst_13 : f32 to vector<300x1xf32>
    %32 = arith.mulf %23, %31 : vector<300x1xf32>
    %cst_14 = arith.constant 0.000000e+00 : f32
    %33 = vector.broadcast %cst_14 : f32 to vector<300x1xf32>
    %34 = arith.select %30, %32, %33 : vector<300x1xi1>, vector<300x1xf32>
    %35 = arith.subf %15, %34 : vector<300x1xf32>
    %36 = arith.subf %34, %28 : vector<300x1xf32>
    %37 = math.absf %36 : vector<300x1xf32>
    %38 = arith.addf %35, %37 : vector<300x1xf32>
    %cst_15 = arith.constant dense<0xFF800000> : vector<300xf32>
    %39 = vector.multi_reduction <maximumf>, %3, %cst_15 [1] : vector<300x10xf32> to vector<300xf32>
    %40 = vector.shape_cast %39 : vector<300xf32> to vector<300x1xf32>
    %41 = vector.broadcast %40 : vector<300x1xf32> to vector<300x10xf32>
    %42 = arith.subf %3, %41 : vector<300x10xf32>
    %43 = math.exp %42 : vector<300x10xf32>
    %cst_16 = arith.constant dense<0.000000e+00> : vector<300xf32>
    %44 = vector.multi_reduction <add>, %43, %cst_16 [1] : vector<300x10xf32> to vector<300xf32>
    %45 = vector.shape_cast %44 : vector<300xf32> to vector<300x1xf32>
    %46 = math.log %45 : vector<300x1xf32>
    %47 = arith.addf %40, %46 : vector<300x1xf32>
    %48 = arith.subf %47, %23 : vector<300x1xf32>
    %cst_17 = arith.constant 1.66666665E-4 : f32
    %49 = vector.broadcast %cst_17 : f32 to vector<300x1xf32>
    %50 = arith.mulf %49, %38 : vector<300x1xf32>
    %cst_18 = arith.constant 0.00166666671 : f32
    %51 = vector.broadcast %cst_18 : f32 to vector<300x1xf32>
    %52 = arith.mulf %51, %48 : vector<300x1xf32>
    %53 = arith.addf %50, %52 : vector<300x1xf32>
    %c0_19 = arith.constant 0 : index
    %c0_20 = arith.constant 0 : index
    %54 = vector.load %arg4[%c0_19, %c0_20] : memref<300x1xf32, #tpu.memory_space<vmem>>, vector<300x1xf32>
    %55 = arith.addf %54, %53 : vector<300x1xf32>
    %c0_21 = arith.constant 0 : index
    %c0_22 = arith.constant 0 : index
    %56 = vector.load %arg4[%c0_21, %c0_22] : memref<300x1xf32, #tpu.memory_space<vmem>>, vector<300x1xf32>
    tpu.vector_store %arg4[%c0_21, %c0_22], %55 {strides = array<i32>} : memref<300x1xf32, #tpu.memory_space<vmem>>, vector<300x1xf32>,
    %c0_i32_23 = arith.constant 0 : i32
    %57 = arith.cmpi eq, %arg0, %c0_i32_23 : i32
    %58 = arith.extui %57 : i1 to i32
    %c0_i32_24 = arith.constant 0 : i32
    %59 = arith.cmpi ne, %58, %c0_i32_24 : i32
    scf.if %59 {
      %c0_25 = arith.constant 0 : index
      %c0_26 = arith.constant 0 : index
      %60 = vector.load %arg4[%c0_25, %c0_26] : memref<300x1xf32, #tpu.memory_space<vmem>>, vector<300x1xf32>
      %61 = vector.shape_cast %60 : vector<300x1xf32> to vector<1x300x1xf32>
      %cst_27 = arith.constant dense<0.000000e+00> : vector<1xf32>
      %62 = vector.multi_reduction <add>, %61, %cst_27 [1, 2] : vector<1x300x1xf32> to vector<1xf32>
      %63 = vector.shape_cast %62 : vector<1xf32> to vector<1x1x1xf32>
      %64 = vector.extract %63[0, 0, 0] : f32 from vector<1x1x1xf32>
      %c0_28 = arith.constant 0 : index
      %c0_29 = arith.constant 0 : index
      %65 = memref.load %arg3[%c0_28, %c0_29] : memref<1x1xf32, #tpu.memory_space<smem>>
      memref.store %64, %arg3[%c0_28, %c0_29] : memref<1x1xf32, #tpu.memory_space<smem>>
    } else {
    }
    return
  }
  func.func @transform_0(%arg0: i32) -> (i32, i32) {
    %c0_i32 = arith.constant 0 : i32
    %c0_i32_0 = arith.constant 0 : i32
    return %arg0, %c0_i32 : i32, i32
  }
  func.func @transform_1(%arg0: i32) -> (i32, i32) {
    %c0_i32 = arith.constant 0 : i32
    %c0_i32_0 = arith.constant 0 : i32
    return %arg0, %c0_i32 : i32, i32
  }
  func.func @transform_2(%arg0: i32) -> (i32, i32) {
    %c0_i32 = arith.constant 0 : i32
    %c0_i32_0 = arith.constant 0 : i32
    %c0_i32_1 = arith.constant 0 : i32
    return %c0_i32, %c0_i32_0 : i32, i32
  }
}

</mosaic_0001>

<bundles_post_ra>
// kernel: tpu_custom_call.1
= control target key start
LH: loop header
LB: loop body
LE: loop exit
PB: predicated region body
PF: predicated region fallthrough
CT: control target
= control target key end

     0   :  { %v2301_v2 = vmov 0   ;;  %s4167_s0 = inlined_call_operand.vmem [shape: f32[300,10], index: 0, kind: input, shape index: {}]   ;;  %s4168_s1 = inlined_call_operand.vmem [shape: s32[300,1], index: 1, kind: input, shape index: {}]   ;;  %s4169_s2 = inlined_call_operand.hbm [shape: f32[1,1], index: 2, kind: output, shape index: {}]  }
   0x1   :  { %v96_v0 = vld [vmem:[%s4168_s1 + $0x10] sm:$0xff]  ;;  %v94_v1 = vld [vmem:[%s4168_s1] sm:$0xff]  ;;  %2108 = vset.pattern.permute.xlu1 %v2301_v2  ;;  %2107 = vset.pattern.permute.xlu0 %v2301_v2  ;;  %v97_v3 = vld [vmem:[%s4168_s1 + $0x18] sm:$0xff] }
   0x2   :  { %141 = vperm.xlu1 %2108, %v96_v0   ;;  %135 = vperm.xlu0 %2107, %v94_v1   ;;  %v95_v4 = vld [vmem:[%s4168_s1 + $0x8] sm:$0xff]  ;;  %v98_v6 = vld [vmem:[%s4168_s1 + $0x20] sm:$0xff]  ;;  %v101_v7 = vld [vmem:[%s4168_s1 + $0x38] sm:$0xff] }
   0x3   :  { %v99_v5 = vld [vmem:[%s4168_s1 + $0x28] sm:$0xff]  ;;  %v100_v8 = vld [vmem:[%s4168_s1 + $0x30] sm:$0xff] }
   0x6   :  { %144 = vperm.xlu1 %2108, %v97_v3   ;;  %138 = vperm.xlu0 %2107, %v95_v4  }
   0xa   :  { %150 = vperm.xlu1 %2108, %v99_v5   ;;  %147 = vperm.xlu0 %2107, %v98_v6  }
   0xb   :  { %7 = vsyncpa [#allocation4], 0  ;;  %v103_v9 = vld [vmem:[%s4168_s1 + $0x48] sm:$0xff]  ;;  %v102_v10 = vld [vmem:[%s4168_s1 + $0x40] sm:$0xff]  ;;  %vm400_vm0 = vcmask 80896   ;;  %vm512_vm1 = vcmask 76800  }
   0xc   :  { %v104_v11 = vld [vmem:[%s4168_s1 + $0x50] sm:$0xff]  ;;  %v106_v12 = vld [vmem:[%s4168_s1 + $0x60] sm:$0xff]  ;;  %v2386_v22 = vld [vmem:[%s4167_s0 + $0x18] sm:$0xff]  ;;  %vm16_vm10 = vcmask 7168   ;;  %s2303_s22 = smov [#allocation3]  }
   0xd   :  { %v108_v13 = vld [vmem:[%s4168_s1 + $0x70] sm:$0xff]  ;;  %v110_v14 = vld [vmem:[%s4168_s1 + $0x80] sm:$0xff]  ;;  %v1247_v24 = vsel %vm400_vm0, %v2386_v22, -inf  ;;  %v2396_v25 = vld [vmem:[%s4167_s0 + $0x28] sm:$0xff]  ;;  %vm289_vm12 = vcmp.gt.f32.partialorder %v2386_v22, 0.0 }
   0xe   :  { %156 = vperm.xlu1 %2108, %v101_v7   ;;  %153 = vperm.xlu0 %2107, %v100_v8   ;;  %v112_v15 = vld [vmem:[%s4168_s1 + $0x90] sm:$0xff]  ;;  %v114_v16 = vld [vmem:[%s4168_s1 + $0xa0] sm:$0xff]  ;;  %v1253_v27 = vsel %vm400_vm0, %v2396_v25, -inf  ;;  %v2406_v28 = vld [vmem:[%s4167_s0 + $0x38] sm:$0xff] }
   0xf   :  { %v116_v17 = vld [vmem:[%s4168_s1 + $0xb0] sm:$0xff]  ;;  %v118_v18 = vld [vmem:[%s4168_s1 + $0xc0] sm:$0xff]  ;;  %v1259_v30 = vsel %vm400_vm0, %v2406_v28, -inf  ;;  %v2416_v31 = vld [vmem:[%s4167_s0 + $0x48] sm:$0xff] }
  0x10   :  { %v2376_v19 = vld [vmem:[%s4167_s0] sm:$0xff]  ;;  %v120_v20 = vld [vmem:[%s4168_s1 + $0xd0] sm:$0xff]  ;;  %v1265_v33 = vsel %vm400_vm0, %v2416_v31, -inf  ;;  %v2426_v34 = vld [vmem:[%s4167_s0 + $0x58] sm:$0xff] }
  0x11   :  { %v1238_v21 = vsel %vm400_vm0, %v2376_v19, -inf  ;;  %v122_v23 = vld [vmem:[%s4168_s1 + $0xe0] sm:$0xff]  ;;  %v124_v26 = vld [vmem:[%s4168_s1 + $0xf0] sm:$0xff]  ;;  %v1271_v36 = vsel %vm400_vm0, %v2426_v34, -inf  ;;  %v2436_v37 = vld [vmem:[%s4167_s0 + $0x68] sm:$0xff]  ;;  %vm286_vm7 = vcmp.gt.f32.partialorder %v2376_v19, 0.0 }
  0x12   :  { %162 = vperm.xlu1 %2108, %v103_v9   ;;  %159 = vperm.xlu0 %2107, %v102_v10   ;;  %v126_v29 = vld [vmem:[%s4168_s1 + $0x100] sm:$0xff]  ;;  %v128_v32 = vld [vmem:[%s4168_s1 + $0x110] sm:$0xff]  ;;  %v1277_v38 = vsel %vm400_vm0, %v2436_v37, -inf  ;;  %v2443_v39 = vld [vmem:[%s4167_s0 + $0x78] sm:$0xff] }
  0x13   :  { %v130_v35 = vld [vmem:[%s4168_s1 + $0x120] sm:$0xff]  ;;  %v2448_v40 = vld [vmem:[%s4167_s0 + $0x88] sm:$0xff]  ;;  %v1283_v41 = vsel %vm400_vm0, %v2443_v39, -inf  ;;  %v2457_v43 = vld [vmem:[%s4167_s0 + $0x98] sm:$0xff] }
  0x14   :  { %v1289_v42 = vsel %vm400_vm0, %v2448_v40, -inf  ;;  %v1295_v44 = vsel %vm400_vm0, %v2457_v43, -inf  ;;  %v2464_v45 = vld [vmem:[%s4167_s0 + $0xa8] sm:$0xff]  ;;  %v2471_v47 = vld [vmem:[%s4167_s0 + $0xb8] sm:$0xff]  ;;  %v2492_v53 = vld [vmem:[%s4167_s0 + $0x10] sm:$0xff] }
  0x15   :  { %v1301_v46 = vsel %vm400_vm0, %v2464_v45, -inf  ;;  %v1307_v48 = vsel %vm400_vm0, %v2471_v47, -inf  ;;  %v2478_v49 = vld [vmem:[%s4167_s0 + $0x8] sm:$0xff]  ;;  %v83_v54 = vld [vmem:[%s4167_s0 + $0xd8] sm:$0xff]  ;;  %v1244_v55 = vsel %vm400_vm0, %v2492_v53, -inf  ;;  %v2503_v57 = vld [vmem:[%s4167_s0 + $0x20] sm:$0xff] }
  0x16   :  { %165 = vperm.xlu0 %2107, %v104_v11   ;;  %v2483_v50 = vld [vmem:[%s4167_s0 + $0xc8] sm:$0xff]  ;;  %v1241_v51 = vsel %vm400_vm0, %v2478_v49, -inf  ;;  %v1319_v56 = vsel %vm400_vm0, %v83_v54, -inf  ;;  %v1250_v58 = vsel %vm400_vm0, %v2503_v57, -inf  ;;  %v2510_v59 = vld [vmem:[%s4167_s0 + $0x30] sm:$0xff]  ;;  %v87_v63 = vld [vmem:[%s4167_s0 + $0xf8] sm:$0xff] }
  0x17   :  { %v1313_v52 = vsel %vm400_vm0, %v2483_v50, -inf  ;;  %v85_v60 = vld [vmem:[%s4167_s0 + $0xe8] sm:$0xff]  ;;  %v1256_v62 = vsel %vm400_vm0, %v2510_v59, -inf  ;;  %v2524_v0 = vld [vmem:[%s4167_s0 + $0x40] sm:$0xff]  ;;  %v1331_v1 = vsel %vm400_vm0, %v87_v63, -inf  ;;  %v2535_v4 = vld [vmem:[%s4167_s0 + $0x50] sm:$0xff] }
  0x18   :  { %v1325_v61 = vsel %vm400_vm0, %v85_v60, -inf  ;;  %v1262_v2 = vsel %vm400_vm0, %v2524_v0, -inf  ;;  %v89_v3 = vld [vmem:[%s4167_s0 + $0x108] sm:$0xff]  ;;  %v1268_v6 = vsel %vm400_vm0, %v2535_v4, -inf  ;;  %v91_v7 = vld [vmem:[%s4167_s0 + $0x118] sm:$0xff]  ;;  %v2546_v8 = vld [vmem:[%s4167_s0 + $0x60] sm:$0xff] }
  0x19   :  { %v1337_v5 = vsel %vm400_vm0, %v89_v3, -inf  ;;  %v1343_v9 = vsel %vm400_vm0, %v91_v7, -inf  ;;  %v1274_v10 = vsel %vm400_vm0, %v2546_v8, -inf  ;;  %v93_v11 = vld [vmem:[%s4167_s0 + $0x128] sm:$0xf]  ;;  %vm288_vm9 = vcmp.gt.f32.partialorder %v2492_v53, 0.0 }
  0x1a   :  { %171 = vperm.xlu0 %2107, %v106_v12   ;;  %v1349_v12 = vsel %vm512_vm1, %v93_v11, -inf  ;;  %vm287_vm13 = vcmp.gt.f32.partialorder %v2478_v49, 0.0  ;;  %vm290_vm15 = vcmp.gt.f32.partialorder %v2503_v57, 0.0 }
  0x1e   :  { %177 = vperm.xlu0 %2107, %v108_v13   ;;  %v2558_v13 = vld [vmem:[%s4167_s0 + $0x70] sm:$0xff] }
  0x22   :  { %183 = vperm.xlu0 %2107, %v110_v14  }
  0x26   :  { %189 = vperm.xlu0 %2107, %v112_v15   ;;  %v1280_v15 = vsel %vm400_vm0, %v2558_v13, -inf }
  0x2a   :  { %195 = vperm.xlu0 %2107, %v114_v16   ;;  %v2567_v16 = vld [vmem:[%s4167_s0 + $0x80] sm:$0xff] }
  0x2e   :  { %201 = vperm.xlu0 %2107, %v116_v17   ;;  %v1286_v17 = vsel %vm400_vm0, %v2567_v16, -inf }
  0x32   :  { %207 = vperm.xlu0 %2107, %v118_v18  }
  0x36   :  { %213 = vperm.xlu0 %2107, %v120_v20   ;;  %1239 = vmax.xlane.f32.xlu1 %v1238_v21  ;;  %v2576_v20 = vld [vmem:[%s4167_s0 + $0x90] sm:$0xff] }
  0x37   :  { %v1292_v21 = vsel %vm400_vm0, %v2576_v20, -inf }
  0x3a   :  { %219 = vperm.xlu0 %2107, %v122_v23   ;;  %1248 = vmax.xlane.f32.xlu1 %v1247_v24  ;;  %v2583_v23 = vld [vmem:[%s4167_s0 + $0xa0] sm:$0xff] }
  0x3e   :  { %225 = vperm.xlu0 %2107, %v124_v26   ;;  %1254 = vmax.xlane.f32.xlu1 %v1253_v27  ;;  %v1298_v26 = vsel %vm400_vm0, %v2583_v23, -inf  ;;  %v2592_v27 = vld [vmem:[%s4167_s0 + $0xb0] sm:$0xff] }
  0x42   :  { %231 = vperm.xlu0 %2107, %v126_v29   ;;  %1260 = vmax.xlane.f32.xlu1 %v1259_v30  ;;  %v1304_v29 = vsel %vm400_vm0, %v2592_v27, -inf }
  0x46   :  { %237 = vperm.xlu0 %2107, %v128_v32   ;;  %1266 = vmax.xlane.f32.xlu1 %v1265_v33  ;;  %v2601_v32 = vld [vmem:[%s4167_s0 + $0xc0] sm:$0xff] }
  0x47   :  { %v1310_v33 = vsel %vm400_vm0, %v2601_v32, -inf }
  0x4a   :  { %243 = vperm.xlu0 %2107, %v130_v35   ;;  %1272 = vmax.xlane.f32.xlu1 %v1271_v36  ;;  %v2608_v35 = vld [vmem:[%s4167_s0 + $0xd0] sm:$0xff] }
  0x4e   :  { %1278 = vmax.xlane.f32.xlu1 %v1277_v38  ;;  %v1316_v38 = vsel %vm400_vm0, %v2608_v35, -inf }
  0x52   :  { %1284 = vmax.xlane.f32.xlu1 %v1283_v41  ;;  %v84_v41 = vld [vmem:[%s4167_s0 + $0xe0] sm:$0xff] }
  0x56   :  { %1290 = vmax.xlane.f32.xlu1 %v1289_v42  ;;  %v1322_v42 = vsel %vm400_vm0, %v84_v41, -inf }
  0x5a   :  { %1296 = vmax.xlane.f32.xlu1 %v1295_v44 }
  0x5e   :  { %1302 = vmax.xlane.f32.xlu1 %v1301_v46  ;;  %v86_v46 = vld [vmem:[%s4167_s0 + $0xf0] sm:$0xff] }
  0x62   :  { %1308 = vmax.xlane.f32.xlu1 %v1307_v48  ;;  %v1328_v48 = vsel %vm400_vm0, %v86_v46, -inf }
  0x66   :  { %1314 = vmax.xlane.f32.xlu1 %v1313_v52  ;;  %v88_v52 = vld [vmem:[%s4167_s0 + $0x100] sm:$0xff] }
  0x69   :  { %1242 = vmax.xlane.f32.xlu0 %v1241_v51 }
  0x6a   :  { %1320 = vmax.xlane.f32.xlu1 %v1319_v56 }
  0x6d   :  { %1245 = vmax.xlane.f32.xlu0 %v1244_v55  ;;  %v1334_v55 = vsel %vm400_vm0, %v88_v52, -inf }
  0x6e   :  { %1326 = vmax.xlane.f32.xlu1 %v1325_v61 }
  0x71   :  { %1251 = vmax.xlane.f32.xlu0 %v1250_v58  ;;  %v90_v58 = vld [vmem:[%s4167_s0 + $0x110] sm:$0xff] }
  0x72   :  { %1332 = vmax.xlane.f32.xlu1 %v1331_v1  ;;  %v1340_v60 = vsel %vm400_vm0, %v90_v58, -inf }
  0x75   :  { %1257 = vmax.xlane.f32.xlu0 %v1256_v62  ;;  %v92_v62 = vld [vmem:[%s4167_s0 + $0x120] sm:$0xff] }
  0x76   :  { %1338 = vmax.xlane.f32.xlu1 %v1337_v5  ;;  %v1346_v63 = vsel %vm400_vm0, %v92_v62, -inf }
  0x79   :  { %1263 = vmax.xlane.f32.xlu0 %v1262_v2 }
  0x7a   :  { %1344 = vmax.xlane.f32.xlu1 %v1343_v9 }
  0x7d   :  { %1269 = vmax.xlane.f32.xlu0 %v1268_v6  ;;  %v2560_v14 = vpop.permute.xlu0 %135  ;;  %v2624_v51 = vpop.permute.xlu1 %141 }
  0x7e   :  { %1350 = vmax.xlane.f32.xlu1 %v1349_v12 }
  0x81   :  { %1275 = vmax.xlane.f32.xlu0 %v1274_v10  ;;  %v2571_v18 = vpop.permute.xlu0 %138  ;;  %v2632_v56 = vpop.permute.xlu1 %144 }
  0x85   :  { %1281 = vmax.xlane.f32.xlu0 %v1280_v15  ;;  %v2585_v24 = vpop.permute.xlu0 %147  ;;  %v2644_v1 = vpop.permute.xlu1 %150 }
  0x89   :  { %1287 = vmax.xlane.f32.xlu0 %v1286_v17  ;;  %v2596_v30 = vpop.permute.xlu0 %153  ;;  %v2648_v3 = vpop.permute.xlu1 %156 }
  0x8d   :  { %1293 = vmax.xlane.f32.xlu0 %v1292_v21  ;;  %v2610_v36 = vpop.permute.xlu0 %159  ;;  %v2652_v6 = vpop.permute.xlu1 %162 }
  0x91   :  { %1299 = vmax.xlane.f32.xlu0 %v1298_v26  ;;  %v2618_v44 = vpop.permute.xlu0 %165 }
  0x95   :  { %1305 = vmax.xlane.f32.xlu0 %v1304_v29  ;;  %v2629_v54 = vpop.permute.xlu0 %171 }
  0x99   :  { %1311 = vmax.xlane.f32.xlu0 %v1310_v33  ;;  %v2638_v61 = vpop.permute.xlu0 %177 }
  0x9d   :  { %1317 = vmax.xlane.f32.xlu0 %v1316_v38  ;;  %v2646_v2 = vpop.permute.xlu0 %183 }
  0xa1   :  { %1323 = vmax.xlane.f32.xlu0 %v1322_v42  ;;  %v2650_v5 = vpop.permute.xlu0 %189 }
  0xa5   :  { %1329 = vmax.xlane.f32.xlu0 %v1328_v48  ;;  %v2654_v7 = vpop.permute.xlu0 %195 }
  0xa9   :  { %1335 = vmax.xlane.f32.xlu0 %v1334_v55  ;;  %v2660_v12 = vpop.permute.xlu0 %201 }
  0xaa   :  { %4215 = vst [vmem:[#allocation6_spill] sm:$0xff] %v2660_v12 }
  0xad   :  { %1341 = vmax.xlane.f32.xlu0 %v1340_v60  ;;  %v2662_v15 = vpop.permute.xlu0 %207 }
  0xae   :  { %4216 = vst [vmem:[#allocation7_spill] sm:$0xff] %v2662_v15 }
  0xb1   :  { %1347 = vmax.xlane.f32.xlu0 %v1346_v63  ;;  %v2664_v17 = vpop.permute.xlu0 %213 }
  0xb2   :  { %4217 = vst [vmem:[#allocation8_spill] sm:$0xff] %v2664_v17 }
  0xb5   :  { %v2667_v29 = vpop.permute.xlu0 %219 }
  0xb6   :  { %4218 = vst [vmem:[#allocation9_spill] sm:$0xff] %v2667_v29 }
  0xb9   :  { %v2669_v33 = vpop.permute.xlu0 %225 }
  0xba   :  { %4219 = vst [vmem:[#allocation10_spill] sm:$0xff] %v2669_v33 }
  0xbd   :  { %v2671_v38 = vpop.permute.xlu0 %231 }
  0xbe   :  { %4220 = vst [vmem:[#allocation11_spill] sm:$0xff] %v2671_v38 }
  0xbf   :  { %v2656_v9 = vpop.xlane.xlu1 %1239 }
  0xc0   :  { %v1352_v10 = vsub.f32 %v2376_v19, %v2656_v9 }
  0xc1   :  { %v2673_v41 = vpop.permute.xlu0 %237 }
  0xc2   :  { %v1390_v11 = vmul.f32 1.442695, %v1352_v10  ;;  %4221 = vst [vmem:[#allocation12_spill] sm:$0xff] %v2673_v41 }
  0xc3   :  { %v2677_v46 = vpop.xlane.xlu1 %1248 }
  0xc4   :  { %2109 = vpow2.f32 %v1390_v11  ;;  %v1355_v52 = vsub.f32 %v2386_v22, %v2677_v46 }
  0xc5   :  { %v2675_v42 = vpop.permute.xlu0 %243 }
  0xc6   :  { %4222 = vst [vmem:[#allocation13_spill] sm:$0xff] %v2675_v42  ;;  %v1396_v62 = vmul.f32 1.442695, %v1355_v52 }
  0xd1   :  { %v2110_v21 = vpop.eup %2109 }
  0xd2   :  { %v1466_v26 = vsel %vm400_vm0, %v2110_v21, 0.0 }
  0xd3   :  { %1467 = vadd.xlane.f32.xlu0 %v1466_v26  ;;  %v2693_v26 = vpop.xlane.xlu1 %1254 }
  0xd7   :  { %v2704_v33 = vpop.xlane.xlu1 %1260 }
  0xd8   :  { %4225 = vst [vmem:[#allocation16_spill] sm:$0xff] %v2704_v33  ;;  %v1359_v17 = vsub.f32 %v2406_v28, %v2704_v33 }
  0xf2   :  { %v2679_v48 = vpop.xlane.xlu0 %1242 }
  0xf3   :  { %4223 = vst [vmem:[#allocation14_spill] sm:$0xff] %v2679_v48  ;;  %v1353_v55 = vsub.f32 %v2478_v49, %v2679_v48 }
  0xf5   :  { %v1392_v58 = vmul.f32 1.442695, %v1353_v55  ;;  %v1357_v55 = vsub.f32 %v2396_v25, %v2693_v26 }
  0xf6   :  { %v2685_v60 = vpop.xlane.xlu0 %1245 }
  0xf7   :  { %2111 = vpow2.f32 %v1392_v58  ;;  %v1354_v63 = vsub.f32 %v2492_v53, %v2685_v60  ;;  %v1400_v52 = vmul.f32 1.442695, %v1357_v55 }
  0xf8   :  { %2113 = vpow2.f32 %v1396_v62  ;;  %v132_v62 = vlaneseq }
  0xf9   :  { %v1394_v10 = vmul.f32 1.442695, %v1354_v63 }
  0xfa   :  { %v2689_v11 = vpop.xlane.xlu0 %1251  ;;  %v2707_v29 = vand.u32 127, %v132_v62  ;;  %v522_v62 = vsel %vm400_vm0, %v2492_v53, 0.0 }
  0xfb   :  { %2115 = vpow2.f32 %v1394_v10  ;;  %v1356_v21 = vsub.f32 %v2503_v57, %v2689_v11  ;;  %v519_v10 = vsel %vm400_vm0, %v2478_v49, 0.0 }
  0xfc   :  { %vm248_vm2 = vcmp.eq.s32.totalorder %v2707_v29, %v2560_v14  ;;  %vm249_vm3 = vcmp.eq.s32.totalorder %v2707_v29, %v2571_v18  ;;  %vm250_vm4 = vcmp.eq.s32.totalorder %v2707_v29, %v2624_v51  ;;  %vm251_vm5 = vcmp.eq.s32.totalorder %v2707_v29, %v2632_v56 }
  0xfd   :  { %v1398_v42 = vmul.f32 1.442695, %v1356_v21  ;;  %vm252_vm6 = vcmp.eq.s32.totalorder %v2707_v29, %v2585_v24  ;;  %vm253_vm8 = vcmp.eq.s32.totalorder %v2707_v29, %v2644_v1  ;;  %v111_v1 = vld [vmem:[%s4168_s1 + $0x88] sm:$0xff]  ;;  %vm254_vm11 = vcmp.eq.s32.totalorder %v2707_v29, %v2596_v30 }
  0xfe   :  { %v2697_v41 = vpop.xlane.xlu0 %1257  ;;  %vm255_vm14 = vcmp.eq.s32.totalorder %v2707_v29, %v2648_v3 }
  0xff   :  { %2117 = vpow2.f32 %v1398_v42  ;;  %4224 = vst [vmem:[#allocation15_spill] sm:$0xff] %v2697_v41  ;;  %v1358_v21 = vsub.f32 %v2510_v59, %v2697_v41  ;;  %v555_v41 = vsel %vm400_vm0, %v2436_v37, 0.0 }
 0x100   :  { %2119 = vpow2.f32 %v1400_v52  ;;  %v516_v52 = vsel %vm400_vm0, %v2376_v19, 0.0 }
 0x104   :  { %v2112_v58 = vpop.eup %2111 }
 0x105   :  { %v1469_v63 = vsel %vm400_vm0, %v2112_v58, 0.0  ;;  %v2114_v38 = vpop.eup %2113  ;;  %v1402_v58 = vmul.f32 1.442695, %v1358_v21  ;;  %v669_v21 = vsel %vm249_vm3, %v2478_v49, 0.0  ;;  %vm291_vm3 = vcmp.gt.f32.partialorder %v2396_v25, 0.0 }
 0x106   :  { %1470 = vadd.xlane.f32.xlu1 %v1469_v63  ;;  %v1475_v63 = vsel %vm400_vm0, %v2114_v38, 0.0  ;;  %v1404_v38 = vmul.f32 1.442695, %v1359_v17  ;;  %v709_v18 = vsel %vm400_vm0, %v669_v21, 0.0 }
 0x107   :  { %2121 = vpow2.f32 %v1402_v58 }
 0x108   :  { %v2116_v42 = vpop.eup %2115  ;;  %2123 = vpow2.f32 %v1404_v38 }
 0x109   :  { %v1472_v55 = vsel %vm400_vm0, %v2116_v42, 0.0  ;;  %v668_v42 = vsel %vm248_vm2, %v2376_v19, 0.0  ;;  %vm256_vm2 = vcmp.eq.s32.totalorder %v2707_v29, %v2610_v36 }
 0x10a   :  { %520 = vadd.xlane.f32.xlu1 %v519_v10  ;;  %1473 = vadd.xlane.f32.xlu0 %v1472_v55  ;;  %v2723_v55 = vpop.xlane.xlu0 %1263  ;;  %v706_v58 = vsel %vm400_vm0, %v668_v42, 0.0  ;;  %v528_v42 = vsel %vm400_vm0, %v2503_v57, 0.0 }
 0x10b   :  { %4226 = vst [vmem:[#allocation17_spill] sm:$0xff] %v2723_v55 }
 0x10c   :  { %v2118_v15 = vpop.eup %2117 }
 0x10d   :  { %v1478_v10 = vsel %vm400_vm0, %v2118_v15, 0.0  ;;  %v2120_v14 = vpop.eup %2119  ;;  %v525_v15 = vsel %vm400_vm0, %v2386_v22, 0.0 }
 0x10e   :  { %1476 = vadd.xlane.f32.xlu1 %v1475_v63  ;;  %517 = vadd.xlane.f32.xlu0 %v516_v52  ;;  %v1481_v17 = vsel %vm400_vm0, %v2120_v14, 0.0  ;;  %v1360_v63 = vsub.f32 %v2524_v0, %v2723_v55  ;;  %v671_v52 = vsel %vm251_vm5, %v2386_v22, 0.0  ;;  %vm292_vm5 = vcmp.gt.f32.partialorder %v2510_v59, 0.0 }
 0x110   :  { %v1406_v51 = vmul.f32 1.442695, %v1360_v63  ;;  %v672_v63 = vsel %vm252_vm6, %v2503_v57, 0.0  ;;  %vm258_vm6 = vcmp.eq.s32.totalorder %v2707_v29, %v2618_v44 }
 0x112   :  { %523 = vadd.xlane.f32.xlu1 %v522_v62  ;;  %1479 = vadd.xlane.f32.xlu0 %v1478_v10  ;;  %v670_v62 = vsel %vm250_vm4, %v2492_v53, 0.0  ;;  %v715_v10 = vsel %vm400_vm0, %v671_v52, 0.0  ;;  %2125 = vpow2.f32 %v1406_v51  ;;  %v324_v51 = vmul.f32 2.0, %v2376_v19 }
 0x113   :  { %v712_v56 = vsel %vm400_vm0, %v670_v62, 0.0  ;;  %vm257_vm4 = vcmp.eq.s32.totalorder %v2707_v29, %v2652_v6 }
 0x114   :  { %v2122_v38 = vpop.eup %2121 }
 0x115   :  { %v1484_v21 = vsel %vm400_vm0, %v2122_v38, 0.0  ;;  %v2124_v14 = vpop.eup %2123  ;;  %v718_v38 = vsel %vm400_vm0, %v672_v63, 0.0 }
 0x116   :  { %710 = vadd.xlane.f32.xlu1 %v709_v18  ;;  %707 = vadd.xlane.f32.xlu0 %v706_v58  ;;  %v1487_v18 = vsel %vm400_vm0, %v2124_v14, 0.0  ;;  %v2744_v58 = vpop.xlane.xlu1 %1266  ;;  %v2764_v14 = vpop.xlane.xlu0 %1269 }
 0x117   :  { %4227 = vst [vmem:[#allocation18_spill] sm:$0xff] %v2744_v58  ;;  %4228 = vst [vmem:[#allocation19_spill] sm:$0xff] %v2764_v14  ;;  %v1362_v19 = vsub.f32 %v2535_v4, %v2764_v14 }
 0x119   :  { %v1410_v63 = vmul.f32 1.442695, %v1362_v19  ;;  %v4176_v19 = vmov 0.0  }
 0x11a   :  { %526 = vadd.xlane.f32.xlu1 %v525_v15  ;;  %1482 = vadd.xlane.f32.xlu0 %v1481_v17  ;;  %v531_v15 = vsel %vm400_vm0, %v2396_v25, 0.0  ;;  %v1361_v17 = vsub.f32 %v2416_v31, %v2744_v58  ;;  %17 = vst.msk [vmem:[#allocation2] sm:$0xff] %vm16_vm10, %v4176_v19  ;;  %18 = vst.msk [vmem:[#allocation2 + $0x8] sm:$0xff] %vm16_vm10, %v4176_v19 }
 0x11b   :  { %19 = vst.msk [vmem:[#allocation2 + $0x10] sm:$0xff] %vm16_vm10, %v4176_v19  ;;  %20 = vst.msk [vmem:[#allocation2 + $0x18] sm:$0xff] %vm16_vm10, %v4176_v19 }
 0x11c   :  { %v1408_v52 = vmul.f32 1.442695, %v1361_v17  ;;  %v673_v17 = vsel %vm253_vm8, %v2396_v25, 0.0  ;;  %21 = vst.msk [vmem:[#allocation2 + $0x20] sm:$0xff] %vm16_vm10, %v4176_v19  ;;  %22 = vst.msk [vmem:[#allocation2 + $0x28] sm:$0xff] %vm16_vm10, %v4176_v19  ;;  %vm294_vm8 = vcmp.gt.f32.partialorder %v2524_v0, 0.0 }
 0x11d   :  { %23 = vst.msk [vmem:[#allocation2 + $0x30] sm:$0xff] %vm16_vm10, %v4176_v19  ;;  %24 = vst.msk [vmem:[#allocation2 + $0x38] sm:$0xff] %vm16_vm10, %v4176_v19 }
 0x11e   :  { %716 = vadd.xlane.f32.xlu1 %v715_v10  ;;  %713 = vadd.xlane.f32.xlu0 %v712_v56  ;;  %2127 = vpow2.f32 %v1408_v52  ;;  %v105_v10 = vld [vmem:[%s4168_s1 + $0x58] sm:$0xff]  ;;  %v362_v56 = vsel %vm286_vm7, %v324_v51, 0.0  ;;  %v721_v51 = vsel %vm400_vm0, %v673_v17, 0.0  ;;  %25 = vst.msk [vmem:[#allocation2 + $0x40] sm:$0xff] %vm16_vm10, %v4176_v19  ;;  %26 = vst.msk [vmem:[#allocation2 + $0x48] sm:$0xff] %vm16_vm10, %v4176_v19  ;;  %vm293_vm7 = vcmp.gt.f32.partialorder %v2406_v28, 0.0 }
 0x11f   :  { %v2126_v62 = vpop.eup %2125  ;;  %2129 = vpow2.f32 %v1410_v63  ;;  %27 = vst.msk [vmem:[#allocation2 + $0x50] sm:$0xff] %vm16_vm10, %v4176_v19  ;;  %28 = vst.msk [vmem:[#allocation2 + $0x58] sm:$0xff] %vm16_vm10, %v4176_v19 }
 0x120   :  { %v1490_v24 = vsel %vm400_vm0, %v2126_v62, 0.0  ;;  %v326_v62 = vmul.f32 2.0, %v2492_v53  ;;  %29 = vst.msk [vmem:[#allocation2 + $0x60] sm:$0xff] %vm16_vm10, %v4176_v19  ;;  %30 = vst.msk [vmem:[#allocation2 + $0x68] sm:$0xff] %vm16_vm10, %v4176_v19 }
 0x121   :  { %31 = vst.msk [vmem:[#allocation2 + $0x70] sm:$0xff] %vm16_vm10, %v4176_v19  ;;  %32 = vst.msk [vmem:[#allocation2 + $0x78] sm:$0xff] %vm16_vm10, %v4176_v19 }
 0x122   :  { %1485 = vadd.xlane.f32.xlu1 %v1484_v21  ;;  %529 = vadd.xlane.f32.xlu0 %v528_v42  ;;  %v401_v21 = vsel %vm400_vm0, %v362_v56, 0.0  ;;  %v107_v42 = vld [vmem:[%s4168_s1 + $0x68] sm:$0xff]  ;;  %v364_v56 = vsel %vm288_vm9, %v326_v62, 0.0  ;;  %33 = vst.msk [vmem:[#allocation2 + $0x80] sm:$0xff] %vm16_vm10, %v4176_v19  ;;  %34 = vst.msk [vmem:[#allocation2 + $0x88] sm:$0xff] %vm16_vm10, %v4176_v19  ;;  %v117_v62 = vld [vmem:[%s4168_s1 + $0xb8] sm:$0xff] }
 0x123   :  { %35 = vst.msk [vmem:[#allocation2 + $0x90] sm:$0xff] %vm16_vm10, %v4176_v19  ;;  %36 = vst.msk [vmem:[#allocation2 + $0x98] sm:$0xff] %vm16_vm10, %v4176_v19  ;;  %v407_v53 = vsel %vm400_vm0, %v364_v56, 0.0  ;;  %v327_v56 = vmul.f32 2.0, %v2386_v22 }
 0x124   :  { %37 = vst.msk [vmem:[#allocation2 + $0xa0] sm:$0xff] %vm16_vm10, %v4176_v19  ;;  %38 = vst.msk [vmem:[#allocation2 + $0xa8] sm:$0xff] %vm16_vm10, %v4176_v19 }
 0x125   :  { %39 = vst.msk [vmem:[#allocation2 + $0xb0] sm:$0xff] %vm16_vm10, %v4176_v19  ;;  %40 = vst.msk [vmem:[#allocation2 + $0xb8] sm:$0xff] %vm16_vm10, %v4176_v19 }
 0x126   :  { %1488 = vadd.xlane.f32.xlu0 %v1487_v18  ;;  %v534_v18 = vsel %vm400_vm0, %v2510_v59, 0.0  ;;  %41 = vst.msk [vmem:[#allocation2 + $0xc0] sm:$0xff] %vm16_vm10, %v4176_v19  ;;  %42 = vst.msk [vmem:[#allocation2 + $0xc8] sm:$0xff] %vm16_vm10, %v4176_v19 }
 0x127   :  { %43 = vst.msk [vmem:[#allocation2 + $0xd0] sm:$0xff] %vm16_vm10, %v4176_v19  ;;  %44 = vst.msk [vmem:[#allocation2 + $0xd8] sm:$0xff] %vm16_vm10, %v4176_v19 }
 0x128   :  { %45 = vst.msk [vmem:[#allocation2 + $0xe0] sm:$0xff] %vm16_vm10, %v4176_v19  ;;  %46 = vst.msk [vmem:[#allocation2 + $0xe8] sm:$0xff] %vm16_vm10, %v4176_v19 }
 0x129   :  { %47 = vst.msk [vmem:[#allocation2 + $0xf0] sm:$0xff] %vm16_vm10, %v4176_v19  ;;  %48 = vst.msk [vmem:[#allocation2 + $0xf8] sm:$0xff] %vm16_vm10, %v4176_v19 }
 0x12a   :  { %532 = vadd.xlane.f32.xlu0 %v531_v15  ;;  %v109_v15 = vld [vmem:[%s4168_s1 + $0x78] sm:$0xff]  ;;  %49 = vst.msk [vmem:[#allocation2 + $0x100] sm:$0xff] %vm16_vm10, %v4176_v19  ;;  %50 = vst.msk [vmem:[#allocation2 + $0x108] sm:$0xff] %vm16_vm10, %v4176_v19 }
 0x12b   :  { %v2128_v52 = vpop.eup %2127  ;;  %51 = vst.msk [vmem:[#allocation2 + $0x110] sm:$0xff] %vm16_vm10, %v4176_v19  ;;  %52 = vst.msk [vmem:[#allocation2 + $0x118] sm:$0xff] %vm16_vm10, %v4176_v19 }
 0x12c   :  { %53 = vst.msk [vmem:[#allocation2 + $0x120] sm:$0xff] %vm16_vm10, %v4176_v19  ;;  %v2130_v30 = vpop.eup %2129  ;;  %v365_v19 = vsel %vm289_vm12, %v327_v56, 0.0 }
 0x12e   :  { %719 = vadd.xlane.f32.xlu0 %v718_v38  ;;  %v2782_v38 = vpop.xlane.xlu1 %1272 }
 0x12f   :  { %4229 = vst [vmem:[#allocation20_spill] sm:$0xff] %v2782_v38 }
 0x132   :  { %1491 = vadd.xlane.f32.xlu0 %v1490_v24  ;;  %v1493_v24 = vsel %vm400_vm0, %v2128_v52, 0.0  ;;  %v537_v52 = vsel %vm400_vm0, %v2406_v28, 0.0 }
 0x133   :  { %168 = vperm.xlu1 %2108, %v105_v10   ;;  %v113_v10 = vld [vmem:[%s4168_s1 + $0x98] sm:$0xff] }
 0x136   :  { %402 = vadd.xlane.f32.xlu0 %v401_v21  ;;  %v2788_v21 = vpop.xlane.xlu0 %1275 }
 0x137   :  { %174 = vperm.xlu1 %2108, %v107_v42   ;;  %4230 = vst [vmem:[#allocation21_spill] sm:$0xff] %v2788_v21  ;;  %v2790_v42 = vpop.xlane.xlu1 %1278 }
 0x138   :  { %4231 = vst [vmem:[#allocation22_spill] sm:$0xff] %v2790_v42  ;;  %v1365_v22 = vsub.f32 %v2436_v37, %v2790_v42  ;;  %v558_v37 = vsel %vm400_vm0, %v2558_v13, 0.0 }
 0x13a   :  { %535 = vadd.xlane.f32.xlu0 %v534_v18  ;;  %v1363_v18 = vsub.f32 %v2426_v34, %v2782_v38  ;;  %v2874_v17 = vpop.xlane.xlu0 %1281  ;;  %v543_v38 = vsel %vm400_vm0, %v2416_v31, 0.0 }
 0x13b   :  { %180 = vperm.xlu1 %2108, %v109_v15   ;;  %v115_v15 = vld [vmem:[%s4168_s1 + $0xa8] sm:$0xff]  ;;  %4232 = vst [vmem:[#allocation23_spill] sm:$0xff] %v2874_v17 }
 0x13c   :  { %v1412_v63 = vmul.f32 1.442695, %v1363_v18 }
 0x13e   :  { %722 = vadd.xlane.f32.xlu0 %v721_v51  ;;  %v674_v51 = vsel %vm254_vm11, %v2510_v59, 0.0  ;;  %2131 = vpow2.f32 %v1412_v63  ;;  %v1496_v63 = vsel %vm400_vm0, %v2130_v30, 0.0  ;;  %v1416_v30 = vmul.f32 1.442695, %v1365_v22  ;;  %v127_v22 = vld [vmem:[%s4168_s1 + $0x108] sm:$0xff] }
 0x13f   :  { %186 = vperm.xlu1 %2108, %v111_v1   ;;  %v2878_v1 = vpop.xlane.xlu1 %1284  ;;  %v724_v18 = vsel %vm400_vm0, %v674_v51, 0.0  ;;  %v410_v51 = vsel %vm400_vm0, %v365_v19, 0.0  ;;  %v125_v19 = vld [vmem:[%s4168_s1 + $0xf8] sm:$0xff]  ;;  %vm260_vm11 = vcmp.eq.s32.totalorder %v2707_v29, %v2629_v54 }
 0x140   :  { %4233 = vst [vmem:[#allocation24_spill] sm:$0xff] %v2878_v1 }
 0x142   :  { %1494 = vadd.xlane.f32.xlu0 %v1493_v24  ;;  %v1364_v24 = vsub.f32 %v2546_v8, %v2788_v21 }
 0x143   :  { %192 = vperm.xlu1 %2108, %v113_v10   ;;  %v119_v10 = vld [vmem:[%s4168_s1 + $0xc8] sm:$0xff] }
 0x146   :  { %408 = vadd.xlane.f32.xlu0 %v407_v53  ;;  %v2890_v53 = vpop.xlane.xlu0 %1287 }
 0x147   :  { %198 = vperm.xlu1 %2108, %v115_v15   ;;  %4234 = vst [vmem:[#allocation25_spill] sm:$0xff] %v2890_v53  ;;  %v2894_v15 = vpop.xlane.xlu1 %1290 }
 0x148   :  { %4235 = vst [vmem:[#allocation26_spill] sm:$0xff] %v2894_v15 }
 0x14a   :  { %538 = vadd.xlane.f32.xlu0 %v537_v52  ;;  %v1414_v52 = vmul.f32 1.442695, %v1364_v24  ;;  %v2900_v21 = vpop.xlane.xlu0 %1293  ;;  %v123_v24 = vld [vmem:[%s4168_s1 + $0xe8] sm:$0xff] }
 0x14b   :  { %204 = vperm.xlu1 %2108, %v117_v62   ;;  %v121_v62 = vld [vmem:[%s4168_s1 + $0xd8] sm:$0xff]  ;;  %4236 = vst [vmem:[#allocation27_spill] sm:$0xff] %v2900_v21  ;;  %v2132_v56 = vpop.eup %2131 }
 0x14c   :  { %2133 = vpow2.f32 %v1414_v52 }
 0x14d   :  { %2135 = vpow2.f32 %v1416_v30  ;;  %v129_v30 = vld [vmem:[%s4168_s1 + $0x118] sm:$0xff] }
 0x14e   :  { %725 = vadd.xlane.f32.xlu0 %v724_v18  ;;  %v2905_v18 = vpop.xlane.xlu1 %1296  ;;  %v2915_v52 = vpop.xlane.xlu0 %1299 }
 0x14f   :  { %210 = vperm.xlu1 %2108, %v119_v10   ;;  %4237 = vst [vmem:[#allocation28_spill] sm:$0xff] %v2905_v18  ;;  %v540_v10 = vsel %vm400_vm0, %v2524_v0, 0.0  ;;  %4238 = vst [vmem:[#allocation29_spill] sm:$0xff] %v2915_v52 }
 0x152   :  { %1497 = vadd.xlane.f32.xlu0 %v1496_v63  ;;  %v2917_v63 = vpop.xlane.xlu1 %1302  ;;  %v2925_v42 = vpop.xlane.xlu0 %1305 }
 0x153   :  { %216 = vperm.xlu1 %2108, %v121_v62   ;;  %4239 = vst [vmem:[#allocation30_spill] sm:$0xff] %v2917_v63  ;;  %v1366_v62 = vsub.f32 %v2558_v13, %v2874_v17  ;;  %4240 = vst [vmem:[#allocation31_spill] sm:$0xff] %v2925_v42  ;;  %v675_v13 = vsel %vm255_vm14, %v2406_v28, 0.0  ;;  %v1373_v36 = vsub.f32 %v2464_v45, %v2917_v63 }
 0x156   :  { %411 = vadd.xlane.f32.xlu0 %v410_v51  ;;  %v1499_v51 = vsel %vm400_vm0, %v2132_v56, 0.0 }
 0x157   :  { %222 = vperm.xlu1 %2108, %v123_v24   ;;  %v1418_v24 = vmul.f32 1.442695, %v1366_v62  ;;  %v2938_v62 = vpop.xlane.xlu0 %1311 }
 0x158   :  { %4242 = vst [vmem:[#allocation33_spill] sm:$0xff] %v2938_v62 }
 0x159   :  { %v2134_v14 = vpop.eup %2133  ;;  %2137 = vpow2.f32 %v1418_v24 }
 0x15a   :  { %541 = vadd.xlane.f32.xlu0 %v540_v10  ;;  %v2929_v10 = vpop.xlane.xlu1 %1308  ;;  %v1502_v56 = vsel %vm400_vm0, %v2134_v14, 0.0  ;;  %v2136_v24 = vpop.eup %2135  ;;  %v1368_v14 = vsub.f32 %v2567_v16, %v2890_v53 }
 0x15b   :  { %228 = vperm.xlu1 %2108, %v125_v19   ;;  %4241 = vst [vmem:[#allocation32_spill] sm:$0xff] %v2929_v10  ;;  %v131_v19 = vld [vmem:[%s4168_s1 + $0x128] sm:$0xf]  ;;  %v2948_v17 = vpop.xlane.xlu0 %1317  ;;  %v1505_v58 = vsel %vm400_vm0, %v2136_v24, 0.0  ;;  %v1369_v24 = vsub.f32 %v2448_v40, %v2894_v15  ;;  %v1375_v44 = vsub.f32 %v2471_v47, %v2929_v10 }
 0x15c   :  { %4244 = vst [vmem:[#allocation35_spill] sm:$0xff] %v2948_v17 }
 0x15e   :  { %1500 = vadd.xlane.f32.xlu0 %v1499_v51  ;;  %v1367_v51 = vsub.f32 %v2443_v39, %v2878_v1  ;;  %v1422_v1 = vmul.f32 1.442695, %v1368_v14 }
 0x15f   :  { %234 = vperm.xlu1 %2108, %v127_v22   ;;  %v2942_v22 = vpop.xlane.xlu1 %1314  ;;  %v2955_v33 = vpop.xlane.xlu0 %1323 }
 0x160   :  { %4243 = vst [vmem:[#allocation34_spill] sm:$0xff] %v2942_v22  ;;  %4246 = vst [vmem:[#allocation37_spill] sm:$0xff] %v2955_v33 }
 0x162   :  { %544 = vadd.xlane.f32.xlu0 %v543_v38  ;;  %v546_v38 = vsel %vm400_vm0, %v2535_v4, 0.0 }
 0x163   :  { %240 = vperm.xlu1 %2108, %v129_v30   ;;  %v1420_v30 = vmul.f32 1.442695, %v1367_v51  ;;  %v2951_v55 = vpop.xlane.xlu1 %1320  ;;  %v2962_v53 = vpop.xlane.xlu0 %1329 }
 0x164   :  { %4245 = vst [vmem:[#allocation36_spill] sm:$0xff] %v2951_v55  ;;  %4248 = vst [vmem:[#allocation39_spill] sm:$0xff] %v2962_v53 }
 0x165   :  { %2139 = vpow2.f32 %v1420_v30 }
 0x166   :  { %1503 = vadd.xlane.f32.xlu0 %v1502_v56  ;;  %v549_v56 = vsel %vm400_vm0, %v2426_v34, 0.0  ;;  %2141 = vpow2.f32 %v1422_v1  ;;  %v1424_v34 = vmul.f32 1.442695, %v1369_v24  ;;  %v325_v24 = vmul.f32 2.0, %v2478_v49 }
 0x167   :  { %246 = vperm.xlu1 %2108, %v131_v19   ;;  %v2138_v19 = vpop.eup %2137  ;;  %v2957_v51 = vpop.xlane.xlu1 %1326 }
 0x168   :  { %4247 = vst [vmem:[#allocation38_spill] sm:$0xff] %v2957_v51  ;;  %v2970_v1 = vpop.xlane.xlu0 %1335  ;;  %2143 = vpow2.f32 %v1424_v34 }
 0x169   :  { %4250 = vst [vmem:[#allocation41_spill] sm:$0xff] %v2970_v1 }
 0x16a   :  { %547 = vadd.xlane.f32.xlu0 %v546_v38  ;;  %v1508_v38 = vsel %vm400_vm0, %v2138_v19, 0.0 }
 0x16b   :  { %v2966_v30 = vpop.xlane.xlu1 %1332 }
 0x16c   :  { %4249 = vst [vmem:[#allocation40_spill] sm:$0xff] %v2966_v30 }
 0x16e   :  { %1506 = vadd.xlane.f32.xlu0 %v1505_v58  ;;  %v552_v58 = vsel %vm400_vm0, %v2546_v8, 0.0 }
 0x16f   :  { %v2973_v15 = vpop.xlane.xlu1 %1338 }
 0x170   :  { %4251 = vst [vmem:[#allocation42_spill] sm:$0xff] %v2973_v15 }
 0x172   :  { %550 = vadd.xlane.f32.xlu0 %v549_v56  ;;  %v2140_v14 = vpop.eup %2139  ;;  %v1370_v56 = vsub.f32 %v2576_v20, %v2900_v21 }
 0x173   :  { %v1511_v19 = vsel %vm400_vm0, %v2140_v14, 0.0  ;;  %v2142_v48 = vpop.eup %2141  ;;  %v2982_v21 = vpop.xlane.xlu1 %1344  ;;  %v1371_v14 = vsub.f32 %v2457_v43, %v2905_v18 }
 0x174   :  { %v1514_v34 = vsel %vm400_vm0, %v2142_v48, 0.0  ;;  %4253 = vst [vmem:[#allocation44_spill] sm:$0xff] %v2982_v21  ;;  %v328_v48 = vmul.f32 2.0, %v2503_v57  ;;  %v561_v57 = vsel %vm400_vm0, %v2443_v39, 0.0  ;;  %v676_v39 = vsel %vm256_vm2, %v2524_v0, 0.0 }
 0x175   :  { %v2144_v12 = vpop.eup %2143 }
 0x176   :  { %1509 = vadd.xlane.f32.xlu0 %v1508_v38  ;;  %v1426_v38 = vmul.f32 1.442695, %v1370_v56  ;;  %v363_v56 = vsel %vm287_vm13, %v325_v24, 0.0  ;;  %v1372_v24 = vsub.f32 %v2583_v23, %v2915_v52  ;;  %v1517_v3 = vsel %vm400_vm0, %v2144_v12, 0.0 }
 0x177   :  { %v404_v49 = vsel %vm400_vm0, %v363_v56, 0.0  ;;  %v329_v12 = vmul.f32 2.0, %v2396_v25 }
 0x178   :  { %2145 = vpow2.f32 %v1426_v38  ;;  %v2993_v38 = vpop.xlane.xlu1 %1350  ;;  %v1430_v56 = vmul.f32 1.442695, %v1372_v24 }
 0x179   :  { %4255 = vst [vmem:[#allocation46_spill] sm:$0xff] %v2993_v38 }
 0x17a   :  { %553 = vadd.xlane.f32.xlu0 %v552_v58  ;;  %v2979_v58 = vpop.xlane.xlu0 %1341 }
 0x17b   :  { %4252 = vst [vmem:[#allocation43_spill] sm:$0xff] %v2979_v58 }
 0x17e   :  { %1512 = vadd.xlane.f32.xlu0 %v1511_v19  ;;  %v1428_v19 = vmul.f32 1.442695, %v1371_v14  ;;  %v727_v14 = vsel %vm400_vm0, %v675_v13, 0.0  ;;  %v367_v13 = vsel %vm291_vm3, %v329_v12, 0.0  ;;  %vm262_vm3 = vcmp.eq.s32.totalorder %v2707_v29, %v2638_v61 }
 0x180   :  { %2147 = vpow2.f32 %v1428_v19 }
 0x181   :  { %2149 = vpow2.f32 %v1430_v56  ;;  %v1432_v56 = vmul.f32 1.442695, %v1373_v36 }
 0x182   :  { %556 = vadd.xlane.f32.xlu0 %v555_v41  ;;  %v2991_v41 = vpop.xlane.xlu0 %1347 }
 0x183   :  { %4254 = vst [vmem:[#allocation45_spill] sm:$0xff] %v2991_v41  ;;  %2151 = vpow2.f32 %v1432_v56 }
 0x185   :  { %v2146_v52 = vpop.eup %2145 }
 0x186   :  { %1515 = vadd.xlane.f32.xlu0 %v1514_v34  ;;  %v366_v34 = vsel %vm290_vm15, %v328_v48, 0.0  ;;  %v3002_v18 = vpop.xlane.xlu0 %1467  ;;  %v1520_v24 = vsel %vm400_vm0, %v2146_v52, 0.0  ;;  %v416_v52 = vsel %vm400_vm0, %v367_v13, 0.0 }
 0x18a   :  { %559 = vadd.xlane.f32.xlu0 %v558_v37 }
 0x18b   :  { %405 = vadd.xlane.f32.xlu1 %v404_v49  ;;  %v413_v49 = vsel %vm400_vm0, %v366_v34, 0.0 }
 0x18d   :  { %v2148_v45 = vpop.eup %2147 }
 0x18e   :  { %1518 = vadd.xlane.f32.xlu0 %v1517_v3  ;;  %v730_v3 = vsel %vm400_vm0, %v676_v39, 0.0  ;;  %v1523_v6 = vsel %vm400_vm0, %v2148_v45, 0.0 }
 0x18f   :  { %728 = vadd.xlane.f32.xlu1 %v727_v14  ;;  %v3004_v37 = vpop.xlane.xlu1 %1470  ;;  %v564_v14 = vsel %vm400_vm0, %v2567_v16, 0.0  ;;  %v677_v16 = vsel %vm257_vm4, %v2416_v31, 0.0 }
 0x190   :  { %v733_v36 = vsel %vm400_vm0, %v677_v16, 0.0 }
 0x192   :  { %562 = vadd.xlane.f32.xlu0 %v561_v57  ;;  %v330_v57 = vmul.f32 2.0, %v2510_v59 }
 0x193   :  { %v3013_v19 = vpop.xlane.xlu0 %1473  ;;  %414 = vadd.xlane.f32.xlu1 %v413_v49  ;;  %v3015_v48 = vpop.xlane.xlu1 %520  ;;  %v1374_v49 = vsub.f32 %v2592_v27, %v2925_v42  ;;  %v567_v27 = vsel %vm400_vm0, %v2448_v40, 0.0  ;;  %v678_v40 = vsel %vm258_vm6, %v2535_v4, 0.0 }
 0x194   :  { %v368_v39 = vsel %vm292_vm5, %v330_v57, 0.0  ;;  %v736_v16 = vsel %vm400_vm0, %v678_v40, 0.0  ;;  %v573_v40 = vsel %vm400_vm0, %v2457_v43, 0.0 }
 0x195   :  { %v1434_v13 = vmul.f32 1.442695, %v1374_v49  ;;  %v419_v31 = vsel %vm400_vm0, %v368_v39, 0.0 }
 0x196   :  { %1521 = vadd.xlane.f32.xlu0 %v1520_v24 }
 0x197   :  { %731 = vadd.xlane.f32.xlu1 %v730_v3  ;;  %v3022_v34 = vpop.xlane.xlu1 %1476  ;;  %v518_v25 = vpop.xlane.xlu0 %517 }
 0x19a   :  { %565 = vadd.xlane.f32.xlu0 %v564_v14  ;;  %v2150_v14 = vpop.eup %2149 }
 0x19b   :  { %417 = vadd.xlane.f32.xlu1 %v416_v52  ;;  %v3033_v12 = vpop.xlane.xlu1 %523  ;;  %v1480_v24 = vpop.xlane.xlu0 %1479  ;;  %v331_v52 = vmul.f32 2.0, %v2406_v28  ;;  %v1526_v45 = vsel %vm400_vm0, %v2150_v14, 0.0  ;;  %v1376_v14 = vsub.f32 %v2601_v32, %v2938_v62 }
 0x19c   :  { %2153 = vlog2.f32 %v1480_v24 }
 0x19d   :  { %2155 = vpow2.f32 %v1434_v13  ;;  %v369_v49 = vsel %vm293_vm7, %v331_v52, 0.0  ;;  %v2152_v13 = vpop.eup %2151 }
 0x19e   :  { %1524 = vadd.xlane.f32.xlu0 %v1523_v6  ;;  %v570_v6 = vsel %vm400_vm0, %v2576_v20, 0.0  ;;  %v422_v39 = vsel %vm400_vm0, %v369_v49, 0.0  ;;  %2157 = vlog2.f32 %v3002_v18  ;;  %v332_v20 = vmul.f32 2.0, %v2524_v0 }
 0x19f   :  { %734 = vadd.xlane.f32.xlu1 %v733_v36  ;;  %v3038_v3 = vpop.xlane.xlu1 %710  ;;  %v3040_v59 = vpop.xlane.xlu0 %707  ;;  %v1436_v36 = vmul.f32 1.442695, %v1375_v44  ;;  %v1438_v49 = vmul.f32 1.442695, %v1376_v14 }
 0x1a0   :  { %v858_v32 = vand.u32 2147483647, %v3040_v59  ;;  %vm972_vm13 = vcmp.gt.f32.partialorder %v3040_v59, 0.0 }
 0x1a1   :  { %2159 = vpow2.f32 %v1436_v36 }
 0x1a2   :  { %568 = vadd.xlane.f32.xlu0 %v567_v27  ;;  %v630_v27 = vmul.f32 0.1, %v518_v25 }
 0x1a3   :  { %420 = vadd.xlane.f32.xlu1 %v419_v31  ;;  %v3049_v56 = vpop.xlane.xlu1 %526  ;;  %v1483_v57 = vpop.xlane.xlu0 %1482  ;;  %v1529_v31 = vsel %vm400_vm0, %v2152_v13, 0.0  ;;  %v1377_v13 = vsub.f32 %v2483_v50, %v2942_v22  ;;  %v680_v50 = vsel %vm260_vm11, %v2546_v8, 0.0 }
 0x1a4   :  { %v820_v25 = vand.u32 2147483647, %v630_v27  ;;  %2161 = vlog2.f32 %v1483_v57 }
 0x1a5   :  { %2163 = vpow2.f32 %v1438_v49  ;;  %v742_v49 = vsel %vm400_vm0, %v680_v50, 0.0 }
 0x1a6   :  { %1527 = vadd.xlane.f32.xlu0 %v1526_v45  ;;  %2165 = vlog2.f32 %v3013_v19 }
 0x1a7   :  { %737 = vadd.xlane.f32.xlu1 %v736_v16  ;;  %v3056_v24 = vpop.xlane.xlu1 %716  ;;  %v3058_v28 = vpop.xlane.xlu0 %713  ;;  %v3080_v16 = vld [vmem:[%s4167_s0 + $0x58] sm:$0xff] }
 0x1a8   :  { %vm297_vm4 = vcmp.gt.f32.partialorder %v3080_v16, 0.0  ;;  %vm974_vm5 = vcmp.gt.f32.partialorder %v3058_v28, 0.0 }
 0x1a9   :  { %v2154_v52 = vpop.eup %2153 }
 0x1aa   :  { %571 = vadd.xlane.f32.xlu0 %v570_v6  ;;  %v2156_v44 = vpop.eup %2155  ;;  %v370_v6 = vsel %vm294_vm8, %v332_v20, 0.0  ;;  %v896_v20 = vmax.f32.f32 %v820_v25, %v858_v32 }
 0x1ab   :  { %423 = vadd.xlane.f32.xlu1 %v422_v39  ;;  %v3064_v47 = vpop.xlane.xlu1 %1485  ;;  %v530_v4 = vpop.xlane.xlu0 %529  ;;  %v1589_v39 = vmul.f32 0.6931472, %v2154_v52  ;;  %v1532_v14 = vsel %vm400_vm0, %v2156_v44, 0.0 }
 0x1ac   :  { %v634_v36 = vmul.f32 0.1, %v530_v4  ;;  %v425_v4 = vsel %vm400_vm0, %v370_v6, 0.0  ;;  %v1010_v6 = vmul.f32 2.0, %v3040_v59 }
 0x1ad   :  { %v3096_v54 = vadd.f32 %v1589_v39, %v2689_v11  ;;  %v934_v11 = vmul.f32 2.0, %v896_v20 }
 0x1ae   :  { %1530 = vadd.xlane.f32.xlu0 %v1529_v31  ;;  %v2262_v31 = vld [vmem:[%s4167_s0 + $0x48] sm:$0xff]  ;;  %v824_v52 = vand.u32 2147483647, %v634_v36 }
 0x1af   :  { %v169_v45 = vpop.permute.xlu1 %168  ;;  %v3071_v18 = vpop.xlane.xlu0 %1488  ;;  %v333_v57 = vmul.f32 2.0, %v2262_v31  ;;  %vm295_vm12 = vcmp.gt.f32.partialorder %v2262_v31, 0.0 }
 0x1b0   :  { %vm259_vm9 = vcmp.eq.s32.totalorder %v2707_v29, %v169_v45  ;;  %v2158_v45 = vpop.eup %2157 }
 0x1b1   :  { %v679_v0 = vsel %vm259_vm9, %v3080_v16, 0.0  ;;  %v2160_v36 = vpop.eup %2159  ;;  %vm264_vm9 = vcmp.eq.s32.totalorder %v2707_v29, %v2646_v2 }
 0x1b2   :  { %574 = vadd.xlane.f32.xlu0 %v573_v40  ;;  %v739_v43 = vsel %vm400_vm0, %v679_v0, 0.0  ;;  %v1440_v40 = vmul.f32 1.442695, %v1377_v13  ;;  %v576_v0 = vsel %vm400_vm0, %v2583_v23, 0.0  ;;  %v1581_v13 = vmul.f32 0.6931472, %v2158_v45 }
 0x1b3   :  { %740 = vadd.xlane.f32.xlu1 %v739_v43  ;;  %v3088_v27 = vpop.xlane.xlu0 %532  ;;  %v371_v43 = vsel %vm295_vm12, %v333_v57, 0.0  ;;  %v175_v8 = vpop.permute.xlu1 %174  ;;  %v1048_v57 = vsel %vm972_vm13, %v1010_v6, 0.0  ;;  %v632_v45 = vmul.f32 0.1, %v3033_v12  ;;  %v3140_v12 = vld [vmem:[%s4167_s0 + $0x68] sm:$0xff]  ;;  %vm975_vm12 = vcmp.gt.f32.partialorder %v3056_v24, 0.0 }
 0x1b4   :  { %2167 = vpow2.f32 %v1440_v40  ;;  %v428_v31 = vsel %vm400_vm0, %v371_v43, 0.0  ;;  %vm261_vm15 = vcmp.eq.s32.totalorder %v2707_v29, %v175_v8  ;;  %v1124_v50 = vsub.f32 %v1048_v57, %v934_v11 }
 0x1b5   :  { %v1535_v40 = vsel %vm400_vm0, %v2160_v36, 0.0  ;;  %v1656_v43 = vadd.f32 %v1581_v13, %v2656_v9  ;;  %v681_v9 = vsel %vm261_vm15, %v3140_v12, 0.0  ;;  %v822_v25 = vand.u32 2147483647, %v632_v45 }
 0x1b6   :  { %1533 = vadd.xlane.f32.xlu0 %v1532_v14  ;;  %v1162_v13 = vand.u32 2147483647, %v1124_v50  ;;  %v635_v22 = vmul.f32 0.1, %v3088_v27  ;;  %v745_v8 = vsel %vm400_vm0, %v681_v9, 0.0  ;;  %v3160_v27 = vld [vmem:[%s4167_s0 + $0xd8] sm:$0xff] }
 0x1b7   :  { %426 = vadd.xlane.f32.xlu1 %v425_v4  ;;  %v3099_v44 = vpop.xlane.xlu0 %719  ;;  %v2263_v4 = vld [vmem:[%s4167_s0 + $0x50] sm:$0xff]  ;;  %v1694_v36 = vsub.f32 %v1656_v43, %v3040_v59  ;;  %v1379_v45 = vsub.f32 %v3160_v27, %v2951_v55  ;;  %v1846_v43 = vld [vmem:[#allocation2] sm:$0xff]  ;;  %vm299_vm11 = vcmp.gt.f32.partialorder %v3140_v12, 0.0 }
 0x1b8   :  { %v862_v32 = vand.u32 2147483647, %v3099_v44  ;;  %v1014_v39 = vmul.f32 2.0, %v3099_v44  ;;  %vm976_vm14 = vcmp.gt.f32.partialorder %v3099_v44, 0.0  ;;  %v334_v20 = vmul.f32 2.0, %v2263_v4 }
 0x1b9   :  { %vm296_vm2 = vcmp.gt.f32.partialorder %v2263_v4, 0.0 }
 0x1ba   :  { %577 = vadd.xlane.f32.xlu0 %v576_v0  ;;  %v900_v23 = vmax.f32.f32 %v824_v52, %v862_v32  ;;  %v1378_v52 = vsub.f32 %v2608_v35, %v2948_v17  ;;  %v3125_v0 = vsel %vm976_vm14, %v1014_v39, 0.0  ;;  %v2162_v32 = vpop.eup %2161  ;;  %v372_v39 = vsel %vm296_vm2, %v334_v20, 0.0 }
 0x1bb   :  { %743 = vadd.xlane.f32.xlu1 %v742_v49  ;;  %v3112_v14 = vpop.xlane.xlu0 %1491  ;;  %v3133_v49 = vld [vmem:[%s4167_s0 + $0xa8] sm:$0xff]  ;;  %v2164_v6 = vpop.eup %2163  ;;  %v1591_v17 = vmul.f32 0.6931472, %v2162_v32  ;;  %v431_v59 = vsel %vm400_vm0, %v372_v39, 0.0  ;;  %v1770_v20 = vmul.f32 0.0016666667, %v1694_v36  ;;  %vm266_vm2 = vcmp.eq.s32.totalorder %v2707_v29, %v2650_v5 }
 0x1bc   :  { %v3119_v19 = vmul.f32 2.0, %v900_v23  ;;  %v579_v35 = vsel %vm400_vm0, %v3133_v49, 0.0  ;;  %v1538_v32 = vsel %vm400_vm0, %v2164_v6, 0.0  ;;  %v3180_v6 = vld [vmem:[%s4167_s0 + $0xb0] sm:$0xff]  ;;  %v2166_v36 = vpop.eup %2165 }
 0x1bd   :  { %v582_v39 = vsel %vm400_vm0, %v3180_v6, 0.0 }
 0x1be   :  { %1536 = vadd.xlane.f32.xlu0 %v1535_v40  ;;  %v1442_v40 = vmul.f32 1.442695, %v1378_v52 }
 0x1bf   :  { %429 = vadd.xlane.f32.xlu1 %v428_v31  ;;  %v403_v11 = vpop.xlane.xlu0 %402  ;;  %v860_v31 = vand.u32 2147483647, %v3058_v28 }
 0x1c0   :  { %v1086_v23 = vsub.f32 %v403_v11, %v1048_v57  ;;  %v335_v57 = vmul.f32 2.0, %v3080_v16  ;;  %2169 = vpow2.f32 %v1442_v40  ;;  %v3168_v11 = vld [vmem:[%s4167_s0 + $0x70] sm:$0xff] }
 0x1c1   :  { %v898_v52 = vmax.f32.f32 %v822_v25, %v860_v31  ;;  %v3175_v25 = vadd.f32 %v1591_v17, %v2693_v26  ;;  %2171 = vlog2.f32 %v3022_v34  ;;  %v1012_v17 = vmul.f32 2.0, %v3058_v28  ;;  %v181_v34 = vpop.permute.xlu1 %180 }
 0x1c2   :  { %v1200_v62 = vadd.f32 %v1162_v13, %v1086_v23  ;;  %580 = vadd.xlane.f32.xlu0 %v579_v35  ;;  %v825_v35 = vand.u32 2147483647, %v635_v22  ;;  %v373_v26 = vsel %vm297_vm4, %v335_v57, 0.0  ;;  %v2168_v22 = vpop.eup %2167  ;;  %vm263_vm7 = vcmp.eq.s32.totalorder %v2707_v29, %v181_v34  ;;  %v3244_v23 = vld [vmem:[%s4167_s0 + $0xe8] sm:$0xff] }
 0x1c3   :  { %746 = vadd.xlane.f32.xlu1 %v745_v8  ;;  %v3152_v4 = vpop.xlane.xlu0 %535  ;;  %v936_v31 = vmul.f32 2.0, %v898_v52  ;;  %v1444_v8 = vmul.f32 1.442695, %v1379_v45  ;;  %v434_v52 = vsel %vm400_vm0, %v373_v26, 0.0  ;;  %v1050_v45 = vsel %vm974_vm5, %v1012_v17, 0.0 }
 0x1c4   :  { %v1732_v50 = vmul.f32 0.00016666666, %v1200_v62  ;;  %v682_v62 = vsel %vm262_vm3, %v3168_v11, 0.0  ;;  %vm300_vm15 = vcmp.gt.f32.partialorder %v3168_v11, 0.0 }
 0x1c5   :  { %v748_v16 = vsel %vm400_vm0, %v682_v62, 0.0  ;;  %2173 = vpow2.f32 %v1444_v8 }
 0x1c6   :  { %v1808_v9 = vadd.f32 %v1770_v20, %v1732_v50  ;;  %1539 = vadd.xlane.f32.xlu0 %v1538_v32  ;;  %v1585_v20 = vmul.f32 0.6931472, %v2166_v36  ;;  %v1541_v36 = vsel %vm400_vm0, %v2168_v22, 0.0 }
 0x1c7   :  { %432 = vadd.xlane.f32.xlu1 %v431_v59  ;;  %v3185_v61 = vpop.xlane.xlu0 %722 }
 0x1c8   :  { %v1884_v13 = vadd.f32 %v1846_v43, %v1808_v9  ;;  %v863_v40 = vand.u32 2147483647, %v3185_v61  ;;  %v1015_v59 = vmul.f32 2.0, %v3185_v61  ;;  %vm977_vm6 = vcmp.gt.f32.partialorder %v3185_v61, 0.0  ;;  %v2269_v43 = vld [vmem:[%s4167_s0 + $0x60] sm:$0xff] }
 0x1c9   :  { %v336_v32 = vmul.f32 2.0, %v2269_v43  ;;  %v1126_v9 = vsub.f32 %v1050_v45, %v936_v31  ;;  %vm298_vm8 = vcmp.gt.f32.partialorder %v2269_v43, 0.0  ;;  %v1658_v17 = vadd.f32 %v1585_v20, %v2685_v60  ;;  %v3233_v60 = vld [vmem:[%s4167_s0 + $0x78] sm:$0xff] }
 0x1ca   :  { %1923 = vst.msk [vmem:[#allocation2] sm:$0xff] %vm16_vm10, %v1884_v13  ;;  %583 = vadd.xlane.f32.xlu0 %v582_v39  ;;  %v901_v57 = vmax.f32.f32 %v825_v35, %v863_v40  ;;  %v3212_v35 = vld [vmem:[%s4167_s0 + $0xe0] sm:$0xff]  ;;  %v3217_v26 = vsel %vm977_vm6, %v1015_v59, 0.0  ;;  %v633_v13 = vmul.f32 0.1, %v3049_v56  ;;  %v683_v56 = vsel %vm263_vm7, %v3233_v60, 0.0 }
 0x1cb   :  { %749 = vadd.xlane.f32.xlu1 %v748_v16  ;;  %v3198_v50 = vpop.xlane.xlu0 %1494  ;;  %v1380_v39 = vsub.f32 %v3212_v35, %v2955_v33  ;;  %v3226_v16 = vld [vmem:[%s4167_s0 + $0xb8] sm:$0xff]  ;;  %v374_v8 = vsel %vm298_vm8, %v336_v32, 0.0  ;;  %v1696_v59 = vsub.f32 %v1658_v17, %v3058_v28  ;;  %v1164_v20 = vand.u32 2147483647, %v1126_v9 }
 0x1cc   :  { %v3207_v62 = vmul.f32 2.0, %v901_v57  ;;  %v585_v22 = vsel %vm400_vm0, %v3226_v16, 0.0  ;;  %v1381_v31 = vsub.f32 %v3244_v23, %v2957_v51  ;;  %v823_v34 = vand.u32 2147483647, %v633_v13 }
 0x1cd   :  { %v2170_v33 = vpop.eup %2169  ;;  %v636_v43 = vmul.f32 0.1, %v3152_v4  ;;  %v751_v28 = vsel %vm400_vm0, %v683_v56, 0.0  ;;  %v437_v9 = vsel %vm400_vm0, %v374_v8, 0.0  ;;  %v1772_v51 = vmul.f32 0.0016666667, %v1696_v59 }
 0x1ce   :  { %1542 = vadd.xlane.f32.xlu0 %v1541_v36  ;;  %v1446_v36 = vmul.f32 1.442695, %v1380_v39  ;;  %v337_v39 = vmul.f32 2.0, %v3140_v12  ;;  %v2172_v17 = vpop.eup %2171  ;;  %v1544_v56 = vsel %vm400_vm0, %v2170_v33, 0.0  ;;  %v3261_v8 = vld [vmem:[%s4167_s0 + $0x80] sm:$0xff]  ;;  %vm301_vm3 = vcmp.gt.f32.partialorder %v3233_v60, 0.0 }
 0x1cf   :  { %435 = vadd.xlane.f32.xlu1 %v434_v52  ;;  %v409_v40 = vpop.xlane.xlu0 %408  ;;  %v861_v52 = vand.u32 2147483647, %v3056_v24  ;;  %v684_v59 = vsel %vm264_vm9, %v3261_v8, 0.0  ;;  %v3272_v33 = vld [vmem:[%s4167_s0 + $0xc0] sm:$0xff]  ;;  %vm302_vm5 = vcmp.gt.f32.partialorder %v3261_v8, 0.0  ;;  %vm268_vm6 = vcmp.eq.s32.totalorder %v2707_v29, %v2654_v7 }
 0x1d0   :  { %v1088_v57 = vsub.f32 %v409_v40, %v1050_v45  ;;  %v187_v40 = vpop.permute.xlu1 %186  ;;  %2175 = vpow2.f32 %v1446_v36  ;;  %v1013_v36 = vmul.f32 2.0, %v3056_v24  ;;  %v3416_v7 = vld [vmem:[%s4167_s0 + $0xa0] sm:$0xff] }
 0x1d1   :  { %v899_v4 = vmax.f32.f32 %v823_v34, %v861_v52  ;;  %vm265_vm14 = vcmp.eq.s32.totalorder %v2707_v29, %v187_v40 }
 0x1d2   :  { %v1202_v32 = vadd.f32 %v1164_v20, %v1088_v57  ;;  %586 = vadd.xlane.f32.xlu0 %v585_v22  ;;  %v1848_v22 = vld [vmem:[#allocation2 + $0x10] sm:$0xff]  ;;  %v1448_v20 = vmul.f32 1.442695, %v1381_v31  ;;  %v826_v57 = vand.u32 2147483647, %v636_v43  ;;  %v375_v31 = vsel %vm299_vm11, %v337_v39, 0.0 }
 0x1d3   :  { %752 = vadd.xlane.f32.xlu1 %v751_v28  ;;  %v3252_v45 = vpop.xlane.xlu0 %538  ;;  %v937_v2 = vmul.f32 2.0, %v899_v4  ;;  %v440_v4 = vsel %vm400_vm0, %v375_v31, 0.0 }
 0x1d4   :  { %v1734_v13 = vmul.f32 0.00016666666, %v1202_v32  ;;  %v1587_v32 = vmul.f32 0.6931472, %v2172_v17  ;;  %v2174_v17 = vpop.eup %2173  ;;  %2177 = vpow2.f32 %v1448_v20 }
 0x1d6   :  { %v1810_v28 = vadd.f32 %v1772_v51, %v1734_v13  ;;  %1545 = vadd.xlane.f32.xlu0 %v1544_v56  ;;  %v588_v51 = vsel %vm400_vm0, %v3272_v33, 0.0  ;;  %v3282_v13 = vpop.permute.xlu1 %192  ;;  %v754_v56 = vsel %vm400_vm0, %v684_v59, 0.0  ;;  %v1547_v59 = vsel %vm400_vm0, %v2174_v17, 0.0 }
 0x1d7   :  { %438 = vadd.xlane.f32.xlu1 %v437_v9  ;;  %v3267_v52 = vpop.xlane.xlu0 %725  ;;  %vm267_vm4 = vcmp.eq.s32.totalorder %v2707_v29, %v3282_v13 }
 0x1d8   :  { %v1886_v34 = vadd.f32 %v1848_v22, %v1810_v28  ;;  %v864_v43 = vand.u32 2147483647, %v3267_v52  ;;  %v1016_v9 = vmul.f32 2.0, %v3267_v52  ;;  %vm978_vm13 = vcmp.gt.f32.partialorder %v3267_v52, 0.0 }
 0x1d9   :  { %v1051_v22 = vsel %vm975_vm12, %v1013_v36, 0.0  ;;  %v1659_v28 = vadd.f32 %v1587_v32, %v2677_v46  ;;  %v3311_v36 = vld [vmem:[%s4167_s0 + $0xc8] sm:$0xff] }
 0x1da   :  { %1925 = vst.msk [vmem:[#allocation2 + $0x10] sm:$0xff] %vm16_vm10, %v1886_v34  ;;  %589 = vadd.xlane.f32.xlu0 %v588_v51  ;;  %v902_v12 = vmax.f32.f32 %v826_v57, %v864_v43  ;;  %v1127_v55 = vsub.f32 %v1051_v22, %v937_v2  ;;  %v3297_v57 = vld [vmem:[%s4167_s0 + $0xf0] sm:$0xff]  ;;  %v338_v51 = vmul.f32 2.0, %v3168_v11  ;;  %v3303_v31 = vsel %vm978_vm13, %v1016_v9, 0.0  ;;  %v3318_v2 = vld [vmem:[%s4167_s0 + $0x88] sm:$0xff]  ;;  %v3324_v9 = vpop.permute.xlu1 %198 }
 0x1db   :  { %755 = vadd.xlane.f32.xlu1 %v754_v56  ;;  %v3287_v39 = vpop.xlane.xlu0 %1497  ;;  %4256 = vst [vmem:[#allocation47_spill] sm:$0xff] %v3297_v57  ;;  %v1382_v20 = vsub.f32 %v3297_v57, %v2962_v53  ;;  %v591_v34 = vsel %vm400_vm0, %v3311_v36, 0.0  ;;  %v685_v11 = vsel %vm265_vm14, %v3318_v2, 0.0  ;;  %v1697_v43 = vsub.f32 %v1659_v28, %v3056_v24  ;;  %v1849_v28 = vld [vmem:[#allocation2 + $0x18] sm:$0xff] }
 0x1dc   :  { %v3292_v10 = vmul.f32 2.0, %v902_v12  ;;  %v1165_v17 = vand.u32 2147483647, %v1127_v55  ;;  %v757_v53 = vsel %vm400_vm0, %v685_v11, 0.0  ;;  %v3335_v55 = vld [vmem:[%s4167_s0 + $0xf8] sm:$0xff]  ;;  %vm303_vm7 = vcmp.gt.f32.partialorder %v3318_v2, 0.0 }
 0x1dd   :  { %v1450_v12 = vmul.f32 1.442695, %v1382_v20  ;;  %v1773_v40 = vmul.f32 0.0016666667, %v1697_v43  ;;  %v339_v20 = vmul.f32 2.0, %v3233_v60  ;;  %v3356_v43 = vld [vmem:[%s4167_s0 + $0x90] sm:$0xff]  ;;  %vm269_vm8 = vcmp.eq.s32.totalorder %v2707_v29, %v3324_v9 }
 0x1de   :  { %1548 = vadd.xlane.f32.xlu0 %v1547_v59  ;;  %v2176_v59 = vpop.eup %2175  ;;  %vm304_vm9 = vcmp.gt.f32.partialorder %v3356_v43, 0.0  ;;  %v689_v9 = vsel %vm269_vm8, %v3133_v49, 0.0  ;;  %vm973_vm14 = vcmp.gt.f32.partialorder %v3038_v3, 0.0  ;;  %vm317_vm8 = vcmp.gt.f32.partialorder %v3335_v55, 0.0 }
 0x1df   :  { %441 = vadd.xlane.f32.xlu1 %v440_v4  ;;  %v412_v32 = vpop.xlane.xlu0 %411  ;;  %v376_v4 = vsel %vm300_vm15, %v338_v51, 0.0  ;;  %2179 = vpow2.f32 %v1450_v12  ;;  %v3341_v51 = vpop.permute.xlu1 %204  ;;  %v377_v12 = vsel %vm301_vm3, %v339_v20, 0.0  ;;  %v597_v20 = vsel %vm400_vm0, %v3160_v27, 0.0 }
 0x1e0   :  { %v1089_v56 = vsub.f32 %v412_v32, %v1051_v22  ;;  %v443_v24 = vsel %vm400_vm0, %v376_v4, 0.0  ;;  %v1383_v22 = vsub.f32 %v3335_v55, %v2966_v30  ;;  %v446_v5 = vsel %vm400_vm0, %v377_v12, 0.0  ;;  %v3397_v12 = vld [vmem:[%s4167_s0 + $0x108] sm:$0xff] }
 0x1e1   :  { %v2178_v60 = vpop.eup %2177  ;;  %vm271_vm13 = vcmp.eq.s32.totalorder %v2707_v29, %v3341_v51  ;;  %vm306_vm15 = vcmp.gt.f32.partialorder %v3416_v7, 0.0  ;;  %vm307_vm3 = vcmp.gt.f32.partialorder %v3133_v49, 0.0 }
 0x1e2   :  { %v1203_v46 = vadd.f32 %v1165_v17, %v1089_v56  ;;  %592 = vadd.xlane.f32.xlu0 %v591_v34  ;;  %v3349_v34 = vld [vmem:[%s4167_s0 + $0xd0] sm:$0xff]  ;;  %v1452_v56 = vmul.f32 1.442695, %v1383_v22  ;;  %v691_v51 = vsel %vm271_vm13, %v3226_v16, 0.0 }
 0x1e3   :  { %758 = vadd.xlane.f32.xlu1 %v757_v53  ;;  %v3327_v42 = vpop.xlane.xlu0 %541  ;;  %v1550_v53 = vsel %vm400_vm0, %v2176_v59, 0.0  ;;  %v594_v11 = vsel %vm400_vm0, %v3349_v34, 0.0 }
 0x1e4   :  { %v1735_v63 = vmul.f32 0.00016666666, %v1203_v46  ;;  %2181 = vpow2.f32 %v1452_v56 }
 0x1e6   :  { %v1811_v32 = vadd.f32 %v1773_v40, %v1735_v63  ;;  %1551 = vadd.xlane.f32.xlu0 %v1550_v53  ;;  %v686_v63 = vsel %vm266_vm2, %v3356_v43, 0.0  ;;  %v3368_v40 = vpop.permute.xlu1 %210  ;;  %v340_v53 = vmul.f32 2.0, %v3261_v8 }
 0x1e7   :  { %444 = vadd.xlane.f32.xlu1 %v443_v24  ;;  %v3344_v46 = vpop.xlane.xlu0 %1500  ;;  %v760_v4 = vsel %vm400_vm0, %v686_v63, 0.0  ;;  %v3374_v24 = vld [vmem:[%s4167_s0 + $0x100] sm:$0xff] }
 0x1e8   :  { %v1887_v17 = vadd.f32 %v1849_v28, %v1811_v32  ;;  %v1384_v22 = vsub.f32 %v3374_v24, %v2970_v1  ;;  %v1553_v28 = vsel %vm400_vm0, %v2178_v60, 0.0  ;;  %v3388_v32 = vld [vmem:[%s4167_s0 + $0x98] sm:$0xff]  ;;  %v378_v60 = vsel %vm302_vm5, %v340_v53, 0.0 }
 0x1e9   :  { %v341_v53 = vmul.f32 2.0, %v3318_v2  ;;  %vm305_vm12 = vcmp.gt.f32.partialorder %v3388_v32, 0.0  ;;  %vm308_vm5 = vcmp.gt.f32.partialorder %v3180_v6, 0.0 }
 0x1ea   :  { %1926 = vst.msk [vmem:[#allocation2 + $0x18] sm:$0xff] %vm16_vm10, %v1887_v17  ;;  %595 = vadd.xlane.f32.xlu0 %v594_v11  ;;  %v687_v11 = vsel %vm267_vm4, %v3388_v32, 0.0  ;;  %v1454_v63 = vmul.f32 1.442695, %v1384_v22  ;;  %v3391_v56 = vpop.permute.xlu1 %216  ;;  %v449_v22 = vsel %vm400_vm0, %v378_v60, 0.0  ;;  %vm273_vm4 = vcmp.eq.s32.totalorder %v2707_v29, %v3368_v40 }
 0x1eb   :  { %761 = vadd.xlane.f32.xlu1 %v760_v4  ;;  %v3364_v59 = vpop.xlane.xlu0 %544  ;;  %v763_v8 = vsel %vm400_vm0, %v687_v11, 0.0  ;;  %v1385_v4 = vsub.f32 %v3397_v12, %v2973_v15  ;;  %v637_v40 = vmul.f32 0.1, %v3252_v45 }
 0x1ec   :  { %v2180_v17 = vpop.eup %2179  ;;  %2183 = vpow2.f32 %v1454_v63  ;;  %v688_v63 = vsel %vm268_vm6, %v3416_v7, 0.0 }
 0x1ed   :  { %v766_v2 = vsel %vm400_vm0, %v688_v63, 0.0 }
 0x1ee   :  { %1554 = vadd.xlane.f32.xlu0 %v1553_v28  ;;  %v1556_v28 = vsel %vm400_vm0, %v2180_v17, 0.0  ;;  %v3419_v60 = vpop.permute.xlu1 %222  ;;  %v379_v17 = vsel %vm303_vm7, %v341_v53, 0.0  ;;  %vm309_vm7 = vcmp.gt.f32.partialorder %v3226_v16, 0.0 }
 0x1ef   :  { %447 = vadd.xlane.f32.xlu1 %v446_v5  ;;  %v3381_v13 = vpop.xlane.xlu0 %1503  ;;  %v452_v53 = vsel %vm400_vm0, %v379_v17, 0.0 }
 0x1f0   :  { %4257 = vst [vmem:[#allocation48_spill] sm:$0xff] %v3381_v13 }
 0x1f2   :  { %598 = vadd.xlane.f32.xlu0 %v597_v20  ;;  %v1456_v20 = vmul.f32 1.442695, %v1385_v4  ;;  %v3437_v63 = vpop.permute.xlu1 %228 }
 0x1f3   :  { %764 = vadd.xlane.f32.xlu1 %v763_v8  ;;  %v3401_v5 = vpop.xlane.xlu0 %547  ;;  %v600_v8 = vsel %vm400_vm0, %v3212_v35, 0.0  ;;  %4259 = vst [vmem:[#allocation50_spill] sm:$0xff] %v3437_v63 }
 0x1f4   :  { %2185 = vpow2.f32 %v1456_v20 }
 0x1f5   :  { %2187 = vlog2.f32 %v3004_v37 }
 0x1f6   :  { %1557 = vadd.xlane.f32.xlu0 %v1556_v28  ;;  %v2182_v28 = vpop.eup %2181 }
 0x1f7   :  { %450 = vadd.xlane.f32.xlu1 %v449_v22  ;;  %v3409_v11 = vpop.xlane.xlu0 %1506  ;;  %v3427_v22 = vld [vmem:[%s4167_s0 + $0x110] sm:$0xff]  ;;  %v1559_v20 = vsel %vm400_vm0, %v2182_v28, 0.0  ;;  %v769_v28 = vsel %vm400_vm0, %v689_v9, 0.0  ;;  %v343_v9 = vmul.f32 2.0, %v3388_v32 }
 0x1f8   :  { %4258 = vst [vmem:[#allocation49_spill] sm:$0xff] %v3409_v11  ;;  %v1386_v15 = vsub.f32 %v3427_v22, %v2979_v58  ;;  %v603_v58 = vsel %vm400_vm0, %v3244_v23, 0.0  ;;  %v859_v11 = vand.u32 2147483647, %v3038_v3 }
 0x1f9   :  { %v2184_v37 = vpop.eup %2183 }
 0x1fa   :  { %601 = vadd.xlane.f32.xlu0 %v600_v8  ;;  %v342_v8 = vmul.f32 2.0, %v3356_v43  ;;  %v1458_v17 = vmul.f32 1.442695, %v1386_v15  ;;  %v3458_v15 = vpop.permute.xlu1 %234 }
 0x1fb   :  { %767 = vadd.xlane.f32.xlu1 %v766_v2  ;;  %v3422_v4 = vpop.xlane.xlu0 %550 }
 0x1fc   :  { %v380_v1 = vsel %vm304_vm9, %v342_v8, 0.0  ;;  %2189 = vpow2.f32 %v1458_v17  ;;  %v1562_v8 = vsel %vm400_vm0, %v2184_v37, 0.0  ;;  %vm310_vm9 = vcmp.gt.f32.partialorder %v3272_v33, 0.0 }
 0x1fe   :  { %1560 = vadd.xlane.f32.xlu0 %v1559_v20  ;;  %v3449_v20 = vld [vmem:[%s4167_s0 + $0x118] sm:$0xff]  ;;  %v3470_v63 = vpop.permute.xlu1 %240 }
 0x1ff   :  { %453 = vadd.xlane.f32.xlu1 %v452_v53  ;;  %v3440_v2 = vpop.xlane.xlu0 %1509  ;;  %v1387_v43 = vsub.f32 %v3449_v20, %v2982_v21  ;;  %v631_v53 = vmul.f32 0.1, %v3015_v48 }
 0x200   :  { %4260 = vst [vmem:[#allocation51_spill] sm:$0xff] %v3440_v2  ;;  %v4262_v2 = vld [vmem:[#allocation6_spill] sm:$0xff] }
 0x201   :  { %vm270_vm11 = vcmp.eq.s32.totalorder %v2707_v29, %v4262_v2  ;;  %4263 = vst [vmem:[#allocation6_spill] sm:$0xff] %v3458_v15  ;;  %v1460_v48 = vmul.f32 1.442695, %v1387_v43  ;;  %v606_v2 = vsel %vm400_vm0, %v3297_v57, 0.0  ;;  %v381_v15 = vsel %vm305_vm12, %v343_v9, 0.0 }
 0x202   :  { %604 = vadd.xlane.f32.xlu0 %v603_v58  ;;  %v455_v58 = vsel %vm400_vm0, %v380_v1, 0.0  ;;  %v690_v17 = vsel %vm270_vm11, %v3180_v6, 0.0  ;;  %v2186_v1 = vpop.eup %2185  ;;  %v1011_v9 = vmul.f32 2.0, %v3038_v3  ;;  %vm275_vm11 = vcmp.eq.s32.totalorder %v2707_v29, %v3391_v56 }
 0x203   :  { %770 = vadd.xlane.f32.xlu1 %v769_v28  ;;  %v3454_v30 = vpop.xlane.xlu0 %553  ;;  %v821_v28 = vand.u32 2147483647, %v631_v53  ;;  %2191 = vpow2.f32 %v1460_v48  ;;  %v1565_v43 = vsel %vm400_vm0, %v2186_v1, 0.0  ;;  %v3479_v53 = vld [vmem:[%s4167_s0 + $0x120] sm:$0xff]  ;;  %v609_v1 = vsel %vm400_vm0, %v3335_v55, 0.0 }
 0x204   :  { %4261 = vst [vmem:[#allocation52_spill] sm:$0xff] %v3454_v30  ;;  %v2188_v30 = vpop.eup %2187 }
 0x205   :  { %v897_v37 = vmax.f32.f32 %v821_v28, %v859_v11  ;;  %v1388_v11 = vsub.f32 %v3479_v53, %v2991_v41  ;;  %v1583_v48 = vmul.f32 0.6931472, %v2188_v30  ;;  %v3498_v30 = vld [vmem:[%s4167_s0 + $0x128] sm:$0xf] }
 0x206   :  { %1563 = vadd.xlane.f32.xlu0 %v1562_v8  ;;  %v772_v8 = vsel %vm400_vm0, %v690_v17, 0.0 }
 0x207   :  { %456 = vadd.xlane.f32.xlu1 %v455_v58  ;;  %v3465_v21 = vpop.xlane.xlu0 %1512  ;;  %v458_v58 = vsel %vm400_vm0, %v381_v15, 0.0  ;;  %v935_v28 = vmul.f32 2.0, %v897_v37  ;;  %v1462_v15 = vmul.f32 1.442695, %v1388_v11  ;;  %v1389_v37 = vsub.f32 %v3498_v30, %v2993_v38  ;;  %v4269_v11 = vld [vmem:[#allocation7_spill] sm:$0xff] }
 0x208   :  { %4264 = vst [vmem:[#allocation53_spill] sm:$0xff] %v3465_v21  ;;  %vm272_vm2 = vcmp.eq.s32.totalorder %v2707_v29, %v4269_v11 }
 0x209   :  { %2193 = vpow2.f32 %v1462_v15  ;;  %v1464_v57 = vmul.f32 1.442695, %v1389_v37  ;;  %v612_v15 = vsel %vm400_vm0, %v3374_v24, 0.0 }
 0x20a   :  { %607 = vadd.xlane.f32.xlu0 %v606_v2  ;;  %v344_v2 = vmul.f32 2.0, %v3416_v7  ;;  %v1049_v7 = vsel %vm973_vm14, %v1011_v9, 0.0  ;;  %2195 = vlog2.f32 %v3064_v47  ;;  %vm311_vm14 = vcmp.gt.f32.partialorder %v3311_v36, 0.0 }
 0x20b   :  { %773 = vadd.xlane.f32.xlu1 %v772_v8  ;;  %v3473_v32 = vpop.xlane.xlu0 %556  ;;  %v3502_v8 = vpop.permute.xlu1 %246  ;;  %2197 = vpow2.f32 %v1464_v57 }
 0x20c   :  { %4265 = vst [vmem:[#allocation54_spill] sm:$0xff] %v3473_v32  ;;  %4267 = vst [vmem:[#allocation56_spill] sm:$0xff] %v3502_v8  ;;  %v382_v21 = vsel %vm306_vm15, %v344_v2, 0.0  ;;  %v775_v32 = vsel %vm400_vm0, %v691_v51, 0.0  ;;  %2199 = vlog2.f32 %v3071_v18  ;;  %vm283_vm15 = vcmp.eq.s32.totalorder %v2707_v29, %v3470_v63 }
 0x20d   :  { %v461_v9 = vsel %vm400_vm0, %v382_v21, 0.0  ;;  %v692_v21 = vsel %vm272_vm2, %v3272_v33, 0.0  ;;  %2201 = vlog2.f32 %v3112_v14  ;;  %vm319_vm2 = vcmp.gt.f32.partialorder %v3397_v12, 0.0 }
 0x20e   :  { %1566 = vadd.xlane.f32.xlu0 %v1565_v43  ;;  %v2190_v43 = vpop.eup %2189  ;;  %v778_v37 = vsel %vm400_vm0, %v692_v21, 0.0  ;;  %v4271_v21 = vld [vmem:[#allocation8_spill] sm:$0xff]  ;;  %2203 = vlog2.f32 %v3198_v50 }
 0x20f   :  { %459 = vadd.xlane.f32.xlu1 %v458_v58  ;;  %v3490_v17 = vpop.xlane.xlu0 %1515  ;;  %v4268_v58 = vld [vmem:[#allocation14_spill] sm:$0xff]  ;;  %v1568_v8 = vsel %vm400_vm0, %v2190_v43, 0.0  ;;  %vm274_vm6 = vcmp.eq.s32.totalorder %v2707_v29, %v4271_v21  ;;  %2205 = vlog2.f32 %v3287_v39 }
 0x210   :  { %4266 = vst [vmem:[#allocation55_spill] sm:$0xff] %v3490_v17  ;;  %v1657_v41 = vadd.f32 %v1583_v48, %v4268_v58  ;;  %v1125_v17 = vsub.f32 %v1049_v7, %v935_v28  ;;  %2207 = vlog2.f32 %v3344_v46 }
 0x212   :  { %610 = vadd.xlane.f32.xlu0 %v609_v1  ;;  %v1695_v48 = vsub.f32 %v1657_v41, %v3038_v3  ;;  %v1163_v28 = vand.u32 2147483647, %v1125_v17  ;;  %v345_v1 = vmul.f32 2.0, %v3133_v49  ;;  %v2192_v41 = vpop.eup %2191  ;;  %v1847_v49 = vld [vmem:[#allocation2 + $0x8] sm:$0xff] }
 0x213   :  { %776 = vadd.xlane.f32.xlu1 %v775_v32  ;;  %v3508_v13 = vpop.xlane.xlu0 %559  ;;  %v1571_v58 = vsel %vm400_vm0, %v2192_v41, 0.0  ;;  %v4272_v41 = vsub.f32 %v3096_v54, %v3099_v44  ;;  %v694_v44 = vsel %vm274_vm6, %v3349_v34, 0.0  ;;  %vm320_vm6 = vcmp.gt.f32.partialorder %v3427_v22, 0.0 }
 0x214   :  { %v406_v38 = vpop.xlane.xlu1 %405  ;;  %v1771_v3 = vmul.f32 0.0016666667, %v1695_v48  ;;  %v383_v17 = vsel %vm307_vm3, %v345_v1, 0.0  ;;  %v4270_v48 = vsub.f32 %v3125_v0, %v3119_v19  ;;  %v693_v19 = vsel %vm273_vm4, %v3311_v36, 0.0 }
 0x215   :  { %v1087_v2 = vsub.f32 %v406_v38, %v1049_v7  ;;  %v464_v11 = vsel %vm400_vm0, %v383_v17, 0.0  ;;  %v1850_v17 = vld [vmem:[#allocation2 + $0x20] sm:$0xff]  ;;  %vm312_vm4 = vcmp.gt.f32.partialorder %v3349_v34, 0.0 }
 0x216   :  { %1569 = vadd.xlane.f32.xlu0 %v1568_v8  ;;  %v2194_v18 = vpop.eup %2193 }
 0x217   :  { %v1201_v32 = vadd.f32 %v1163_v28, %v1087_v2  ;;  %462 = vadd.xlane.f32.xlu1 %v461_v9  ;;  %v3516_v51 = vpop.xlane.xlu0 %1518  ;;  %v1166_v28 = vand.u32 2147483647, %v4270_v48  ;;  %v346_v2 = vmul.f32 2.0, %v3180_v6  ;;  %v4273_v48 = vsub.f32 %v3217_v26, %v3207_v62 }
 0x218   :  { %v3524_v38 = vpop.xlane.xlu1 %728  ;;  %v784_v62 = vsel %vm400_vm0, %v694_v44, 0.0 }
 0x219   :  { %v1733_v47 = vmul.f32 0.00016666666, %v1201_v32  ;;  %vm979_vm12 = vcmp.gt.f32.partialorder %v3524_v38, 0.0 }
 0x21a   :  { %613 = vadd.xlane.f32.xlu0 %v612_v15  ;;  %v615_v15 = vsel %vm400_vm0, %v3397_v12, 0.0 }
 0x21b   :  { %v1809_v8 = vadd.f32 %v1771_v3, %v1733_v47  ;;  %779 = vadd.xlane.f32.xlu1 %v778_v37  ;;  %v3527_v7 = vpop.xlane.xlu0 %562  ;;  %v1774_v3 = vmul.f32 0.0016666667, %v4272_v41  ;;  %v384_v47 = vsel %vm308_vm5, %v346_v2, 0.0  ;;  %v2196_v37 = vpop.eup %2195  ;;  %v865_v2 = vand.u32 2147483647, %v3524_v38 }
 0x21c   :  { %v415_v43 = vpop.xlane.xlu1 %414  ;;  %v467_v54 = vsel %vm400_vm0, %v384_v47, 0.0  ;;  %vm277_vm5 = vcmp.eq.s32.totalorder %v2707_v29, %v3419_v60 }
 0x21d   :  { %v1885_v57 = vadd.f32 %v1847_v49, %v1809_v8  ;;  %v1090_v9 = vsub.f32 %v415_v43, %v3125_v0  ;;  %v781_v49 = vsel %vm400_vm0, %v693_v19, 0.0  ;;  %v827_v19 = vand.u32 2147483647, %v637_v40 }
 0x21e   :  { %1572 = vadd.xlane.f32.xlu0 %v1571_v58  ;;  %v347_v58 = vmul.f32 2.0, %v3226_v16  ;;  %v618_v16 = vsel %vm400_vm0, %v3427_v22, 0.0 }
 0x21f   :  { %1924 = vst.msk [vmem:[#allocation2 + $0x8] sm:$0xff] %vm16_vm10, %v1885_v57  ;;  %v1204_v1 = vadd.f32 %v1166_v28, %v1090_v9  ;;  %465 = vadd.xlane.f32.xlu1 %v464_v11  ;;  %v3541_v32 = vpop.xlane.xlu0 %1521  ;;  %v1574_v57 = vsel %vm400_vm0, %v2194_v18, 0.0  ;;  %v1167_v28 = vand.u32 2147483647, %v4273_v48  ;;  %v1017_v48 = vmul.f32 2.0, %v3524_v38 }
 0x220   :  { %v3549_v0 = vpop.xlane.xlu1 %731 }
 0x221   :  { %v1736_v6 = vmul.f32 0.00016666666, %v1204_v1  ;;  %v2198_v1 = vpop.eup %2197  ;;  %v866_v56 = vand.u32 2147483647, %v3549_v0  ;;  %vm980_vm3 = vcmp.gt.f32.partialorder %v3549_v0, 0.0 }
 0x222   :  { %616 = vadd.xlane.f32.xlu0 %v615_v15  ;;  %v1593_v15 = vmul.f32 0.6931472, %v2196_v37  ;;  %v4275_v37 = vld [vmem:[#allocation15_spill] sm:$0xff] }
 0x223   :  { %v1812_v8 = vadd.f32 %v1774_v3, %v1736_v6  ;;  %782 = vadd.xlane.f32.xlu1 %v781_v49  ;;  %v3558_v43 = vpop.xlane.xlu0 %565  ;;  %v385_v6 = vsel %vm309_vm7, %v347_v58, 0.0  ;;  %v4274_v3 = vsub.f32 %v3175_v25, %v3185_v61  ;;  %v903_v49 = vmax.f32.f32 %v827_v19, %v865_v2 }
 0x224   :  { %v418_v11 = vpop.xlane.xlu1 %417  ;;  %v1662_v40 = vadd.f32 %v1593_v15, %v4275_v37  ;;  %v470_v58 = vsel %vm400_vm0, %v385_v6, 0.0  ;;  %v348_v25 = vmul.f32 2.0, %v3272_v33  ;;  %v4277_v15 = vld [vmem:[#allocation9_spill] sm:$0xff]  ;;  %v695_v6 = vsel %vm275_vm11, %v3160_v27, 0.0  ;;  %v4278_v37 = vld [vmem:[#allocation16_spill] sm:$0xff] }
 0x225   :  { %v1888_v9 = vadd.f32 %v1850_v17, %v1812_v8  ;;  %v1091_v45 = vsub.f32 %v418_v11, %v3217_v26  ;;  %v1775_v47 = vmul.f32 0.0016666667, %v4274_v3  ;;  %v1577_v17 = vsel %vm512_vm1, %v2198_v1, 0.0  ;;  %v1851_v8 = vld [vmem:[#allocation2 + $0x28] sm:$0xff] }
 0x226   :  { %1575 = vadd.xlane.f32.xlu0 %v1574_v57  ;;  %v355_v11 = vmul.f32 2.0, %v3335_v55  ;;  %v2200_v57 = vpop.eup %2199  ;;  %v1700_v14 = vsub.f32 %v1662_v40, %v3267_v52  ;;  %v941_v1 = vmul.f32 2.0, %v903_v49  ;;  %vm276_vm13 = vcmp.eq.s32.totalorder %v2707_v29, %v4277_v15  ;;  %v1852_v40 = vld [vmem:[#allocation2 + $0x30] sm:$0xff] }
 0x227   :  { %1927 = vst.msk [vmem:[#allocation2 + $0x20] sm:$0xff] %vm16_vm10, %v1888_v9  ;;  %v1205_v18 = vadd.f32 %v1167_v28, %v1091_v45  ;;  %468 = vadd.xlane.f32.xlu1 %v467_v54  ;;  %v3574_v21 = vpop.xlane.xlu0 %1524  ;;  %v4276_v9 = vsub.f32 %v3303_v31, %v3292_v10  ;;  %v1595_v19 = vmul.f32 0.6931472, %v2200_v57  ;;  %v621_v52 = vsel %vm400_vm0, %v3449_v20, 0.0 }
 0x228   :  { %v3578_v41 = vpop.xlane.xlu1 %734  ;;  %v393_v10 = vsel %vm317_vm8, %v355_v11, 0.0  ;;  %v639_v15 = vmul.f32 0.1, %v3364_v59  ;;  %vm313_vm11 = vcmp.gt.f32.partialorder %v3160_v27, 0.0 }
 0x229   :  { %v1737_v26 = vmul.f32 0.00016666666, %v1205_v18  ;;  %v1168_v45 = vand.u32 2147483647, %v4276_v9  ;;  %v638_v18 = vmul.f32 0.1, %v3327_v42  ;;  %v1663_v33 = vadd.f32 %v1595_v19, %v4278_v37  ;;  %v2202_v19 = vpop.eup %2201 }
 0x22a   :  { %619 = vadd.xlane.f32.xlu0 %v618_v16  ;;  %v1055_v42 = vsel %vm979_vm12, %v1017_v48, 0.0  ;;  %v703_v9 = vsel %vm283_vm15, %v3449_v20, 0.0  ;;  %v867_v59 = vand.u32 2147483647, %v3578_v41  ;;  %vm981_vm8 = vcmp.gt.f32.partialorder %v3578_v41, 0.0 }
 0x22b   :  { %v1813_v54 = vadd.f32 %v1775_v47, %v1737_v26  ;;  %785 = vadd.xlane.f32.xlu1 %v784_v62  ;;  %v3589_v44 = vpop.xlane.xlu0 %568  ;;  %v386_v62 = vsel %vm310_vm9, %v348_v25, 0.0  ;;  %v1776_v26 = vmul.f32 0.0016666667, %v1700_v14  ;;  %v349_v47 = vmul.f32 2.0, %v3311_v36 }
 0x22c   :  { %v421_v61 = vpop.xlane.xlu1 %420  ;;  %v1131_v49 = vsub.f32 %v1055_v42, %v941_v1  ;;  %v696_v25 = vsel %vm276_vm13, %v3212_v35, 0.0  ;;  %v1701_v14 = vsub.f32 %v1663_v33, %v3524_v38  ;;  %v473_v50 = vsel %vm400_vm0, %v386_v62, 0.0 }
 0x22d   :  { %v1889_v28 = vadd.f32 %v1851_v8, %v1813_v54  ;;  %v1092_v2 = vsub.f32 %v421_v61, %v3303_v31  ;;  %v787_v8 = vsel %vm400_vm0, %v695_v6, 0.0  ;;  %v494_v54 = vsel %vm400_vm0, %v393_v10, 0.0 }
 0x22e   :  { %1578 = vadd.xlane.f32.xlu0 %v1577_v17  ;;  %v790_v38 = vsel %vm400_vm0, %v696_v25, 0.0  ;;  %v811_v63 = vsel %vm400_vm0, %v703_v9, 0.0  ;;  %v357_v6 = vmul.f32 2.0, %v3397_v12  ;;  %v627_v33 = vsel %vm512_vm1, %v3498_v30, 0.0  ;;  %v4279_v25 = vld [vmem:[#allocation10_spill] sm:$0xff] }
 0x22f   :  { %1928 = vst.msk [vmem:[#allocation2 + $0x28] sm:$0xff] %vm16_vm10, %v1889_v28  ;;  %v1206_v16 = vadd.f32 %v1168_v45, %v1092_v2  ;;  %471 = vadd.xlane.f32.xlu1 %v470_v58  ;;  %v3611_v31 = vpop.xlane.xlu0 %1527  ;;  %v828_v58 = vand.u32 2147483647, %v638_v18  ;;  %v387_v45 = vsel %vm311_vm14, %v349_v47, 0.0  ;;  %v1169_v2 = vand.u32 2147483647, %v1131_v49 }
 0x230   :  { %v3619_v3 = vpop.xlane.xlu1 %737  ;;  %v476_v36 = vsel %vm400_vm0, %v387_v45, 0.0  ;;  %v350_v18 = vmul.f32 2.0, %v3349_v34  ;;  %v1597_v47 = vmul.f32 0.6931472, %v2202_v19  ;;  %v1853_v49 = vld [vmem:[#allocation2 + $0x38] sm:$0xff]  ;;  %vm278_vm7 = vcmp.eq.s32.totalorder %v2707_v29, %v4279_v25  ;;  %v2204_v45 = vpop.eup %2203 }
 0x231   :  { %v1738_v17 = vmul.f32 0.00016666666, %v1206_v16  ;;  %v904_v1 = vmax.f32.f32 %v828_v58, %v866_v56  ;;  %v1018_v16 = vmul.f32 2.0, %v3549_v0  ;;  %vm322_vm9 = vcmp.gt.f32.partialorder %v3479_v53, 0.0 }
 0x232   :  { %622 = vadd.xlane.f32.xlu0 %v621_v52  ;;  %v388_v9 = vsel %vm312_vm4, %v350_v18, 0.0  ;;  %v360_v34 = vmul.f32 2.0, %v3479_v53  ;;  %vm982_vm12 = vcmp.gt.f32.partialorder %v3619_v3, 0.0  ;;  %vm314_vm14 = vcmp.gt.f32.partialorder %v3212_v35, 0.0 }
 0x233   :  { %v1814_v11 = vadd.f32 %v1776_v26, %v1738_v17  ;;  %788 = vadd.xlane.f32.xlu1 %v787_v8  ;;  %v3631_v57 = vpop.xlane.xlu0 %571  ;;  %v1777_v26 = vmul.f32 0.0016666667, %v1701_v14  ;;  %v829_v17 = vand.u32 2147483647, %v639_v15  ;;  %v1056_v39 = vsel %vm980_vm3, %v1018_v16, 0.0  ;;  %v4280_v14 = vld [vmem:[#allocation17_spill] sm:$0xff] }
 0x234   :  { %v424_v61 = vpop.xlane.xlu1 %423  ;;  %v351_v16 = vmul.f32 2.0, %v3160_v27 }
 0x235   :  { %v1890_v48 = vadd.f32 %v1852_v40, %v1814_v11  ;;  %v1093_v28 = vsub.f32 %v424_v61, %v1055_v42  ;;  %v942_v42 = vmul.f32 2.0, %v904_v1  ;;  %v358_v40 = vmul.f32 2.0, %v3427_v22 }
 0x236   :  { %495 = vadd.xlane.f32.xlu0 %v494_v54  ;;  %v905_v58 = vmax.f32.f32 %v829_v17, %v867_v59  ;;  %v395_v11 = vsel %vm319_vm2, %v357_v6, 0.0  ;;  %v1664_v61 = vadd.f32 %v1597_v47, %v4280_v14  ;;  %v479_v47 = vsel %vm400_vm0, %v388_v9, 0.0 }
 0x237   :  { %1929 = vst.msk [vmem:[#allocation2 + $0x30] sm:$0xff] %vm16_vm10, %v1890_v48  ;;  %v1207_v52 = vadd.f32 %v1169_v2, %v1093_v28  ;;  %474 = vadd.xlane.f32.xlu1 %v473_v50  ;;  %v3649_v10 = vpop.xlane.xlu0 %1530  ;;  %v1132_v60 = vsub.f32 %v1056_v39, %v942_v42  ;;  %v697_v50 = vsel %vm277_vm5, %v3244_v23, 0.0  ;;  %v640_v48 = vmul.f32 0.1, %v3401_v5 }
 0x238   :  { %v1019_v2 = vmul.f32 2.0, %v3578_v41  ;;  %v500_v1 = vsel %vm400_vm0, %v395_v11, 0.0  ;;  %v396_v15 = vsel %vm320_vm6, %v358_v40, 0.0  ;;  %v943_v23 = vmul.f32 2.0, %v905_v58  ;;  %v4281_v40 = vld [vmem:[#allocation18_spill] sm:$0xff]  ;;  %v1854_v11 = vld [vmem:[#allocation2 + $0x40] sm:$0xff] }
 0x239   :  { %v1739_v62 = vmul.f32 0.00016666666, %v1207_v52  ;;  %v1702_v5 = vsub.f32 %v1664_v61, %v3549_v0  ;;  %v1170_v52 = vand.u32 2147483647, %v1132_v60  ;;  %v793_v18 = vsel %vm400_vm0, %v697_v50, 0.0  ;;  %v4282_v61 = vld [vmem:[#allocation47_spill] sm:$0xff] }
 0x23a   :  { %812 = vadd.xlane.f32.xlu0 %v811_v63  ;;  %v868_v63 = vand.u32 2147483647, %v3619_v3  ;;  %v830_v59 = vand.u32 2147483647, %v640_v48  ;;  %v1057_v0 = vsel %vm981_vm8, %v1019_v2, 0.0  ;;  %v398_v17 = vsel %vm322_vm9, %v360_v34, 0.0 }
 0x23b   :  { %v1815_v56 = vadd.f32 %v1777_v26, %v1739_v62  ;;  %791 = vadd.xlane.f32.xlu1 %v790_v38  ;;  %v3663_v37 = vpop.xlane.xlu0 %574  ;;  %v503_v26 = vsel %vm400_vm0, %v396_v15, 0.0  ;;  %v1133_v46 = vsub.f32 %v1057_v0, %v943_v23  ;;  %v641_v58 = vmul.f32 0.1, %v3422_v4 }
 0x23c   :  { %v3668_v8 = vpop.xlane.xlu1 %740  ;;  %v698_v27 = vsel %vm278_vm7, %v4282_v61, 0.0  ;;  %v389_v50 = vsel %vm313_vm11, %v351_v16, 0.0  ;;  %v509_v9 = vsel %vm400_vm0, %v398_v17, 0.0  ;;  %v1020_v4 = vmul.f32 2.0, %v3619_v3 }
 0x23d   :  { %v1891_v54 = vadd.f32 %v1853_v49, %v1815_v56  ;;  %v1778_v56 = vmul.f32 0.0016666667, %v1702_v5  ;;  %v1171_v2 = vand.u32 2147483647, %v1133_v46  ;;  %v4283_v5 = vld [vmem:[#allocation48_spill] sm:$0xff]  ;;  %v4285_v46 = vld [vmem:[#allocation19_spill] sm:$0xff] }
 0x23e   :  { %628 = vadd.xlane.f32.xlu0 %v627_v33  ;;  %v906_v33 = vmax.f32.f32 %v830_v59, %v868_v63  ;;  %2209 = vlog2.f32 %v4283_v5  ;;  %v831_v25 = vand.u32 2147483647, %v641_v58  ;;  %v482_v63 = vsel %vm400_vm0, %v389_v50, 0.0 }
 0x23f   :  { %1930 = vst.msk [vmem:[#allocation2 + $0x38] sm:$0xff] %vm16_vm10, %v1891_v54  ;;  %477 = vadd.xlane.f32.xlu1 %v476_v36  ;;  %v3681_v28 = vpop.xlane.xlu0 %1533  ;;  %v1599_v36 = vmul.f32 0.6931472, %v2204_v45  ;;  %v2206_v54 = vpop.eup %2205  ;;  %v1058_v16 = vsel %vm982_vm12, %v1020_v4, 0.0  ;;  %v352_v59 = vmul.f32 2.0, %v3212_v35  ;;  %vm983_vm15 = vcmp.gt.f32.partialorder %v3668_v8, 0.0 }
 0x240   :  { %v427_v38 = vpop.xlane.xlu1 %426  ;;  %v944_v23 = vmul.f32 2.0, %v906_v33  ;;  %v1601_v34 = vmul.f32 0.6931472, %v2206_v54  ;;  %v4286_v33 = vld [vmem:[#allocation52_spill] sm:$0xff]  ;;  %v1021_v54 = vmul.f32 2.0, %v3668_v8  ;;  %vm316_vm6 = vcmp.gt.f32.partialorder %v4282_v61, 0.0 }
 0x241   :  { %v1094_v19 = vsub.f32 %v427_v38, %v1056_v39  ;;  %v1665_v39 = vadd.f32 %v1599_v36, %v4281_v40  ;;  %v4284_v36 = vld [vmem:[#allocation50_spill] sm:$0xff]  ;;  %v642_v40 = vmul.f32 0.1, %v4286_v33  ;;  %vm318_vm11 = vcmp.gt.f32.partialorder %v3374_v24, 0.0 }
 0x242   :  { %501 = vadd.xlane.f32.xlu0 %v500_v1  ;;  %v869_v1 = vand.u32 2147483647, %v3668_v8  ;;  %vm279_vm13 = vcmp.eq.s32.totalorder %v2707_v29, %v4284_v36  ;;  %v1666_v17 = vadd.f32 %v1601_v34, %v4285_v46  ;;  %v2290_v34 = vld [vmem:[%s4167_s0 + $0xe8] sm:$0xff]  ;;  %v1856_v46 = vld [vmem:[#allocation2 + $0x50] sm:$0xff] }
 0x243   :  { %v1208_v6 = vadd.f32 %v1170_v52, %v1094_v19  ;;  %794 = vadd.xlane.f32.xlu1 %v793_v18  ;;  %v3693_v62 = vpop.xlane.xlu0 %577  ;;  %v1703_v45 = vsub.f32 %v1665_v39, %v3578_v41  ;;  %v796_v19 = vsel %vm400_vm0, %v698_v27, 0.0  ;;  %v390_v27 = vsel %vm314_vm14, %v352_v59, 0.0 }
 0x244   :  { %v3698_v42 = vpop.xlane.xlu1 %743  ;;  %v1704_v35 = vsub.f32 %v1666_v17, %v3619_v3  ;;  %v353_v5 = vmul.f32 2.0, %v2290_v34  ;;  %vm315_vm3 = vcmp.gt.f32.partialorder %v2290_v34, 0.0  ;;  %v354_v34 = vmul.f32 2.0, %v4282_v61 }
 0x245   :  { %v1740_v49 = vmul.f32 0.00016666666, %v1208_v6  ;;  %v907_v6 = vmax.f32.f32 %v831_v25, %v869_v1  ;;  %v4287_v1 = vld [vmem:[#allocation49_spill] sm:$0xff]  ;;  %v4288_v25 = vld [vmem:[#allocation11_spill] sm:$0xff]  ;;  %vm984_vm4 = vcmp.gt.f32.partialorder %v3698_v42, 0.0 }
 0x246   :  { %504 = vadd.xlane.f32.xlu0 %v503_v26  ;;  %v1779_v26 = vmul.f32 0.0016666667, %v1703_v45  ;;  %2211 = vlog2.f32 %v4287_v1  ;;  %vm280_vm2 = vcmp.eq.s32.totalorder %v2707_v29, %v4288_v25  ;;  %v4292_v1 = vld [vmem:[#allocation6_spill] sm:$0xff] }
 0x247   :  { %v1816_v60 = vadd.f32 %v1778_v56, %v1740_v49  ;;  %480 = vadd.xlane.f32.xlu1 %v479_v47  ;;  %v3706_v14 = vpop.xlane.xlu0 %1536  ;;  %v1134_v47 = vsub.f32 %v1058_v16, %v944_v23  ;;  %v1855_v49 = vld [vmem:[#allocation2 + $0x48] sm:$0xff]  ;;  %v2208_v56 = vpop.eup %2207  ;;  %v945_v50 = vmul.f32 2.0, %v907_v6  ;;  %v1059_v23 = vsel %vm983_vm15, %v1021_v54, 0.0  ;;  %v4289_v6 = vld [vmem:[#allocation20_spill] sm:$0xff] }
 0x248   :  { %v430_v48 = vpop.xlane.xlu1 %429  ;;  %v1603_v4 = vmul.f32 0.6931472, %v2208_v56  ;;  %v700_v33 = vsel %vm280_vm2, %v3374_v24, 0.0  ;;  %vm281_vm5 = vcmp.eq.s32.totalorder %v2707_v29, %v4292_v1  ;;  %vm321_vm15 = vcmp.gt.f32.partialorder %v3449_v20, 0.0 }
 0x249   :  { %v1892_v15 = vadd.f32 %v1854_v11, %v1816_v60  ;;  %v1095_v38 = vsub.f32 %v430_v48, %v1057_v0  ;;  %v699_v11 = vsel %vm279_vm13, %v3335_v55, 0.0  ;;  %v1172_v48 = vand.u32 2147483647, %v1134_v47 }
 0x24a   :  { %510 = vadd.xlane.f32.xlu0 %v509_v9  ;;  %v832_v55 = vand.u32 2147483647, %v642_v40  ;;  %v391_v40 = vsel %vm315_vm3, %v353_v5, 0.0  ;;  %vm323_vm3 = vcmp.gt.f32.partialorder %v3498_v30, 0.0 }
 0x24b   :  { %1931 = vst.msk [vmem:[#allocation2 + $0x40] sm:$0xff] %vm16_vm10, %v1892_v15  ;;  %v1209_v41 = vadd.f32 %v1171_v2, %v1095_v38  ;;  %797 = vadd.xlane.f32.xlu1 %v796_v19  ;;  %v3720_v52 = vpop.xlane.xlu0 %580  ;;  %v870_v2 = vand.u32 2147483647, %v3698_v42  ;;  %v799_v15 = vsel %vm400_vm0, %v699_v11, 0.0  ;;  %v2210_v17 = vpop.eup %2209 }
 0x24c   :  { %v3725_v18 = vpop.xlane.xlu1 %746 }
 0x24d   :  { %v1741_v0 = vmul.f32 0.00016666666, %v1209_v41  ;;  %v485_v41 = vsel %vm400_vm0, %v390_v27, 0.0  ;;  %v908_v59 = vmax.f32.f32 %v832_v55, %v870_v2  ;;  %v1023_v61 = vmul.f32 2.0, %v3725_v18 }
 0x24e   :  { %vm985_vm8 = vcmp.gt.f32.partialorder %v3725_v18, 0.0 }
 0x24f   :  { %v1817_v39 = vadd.f32 %v1779_v26, %v1741_v0  ;;  %483 = vadd.xlane.f32.xlu1 %v482_v63  ;;  %v3731_v58 = vpop.xlane.xlu0 %1539  ;;  %v1135_v63 = vsub.f32 %v1059_v23, %v945_v50  ;;  %v1667_v0 = vadd.f32 %v1603_v4, %v4289_v6  ;;  %v4290_v26 = vld [vmem:[#allocation54_spill] sm:$0xff]  ;;  %v802_v4 = vsel %vm400_vm0, %v700_v33, 0.0  ;;  %v1857_v6 = vld [vmem:[#allocation2 + $0x58] sm:$0xff] }
 0x250   :  { %v433_v60 = vpop.xlane.xlu1 %432  ;;  %v643_v47 = vmul.f32 0.1, %v4290_v26  ;;  %v644_v26 = vmul.f32 0.1, %v3508_v13 }
 0x251   :  { %v1893_v9 = vadd.f32 %v1855_v49, %v1817_v39  ;;  %v1096_v45 = vsub.f32 %v433_v60, %v1058_v16  ;;  %v1780_v16 = vmul.f32 0.0016666667, %v1704_v35  ;;  %v871_v39 = vand.u32 2147483647, %v3725_v18 }
 0x252   :  { %v1173_v54 = vand.u32 2147483647, %v1135_v63  ;;  %v1705_v60 = vsub.f32 %v1667_v0, %v3668_v8  ;;  %v1022_v35 = vmul.f32 2.0, %v3698_v42  ;;  %v833_v2 = vand.u32 2147483647, %v643_v47 }
 0x253   :  { %1932 = vst.msk [vmem:[#allocation2 + $0x48] sm:$0xff] %vm16_vm10, %v1893_v9  ;;  %v1210_v38 = vadd.f32 %v1172_v48, %v1096_v45  ;;  %800 = vadd.xlane.f32.xlu1 %v799_v15  ;;  %v3744_v3 = vpop.xlane.xlu0 %583  ;;  %v946_v9 = vmul.f32 2.0, %v908_v59  ;;  %v1605_v45 = vmul.f32 0.6931472, %v2210_v17  ;;  %v4291_v48 = vld [vmem:[#allocation51_spill] sm:$0xff]  ;;  %v2212_v0 = vpop.eup %2211  ;;  %v701_v17 = vsel %vm281_vm5, %v3397_v12, 0.0 }
 0x254   :  { %v3751_v19 = vpop.xlane.xlu1 %749  ;;  %2213 = vlog2.f32 %v4291_v48  ;;  %v909_v5 = vmax.f32.f32 %v833_v2, %v871_v39  ;;  %v834_v12 = vand.u32 2147483647, %v644_v26 }
 0x255   :  { %v1742_v36 = vmul.f32 0.00016666666, %v1210_v38  ;;  %v488_v38 = vsel %vm400_vm0, %v391_v40, 0.0  ;;  %v392_v40 = vsel %vm316_vm6, %v354_v34, 0.0  ;;  %v872_v13 = vand.u32 2147483647, %v3751_v19 }
 0x256   :  { %v947_v39 = vmul.f32 2.0, %v909_v5  ;;  %v491_v2 = vsel %vm400_vm0, %v392_v40, 0.0  ;;  %v4296_v34 = vld [vmem:[#allocation22_spill] sm:$0xff]  ;;  %vm986_vm9 = vcmp.gt.f32.partialorder %v3751_v19, 0.0  ;;  %v4297_v40 = vld [vmem:[#allocation55_spill] sm:$0xff] }
 0x257   :  { %v1818_v49 = vadd.f32 %v1780_v16, %v1742_v36  ;;  %486 = vadd.xlane.f32.xlu1 %v485_v41  ;;  %v3756_v56 = vpop.xlane.xlu0 %1542  ;;  %v1781_v41 = vmul.f32 0.0016666667, %v1705_v60  ;;  %v4293_v36 = vld [vmem:[#allocation12_spill] sm:$0xff]  ;;  %v4294_v16 = vld [vmem:[#allocation21_spill] sm:$0xff] }
 0x258   :  { %v436_v11 = vpop.xlane.xlu1 %435  ;;  %vm282_vm7 = vcmp.eq.s32.totalorder %v2707_v29, %v4293_v36  ;;  %v1668_v59 = vadd.f32 %v1605_v45, %v4294_v16  ;;  %v1061_v45 = vsel %vm985_vm8, %v1023_v61, 0.0 }
 0x259   :  { %v1894_v27 = vadd.f32 %v1856_v46, %v1818_v49  ;;  %v1097_v50 = vsub.f32 %v436_v11, %v1059_v23  ;;  %v1060_v23 = vsel %vm984_vm4, %v1022_v35, 0.0  ;;  %v1607_v35 = vmul.f32 0.6931472, %v2212_v0 }
 0x25a   :  { %v1136_v63 = vsub.f32 %v1060_v23, %v946_v9  ;;  %v1706_v33 = vsub.f32 %v1668_v59, %v3698_v42  ;;  %v702_v1 = vsel %vm282_vm7, %v3427_v22, 0.0  ;;  %v356_v0 = vmul.f32 2.0, %v3374_v24  ;;  %v4299_v24 = vld [vmem:[#allocation23_spill] sm:$0xff] }
 0x25b   :  { %1933 = vst.msk [vmem:[#allocation2 + $0x50] sm:$0xff] %vm16_vm10, %v1894_v27  ;;  %v1211_v15 = vadd.f32 %v1173_v54, %v1097_v50  ;;  %803 = vadd.xlane.f32.xlu1 %v802_v4  ;;  %v3768_v8 = vpop.xlane.xlu0 %586  ;;  %v4295_v27 = vld [vmem:[#allocation53_spill] sm:$0xff]  ;;  %v805_v50 = vsel %vm400_vm0, %v701_v17, 0.0  ;;  %v1137_v4 = vsub.f32 %v1061_v45, %v947_v39  ;;  %v1669_v5 = vadd.f32 %v1607_v35, %v4296_v34 }
 0x25c   :  { %v3770_v55 = vpop.xlane.xlu1 %752  ;;  %v1174_v60 = vand.u32 2147483647, %v1136_v63  ;;  %2215 = vlog2.f32 %v4295_v27  ;;  %v1024_v17 = vmul.f32 2.0, %v3751_v19  ;;  %vm54_vm4 = vcmask 3072  }
 0x25d   :  { %v1743_v25 = vmul.f32 0.00016666666, %v1211_v15  ;;  %v1707_v36 = vsub.f32 %v1669_v5, %v3725_v18  ;;  %v873_v22 = vand.u32 2147483647, %v3770_v55  ;;  %2217 = vlog2.f32 %v4297_v40 }
 0x25e   :  { %v1025_v5 = vmul.f32 2.0, %v3770_v55  ;;  %vm987_vm14 = vcmp.gt.f32.partialorder %v3770_v55, 0.0  ;;  %2219 = vlog2.f32 %v3516_v51 }
 0x25f   :  { %v1819_v47 = vadd.f32 %v1781_v41, %v1743_v25  ;;  %489 = vadd.xlane.f32.xlu1 %v488_v38  ;;  %v3779_v46 = vpop.xlane.xlu0 %1545  ;;  %v1782_v38 = vmul.f32 0.0016666667, %v1706_v33  ;;  %v645_v25 = vmul.f32 0.1, %v3527_v7  ;;  %v1858_v41 = vld [vmem:[#allocation2 + $0x60] sm:$0xff]  ;;  %2221 = vlog2.f32 %v3541_v32  ;;  %v4302_v32 = vld [vmem:[#allocation25_spill] sm:$0xff] }
 0x260   :  { %v439_v49 = vpop.xlane.xlu1 %438  ;;  %v1783_v27 = vmul.f32 0.0016666667, %v1707_v36  ;;  %2223 = vlog2.f32 %v3574_v21 }
 0x261   :  { %v1895_v11 = vadd.f32 %v1857_v6, %v1819_v47  ;;  %v1098_v54 = vsub.f32 %v439_v49, %v1060_v23  ;;  %v910_v23 = vmax.f32.f32 %v834_v12, %v872_v13  ;;  %v2214_v63 = vpop.eup %2213  ;;  %v808_v6 = vsel %vm400_vm0, %v702_v1, 0.0 }
 0x262   :  { %v1175_v47 = vand.u32 2147483647, %v1137_v4  ;;  %v1609_v33 = vmul.f32 0.6931472, %v2214_v63  ;;  %v835_v39 = vand.u32 2147483647, %v645_v25  ;;  %2225 = vlog2.f32 %v3611_v31 }
 0x263   :  { %1934 = vst.msk [vmem:[#allocation2 + $0x58] sm:$0xff] %vm16_vm10, %v1895_v11  ;;  %v1212_v9 = vadd.f32 %v1174_v60, %v1098_v54  ;;  %806 = vadd.xlane.f32.xlu1 %v805_v50  ;;  %v3792_v42 = vpop.xlane.xlu0 %589  ;;  %v948_v49 = vmul.f32 2.0, %v910_v23  ;;  %v624_v54 = vsel %vm400_vm0, %v3479_v53, 0.0  ;;  %v1062_v60 = vsel %vm986_vm9, %v1024_v17, 0.0  ;;  %v1859_v4 = vld [vmem:[#allocation2 + $0x68] sm:$0xff] }
 0x264   :  { %v3794_v48 = vpop.xlane.xlu1 %755  ;;  %v911_v35 = vmax.f32.f32 %v835_v39, %v873_v22  ;;  %2227 = vlog2.f32 %v3649_v10 }
 0x265   :  { %v1744_v15 = vmul.f32 0.00016666666, %v1212_v9  ;;  %v1138_v12 = vsub.f32 %v1062_v60, %v948_v49  ;;  %v394_v9 = vsel %vm318_vm11, %v356_v0, 0.0  ;;  %vm988_vm2 = vcmp.gt.f32.partialorder %v3794_v48, 0.0 }
 0x266   :  { %v497_v63 = vsel %vm400_vm0, %v394_v9, 0.0  ;;  %2229 = vlog2.f32 %v3681_v28 }
 0x267   :  { %v1820_v16 = vadd.f32 %v1782_v38, %v1744_v15  ;;  %492 = vadd.xlane.f32.xlu1 %v491_v2  ;;  %v3803_v59 = vpop.xlane.xlu0 %1548  ;;  %v1670_v2 = vadd.f32 %v1609_v33, %v4299_v24  ;;  %v4300_v15 = vld [vmem:[#allocation56_spill] sm:$0xff]  ;;  %v646_v38 = vmul.f32 0.1, %v3558_v43  ;;  %v1176_v22 = vand.u32 2147483647, %v1138_v12 }
 0x268   :  { %v442_v26 = vpop.xlane.xlu1 %441  ;;  %vm285_vm13 = vcmp.eq.s32.totalorder %v2707_v29, %v4300_v15  ;;  %2231 = vlog2.f32 %v3706_v14 }
 0x269   :  { %v1896_v61 = vadd.f32 %v1858_v41, %v1820_v16  ;;  %v1099_v7 = vsub.f32 %v442_v26, %v1061_v45  ;;  %v4298_v45 = vld [vmem:[#allocation13_spill] sm:$0xff]  ;;  %v2216_v1 = vpop.eup %2215  ;;  %v1708_v25 = vsub.f32 %v1670_v2, %v3751_v19  ;;  %v949_v16 = vmul.f32 2.0, %v911_v35  ;;  %v1860_v35 = vld [vmem:[#allocation2 + $0x70] sm:$0xff] }
 0x26a   :  { %vm284_vm12 = vcmp.eq.s32.totalorder %v2707_v29, %v4298_v45  ;;  %v1611_v43 = vmul.f32 0.6931472, %v2216_v1  ;;  %v836_v19 = vand.u32 2147483647, %v646_v38  ;;  %v705_v51 = vsel %vm285_vm13, %v3498_v30, 0.0 }
 0x26b   :  { %1935 = vst.msk [vmem:[#allocation2 + $0x60] sm:$0xff] %vm16_vm10, %v1896_v61  ;;  %v1213_v18 = vadd.f32 %v1175_v47, %v1099_v7  ;;  %809 = vadd.xlane.f32.xlu1 %v808_v6  ;;  %v3814_v13 = vpop.xlane.xlu0 %592  ;;  %v874_v6 = vand.u32 2147483647, %v3794_v48  ;;  %v704_v26 = vsel %vm284_vm12, %v3479_v53, 0.0  ;;  %v1063_v61 = vsel %vm987_vm14, %v1025_v5, 0.0 }
 0x26c   :  { %v3816_v11 = vpop.xlane.xlu1 %758  ;;  %v359_v7 = vmul.f32 2.0, %v3449_v20  ;;  %v1139_v33 = vsub.f32 %v1063_v61, %v949_v16  ;;  %v1784_v53 = vmul.f32 0.0016666667, %v1708_v25  ;;  %v817_v29 = vsel %vm512_vm1, %v705_v51, 0.0 }
 0x26d   :  { %v1745_v50 = vmul.f32 0.00016666666, %v1213_v18  ;;  %v912_v39 = vmax.f32.f32 %v836_v19, %v874_v6  ;;  %v4301_v18 = vld [vmem:[#allocation24_spill] sm:$0xff]  ;;  %v361_v20 = vmul.f32 2.0, %v3498_v30  ;;  %v875_v2 = vand.u32 2147483647, %v3816_v11 }
 0x26e   :  { %v397_v45 = vsel %vm321_vm15, %v359_v7, 0.0  ;;  %v1177_v1 = vand.u32 2147483647, %v1139_v33  ;;  %v1027_v33 = vmul.f32 2.0, %v3816_v11  ;;  %2233 = vlog2.f32 %v3731_v58 }
 0x26f   :  { %v1821_v23 = vadd.f32 %v1783_v27, %v1745_v50  ;;  %625 = vadd.xlane.f32.xlu1 %v624_v54  ;;  %v3826_v34 = vpop.xlane.xlu0 %1551  ;;  %v1671_v54 = vadd.f32 %v1611_v43, %v4301_v18  ;;  %v814_v27 = vsel %vm400_vm0, %v704_v26, 0.0  ;;  %v2218_v50 = vpop.eup %2217  ;;  %v506_v16 = vsel %vm400_vm0, %v397_v45, 0.0 }
 0x270   :  { %v445_v41 = vpop.xlane.xlu1 %444  ;;  %v1613_v5 = vmul.f32 0.6931472, %v2218_v50  ;;  %v399_v26 = vsel %vm323_vm3, %v361_v20, 0.0  ;;  %v2220_v30 = vpop.eup %2219  ;;  %vm989_vm0 = vcmp.gt.f32.partialorder %v3816_v11, 0.0  ;;  %2235 = vlog2.f32 %v3756_v56 }
 0x271   :  { %v1897_v0 = vadd.f32 %v1859_v4, %v1821_v23  ;;  %v1100_v36 = vsub.f32 %v445_v41, %v1062_v60  ;;  %v647_v60 = vmul.f32 0.1, %v3589_v44  ;;  %v1709_v24 = vsub.f32 %v1671_v54, %v3770_v55  ;;  %v2222_v21 = vpop.eup %2221 }
 0x272   :  { %v1026_v44 = vmul.f32 2.0, %v3794_v48  ;;  %v950_v23 = vmul.f32 2.0, %v912_v39  ;;  %v1672_v19 = vadd.f32 %v1613_v5, %v4302_v32  ;;  %2237 = vlog2.f32 %v3779_v46 }
 0x273   :  { %1936 = vst.msk [vmem:[#allocation2 + $0x68] sm:$0xff] %vm16_vm10, %v1897_v0  ;;  %v1214_v47 = vadd.f32 %v1176_v22, %v1100_v36  ;;  %498 = vadd.xlane.f32.xlu1 %v497_v63  ;;  %v3839_v17 = vpop.xlane.xlu0 %595  ;;  %v837_v25 = vand.u32 2147483647, %v647_v60  ;;  %v1785_v36 = vmul.f32 0.0016666667, %v1709_v24  ;;  %2239 = vlog2.f32 %v3803_v59  ;;  %v1973_v59 = vld [vmem:[#allocation2 + $0x40] sm:$0xff] }
 0x274   :  { %v3842_v49 = vpop.xlane.xlu1 %761  ;;  %v1064_v6 = vsel %vm988_vm2, %v1026_v44, 0.0  ;;  %v1710_v51 = vsub.f32 %v1672_v19, %v3794_v48  ;;  %v649_v44 = vmul.f32 0.1, %v3663_v37  ;;  %2241 = vlog2.f32 %v3826_v34 }
 0x275   :  { %v1746_v40 = vmul.f32 0.00016666666, %v1214_v47  ;;  %v913_v0 = vmax.f32.f32 %v837_v25, %v875_v2  ;;  %v1140_v43 = vsub.f32 %v1064_v6, %v950_v23  ;;  %v1861_v47 = vld [vmem:[#allocation2 + $0x78] sm:$0xff]  ;;  %v876_v18 = vand.u32 2147483647, %v3842_v49 }
 0x276   :  { %v1786_v20 = vmul.f32 0.0016666667, %v1710_v51  ;;  %v839_v37 = vand.u32 2147483647, %v649_v44 }
 0x277   :  { %v1822_v12 = vadd.f32 %v1784_v53, %v1746_v40  ;;  %815 = vadd.xlane.f32.xlu1 %v814_v27  ;;  %v3852_v9 = vpop.xlane.xlu0 %1554  ;;  %v513_v40 = vsel %vm512_vm1, %v399_v26, 0.0  ;;  %v951_v39 = vmul.f32 2.0, %v913_v0  ;;  %v1615_v27 = vmul.f32 0.6931472, %v2220_v30 }
 0x278   :  { %v448_v4 = vpop.xlane.xlu1 %447  ;;  %vm990_vm1 = vcmp.gt.f32.partialorder %v3842_v49, 0.0  ;;  %2243 = vlog2.f32 %v3852_v9 }
 0x279   :  { %v1898_v15 = vadd.f32 %v1860_v35, %v1822_v12  ;;  %v1101_v38 = vsub.f32 %v448_v4, %v1063_v61  ;;  %v648_v61 = vmul.f32 0.1, %v3631_v57  ;;  %v1178_v35 = vand.u32 2147483647, %v1140_v43  ;;  %v4303_v4 = vld [vmem:[#allocation26_spill] sm:$0xff] }
 0x27a   :  { %v1065_v12 = vsel %vm989_vm0, %v1027_v33, 0.0  ;;  %v1617_v43 = vmul.f32 0.6931472, %v2222_v21 }
 0x27b   :  { %1937 = vst.msk [vmem:[#allocation2 + $0x70] sm:$0xff] %vm16_vm10, %v1898_v15  ;;  %v1215_v55 = vadd.f32 %v1177_v1, %v1101_v38  ;;  %818 = vadd.xlane.f32.xlu1 %v817_v29  ;;  %v3863_v41 = vpop.xlane.xlu0 %598  ;;  %v838_v50 = vand.u32 2147483647, %v648_v61  ;;  %v1141_v45 = vsub.f32 %v1065_v12, %v951_v39  ;;  %v1673_v1 = vadd.f32 %v1615_v27, %v4303_v4  ;;  %v1862_v15 = vld [vmem:[#allocation2 + $0x80] sm:$0xff] }
 0x27c   :  { %v3865_v63 = vpop.xlane.xlu1 %764  ;;  %v650_v39 = vmul.f32 0.1, %v3693_v62  ;;  %v4305_v27 = vmov 0.0  }
 0x27d   :  { %v1747_v22 = vmul.f32 0.00016666666, %v1215_v55  ;;  %v914_v2 = vmax.f32.f32 %v838_v50, %v876_v18  ;;  %v1711_v23 = vsub.f32 %v1673_v1, %v3816_v11  ;;  %v877_v5 = vand.u32 2147483647, %v3865_v63  ;;  %55 = vst.msk [vmem:[#allocation2 + $0x128] sm:$0xf] %vm54_vm4, %v4305_v27 }
 0x27e   :  { %v1029_v18 = vmul.f32 2.0, %v3865_v63  ;;  %vm991_vm5 = vcmp.gt.f32.partialorder %v3865_v63, 0.0  ;;  %v840_v62 = vand.u32 2147483647, %v650_v39  ;;  %v4307_v39 = vld [vmem:[#allocation29_spill] sm:$0xff] }
 0x27f   :  { %v1823_v7 = vadd.f32 %v1785_v36, %v1747_v22  ;;  %507 = vadd.xlane.f32.xlu1 %v506_v16  ;;  %v3876_v57 = vpop.xlane.xlu0 %1557  ;;  %v1179_v16 = vand.u32 2147483647, %v1141_v45  ;;  %v952_v22 = vmul.f32 2.0, %v914_v2  ;;  %v915_v19 = vmax.f32.f32 %v839_v37, %v877_v5 }
 0x280   :  { %v451_v53 = vpop.xlane.xlu1 %450  ;;  %v651_v5 = vmul.f32 0.1, %v3720_v52  ;;  %2245 = vlog2.f32 %v3876_v57 }
 0x281   :  { %v1899_v54 = vadd.f32 %v1861_v47, %v1823_v7  ;;  %v1102_v60 = vsub.f32 %v451_v53, %v1064_v6  ;;  %v1028_v6 = vmul.f32 2.0, %v3842_v49  ;;  %v1787_v47 = vmul.f32 0.0016666667, %v1711_v23  ;;  %v4304_v7 = vld [vmem:[#allocation27_spill] sm:$0xff]  ;;  %v1863_v53 = vld [vmem:[#allocation2 + $0x88] sm:$0xff] }
 0x282   :  { %v1674_v33 = vadd.f32 %v1617_v43, %v4304_v7  ;;  %v841_v52 = vand.u32 2147483647, %v651_v5  ;;  %v4308_v5 = vld [vmem:[#allocation30_spill] sm:$0xff] }
 0x283   :  { %1938 = vst.msk [vmem:[#allocation2 + $0x78] sm:$0xff] %vm16_vm10, %v1899_v54  ;;  %v1216_v48 = vadd.f32 %v1178_v35, %v1102_v60  ;;  %514 = vadd.xlane.f32.xlu1 %v513_v40  ;;  %v3885_v25 = vpop.xlane.xlu0 %601  ;;  %v1066_v32 = vsel %vm990_vm1, %v1028_v6, 0.0  ;;  %v2224_v40 = vpop.eup %2223  ;;  %v953_v35 = vmul.f32 2.0, %v915_v19 }
 0x284   :  { %v3879_v29 = vpop.xlane.xlu1 %767  ;;  %v1142_v61 = vsub.f32 %v1066_v32, %v952_v22  ;;  %v1712_v54 = vsub.f32 %v1674_v33, %v3842_v49  ;;  %v1067_v49 = vsel %vm991_vm5, %v1029_v18, 0.0  ;;  %v1865_v18 = vld [vmem:[#allocation2 + $0x98] sm:$0xff] }
 0x285   :  { %v1748_v24 = vmul.f32 0.00016666666, %v1216_v48  ;;  %v878_v50 = vand.u32 2147483647, %v3879_v29  ;;  %v1143_v1 = vsub.f32 %v1067_v49, %v953_v35  ;;  %v1030_v43 = vmul.f32 2.0, %v3879_v29 }
 0x286   :  { %v1180_v45 = vand.u32 2147483647, %v1142_v61  ;;  %v1788_v44 = vmul.f32 0.0016666667, %v1712_v54  ;;  %vm992_vm6 = vcmp.gt.f32.partialorder %v3879_v29, 0.0 }
 0x287   :  { %v1824_v38 = vadd.f32 %v1786_v20, %v1748_v24  ;;  %v3894_v51 = vpop.xlane.xlu0 %1560  ;;  %v1619_v20 = vmul.f32 0.6931472, %v2224_v40  ;;  %v916_v21 = vmax.f32.f32 %v840_v62, %v878_v50  ;;  %v1181_v22 = vand.u32 2147483647, %v1143_v1 }
 0x288   :  { %v454_v55 = vpop.xlane.xlu1 %453  ;;  %v1068_v61 = vsel %vm992_vm6, %v1030_v43, 0.0  ;;  %2247 = vlog2.f32 %v3894_v51 }
 0x289   :  { %v1900_v0 = vadd.f32 %v1862_v15, %v1824_v38  ;;  %v1103_v36 = vsub.f32 %v454_v55, %v1065_v12  ;;  %v4306_v38 = vld [vmem:[#allocation28_spill] sm:$0xff]  ;;  %v1864_v55 = vld [vmem:[#allocation2 + $0x90] sm:$0xff] }
 0x28a   :  { %v1675_v23 = vadd.f32 %v1619_v20, %v4306_v38 }
 0x28b   :  { %1939 = vst.msk [vmem:[#allocation2 + $0x80] sm:$0xff] %vm16_vm10, %v1900_v0  ;;  %v1217_v11 = vadd.f32 %v1179_v16, %v1103_v36  ;;  %v3905_v2 = vpop.xlane.xlu0 %604  ;;  %v2226_v16 = vpop.eup %2225 }
 0x28c   :  { %v3891_v26 = vpop.xlane.xlu1 %770  ;;  %v1713_v6 = vsub.f32 %v1675_v23, %v3865_v63  ;;  %v1621_v19 = vmul.f32 0.6931472, %v2226_v16  ;;  %v2228_v54 = vpop.eup %2227  ;;  %v653_v16 = vmul.f32 0.1, %v3768_v8 }
 0x28d   :  { %v1749_v30 = vmul.f32 0.00016666666, %v1217_v11  ;;  %v879_v0 = vand.u32 2147483647, %v3891_v26  ;;  %v1031_v35 = vmul.f32 2.0, %v3891_v26  ;;  %vm993_vm7 = vcmp.gt.f32.partialorder %v3891_v26, 0.0 }
 0x28e   :  { %v1789_v33 = vmul.f32 0.0016666667, %v1713_v6  ;;  %v1866_v6 = vld [vmem:[#allocation2 + $0xa0] sm:$0xff]  ;;  %v843_v8 = vand.u32 2147483647, %v653_v16  ;;  %v1968_v16 = vld [vmem:[#allocation2 + $0x18] sm:$0xff] }
 0x28f   :  { %v1825_v31 = vadd.f32 %v1787_v47, %v1749_v30  ;;  %v3916_v47 = vpop.xlane.xlu0 %1563  ;;  %v917_v7 = vmax.f32.f32 %v841_v52, %v879_v0  ;;  %v2230_v0 = vpop.eup %2229 }
 0x290   :  { %v457_v60 = vpop.xlane.xlu1 %456  ;;  %2249 = vlog2.f32 %v3916_v47 }
 0x291   :  { %v1901_v48 = vadd.f32 %v1863_v53, %v1825_v31  ;;  %v1104_v12 = vsub.f32 %v457_v60, %v1066_v32  ;;  %v954_v32 = vmul.f32 2.0, %v916_v21  ;;  %v1676_v31 = vadd.f32 %v1621_v19, %v4307_v39  ;;  %v1965_v39 = vld [vmem:[#allocation2] sm:$0xff] }
 0x292   :  { %v652_v60 = vmul.f32 0.1, %v3744_v3 }
 0x293   :  { %1940 = vst.msk [vmem:[#allocation2 + $0x88] sm:$0xff] %vm16_vm10, %v1901_v48  ;;  %v1218_v24 = vadd.f32 %v1180_v45, %v1104_v12  ;;  %v1144_v40 = vsub.f32 %v1068_v61, %v954_v32  ;;  %v1714_v27 = vsub.f32 %v1676_v31, %v3879_v29  ;;  %v3925_v50 = vpop.xlane.xlu0 %607  ;;  %v955_v12 = vmul.f32 2.0, %v917_v7  ;;  %v1966_v7 = vld [vmem:[#allocation2 + $0x8] sm:$0xff] }
 0x294   :  { %v3907_v4 = vpop.xlane.xlu1 %773  ;;  %v842_v3 = vand.u32 2147483647, %v652_v60  ;;  %v4309_v60 = vld [vmem:[#allocation31_spill] sm:$0xff]  ;;  %v2004_v58 = vsel %vm16_vm10, %v1966_v7, 0.0 }
 0x295   :  { %v1750_v15 = vmul.f32 0.00016666666, %v1218_v24  ;;  %v880_v45 = vand.u32 2147483647, %v3907_v4  ;;  %v1182_v24 = vand.u32 2147483647, %v1144_v40 }
 0x296   :  { %v1790_v21 = vmul.f32 0.0016666667, %v1714_v27  ;;  %vm994_vm8 = vcmp.gt.f32.partialorder %v3907_v4, 0.0  ;;  %v2232_v27 = vpop.eup %2231 }
 0x297   :  { %v1826_v10 = vadd.f32 %v1788_v44, %v1750_v15  ;;  %v1069_v44 = vsel %vm993_vm7, %v1031_v35, 0.0  ;;  %v918_v23 = vmax.f32.f32 %v842_v3, %v880_v45  ;;  %v1867_v35 = vld [vmem:[#allocation2 + $0xa8] sm:$0xff] }
 0x298   :  { %v460_v36 = vpop.xlane.xlu1 %459  ;;  %v1145_v15 = vsub.f32 %v1069_v44, %v955_v12 }
 0x299   :  { %v1902_v37 = vadd.f32 %v1864_v55, %v1826_v10  ;;  %v1105_v11 = vsub.f32 %v460_v36, %v1067_v49  ;;  %v1623_v49 = vmul.f32 0.6931472, %v2228_v54  ;;  %v3935_v10 = vpop.xlane.xlu0 %1566  ;;  %v956_v52 = vmul.f32 2.0, %v918_v23 }
 0x29a   :  { %v1627_v23 = vmul.f32 0.6931472, %v2232_v27  ;;  %2251 = vlog2.f32 %v3935_v10 }
 0x29b   :  { %1941 = vst.msk [vmem:[#allocation2 + $0x90] sm:$0xff] %vm16_vm10, %v1902_v37  ;;  %v1219_v63 = vadd.f32 %v1181_v22, %v1105_v11  ;;  %v1677_v55 = vadd.f32 %v1623_v49, %v4308_v5  ;;  %v1183_v37 = vand.u32 2147483647, %v1145_v15  ;;  %v1032_v11 = vmul.f32 2.0, %v3907_v4 }
 0x29c   :  { %v3919_v30 = vpop.xlane.xlu1 %776 }
 0x29d   :  { %v1751_v53 = vmul.f32 0.00016666666, %v1219_v63  ;;  %v1715_v36 = vsub.f32 %v1677_v55, %v3891_v26  ;;  %v881_v22 = vand.u32 2147483647, %v3919_v30  ;;  %v1625_v63 = vmul.f32 0.6931472, %v2230_v0  ;;  %v3943_v26 = vpop.xlane.xlu0 %610 }
 0x29e   :  { %v1033_v45 = vmul.f32 2.0, %v3919_v30  ;;  %vm995_vm9 = vcmp.gt.f32.partialorder %v3919_v30, 0.0  ;;  %v661_v47 = vmul.f32 0.1, %v3943_v26 }
 0x29f   :  { %v1827_v28 = vadd.f32 %v1789_v33, %v1751_v53  ;;  %v1070_v53 = vsel %vm994_vm8, %v1032_v11, 0.0  ;;  %v919_v40 = vmax.f32.f32 %v843_v8, %v881_v22  ;;  %v1791_v31 = vmul.f32 0.0016666667, %v1715_v36 }
 0x2a0   :  { %v463_v48 = vpop.xlane.xlu1 %462  ;;  %v1146_v54 = vsub.f32 %v1070_v53, %v956_v52  ;;  %v1071_v55 = vsel %vm995_vm9, %v1033_v45, 0.0  ;;  %v1868_v52 = vld [vmem:[#allocation2 + $0xb0] sm:$0xff]  ;;  %v2008_v8 = vsel %vm16_vm10, %v1968_v16, 0.0  ;;  %v656_v16 = vmul.f32 0.1, %v3839_v17 }
 0x2a1   :  { %v1903_v20 = vadd.f32 %v1865_v18, %v1827_v28  ;;  %v1106_v62 = vsub.f32 %v463_v48, %v1068_v61  ;;  %v1678_v28 = vadd.f32 %v1625_v63, %v4309_v60  ;;  %v654_v48 = vmul.f32 0.1, %v3792_v42  ;;  %v3956_v42 = vpop.xlane.xlu0 %1569  ;;  %v2234_v63 = vpop.eup %2233 }
 0x2a2   :  { %v957_v49 = vmul.f32 2.0, %v919_v40  ;;  %v1184_v15 = vand.u32 2147483647, %v1146_v54  ;;  %v846_v17 = vand.u32 2147483647, %v656_v16  ;;  %2253 = vlog2.f32 %v3956_v42 }
 0x2a3   :  { %1942 = vst.msk [vmem:[#allocation2 + $0x98] sm:$0xff] %vm16_vm10, %v1903_v20  ;;  %v1220_v1 = vadd.f32 %v1182_v24, %v1106_v62  ;;  %v2003_v20 = vsel %vm16_vm10, %v1965_v39, 0.0  ;;  %v1716_v62 = vsub.f32 %v1678_v28, %v3907_v4  ;;  %v844_v5 = vand.u32 2147483647, %v654_v48 }
 0x2a4   :  { %v3931_v29 = vpop.xlane.xlu1 %779 }
 0x2a5   :  { %v1752_v38 = vmul.f32 0.00016666666, %v1220_v1  ;;  %v882_v3 = vand.u32 2147483647, %v3931_v29  ;;  %v1792_v22 = vmul.f32 0.0016666667, %v1716_v62  ;;  %v3967_v39 = vpop.xlane.xlu0 %613 }
 0x2a6   :  { %v1034_v60 = vmul.f32 2.0, %v3931_v29  ;;  %vm996_vm11 = vcmp.gt.f32.partialorder %v3931_v29, 0.0 }
 0x2a7   :  { %v1828_v14 = vadd.f32 %v1790_v21, %v1752_v38  ;;  %v1967_v21 = vld [vmem:[#allocation2 + $0x10] sm:$0xff]  ;;  %v2005_v38 = vadd.f32 %v2004_v58, %v2003_v20  ;;  %v1629_v58 = vmul.f32 0.6931472, %v2234_v63 }
 0x2a8   :  { %v466_v43 = vpop.xlane.xlu1 %465  ;;  %v2006_v36 = vsel %vm16_vm10, %v1967_v21, 0.0  ;;  %v1971_v20 = vld [vmem:[#allocation2 + $0x30] sm:$0xff] }
 0x2a9   :  { %v1904_v32 = vadd.f32 %v1866_v6, %v1828_v14  ;;  %v1107_v19 = vsub.f32 %v466_v43, %v1069_v44  ;;  %v1969_v6 = vld [vmem:[#allocation2 + $0x20] sm:$0xff]  ;;  %v1147_v14 = vsub.f32 %v1071_v55, %v957_v49  ;;  %v2007_v11 = vadd.f32 %v2006_v36, %v2005_v38  ;;  %v4311_v38 = vld [vmem:[#allocation33_spill] sm:$0xff]  ;;  %v3979_v46 = vpop.xlane.xlu0 %1572 }
 0x2aa   :  { %2255 = vlog2.f32 %v3979_v46  ;;  %v1983_v46 = vld [vmem:[#allocation2 + $0x90] sm:$0xff] }
 0x2ab   :  { %1943 = vst.msk [vmem:[#allocation2 + $0xa0] sm:$0xff] %vm16_vm10, %v1904_v32  ;;  %v1221_v61 = vadd.f32 %v1183_v37, %v1107_v19  ;;  %v920_v37 = vmax.f32.f32 %v844_v5, %v882_v3  ;;  %v4310_v32 = vld [vmem:[#allocation32_spill] sm:$0xff]  ;;  %v655_v19 = vmul.f32 0.1, %v3814_v13  ;;  %v1185_v54 = vand.u32 2147483647, %v1147_v14 }
 0x2ac   :  { %v3945_v33 = vpop.xlane.xlu1 %782  ;;  %v1679_v56 = vadd.f32 %v1627_v23, %v4310_v32  ;;  %v2009_v27 = vadd.f32 %v2008_v8, %v2007_v11  ;;  %v1972_v3 = vld [vmem:[#allocation2 + $0x38] sm:$0xff]  ;;  %v1680_v23 = vadd.f32 %v1629_v58, %v4311_v38  ;;  %v657_v58 = vmul.f32 0.1, %v3863_v41 }
 0x2ad   :  { %v1753_v18 = vmul.f32 0.00016666666, %v1221_v61  ;;  %v2010_v61 = vsel %vm16_vm10, %v1969_v6, 0.0  ;;  %v845_v48 = vand.u32 2147483647, %v655_v19  ;;  %v1869_v5 = vld [vmem:[#allocation2 + $0xb8] sm:$0xff] }
 0x2ae   :  { %v1717_v40 = vsub.f32 %v1679_v56, %v3919_v30  ;;  %v2011_v45 = vadd.f32 %v2010_v61, %v2009_v27  ;;  %v1035_v14 = vmul.f32 2.0, %v3945_v33  ;;  %v2016_v36 = vsel %vm16_vm10, %v1972_v3, 0.0 }
 0x2af   :  { %v1829_v12 = vadd.f32 %v1791_v31, %v1753_v18  ;;  %v883_v31 = vand.u32 2147483647, %v3945_v33  ;;  %vm997_vm12 = vcmp.gt.f32.partialorder %v3945_v33, 0.0 }
 0x2b0   :  { %v469_v24 = vpop.xlane.xlu1 %468  ;;  %v1073_v61 = vsel %vm997_vm12, %v1035_v14, 0.0 }
 0x2b1   :  { %v1905_v1 = vadd.f32 %v1867_v35, %v1829_v12  ;;  %v1108_v44 = vsub.f32 %v469_v24, %v1070_v53  ;;  %v1970_v53 = vld [vmem:[#allocation2 + $0x28] sm:$0xff]  ;;  %v958_v35 = vmul.f32 2.0, %v920_v37  ;;  %v1072_v24 = vsel %vm996_vm11, %v1034_v60, 0.0 }
 0x2b2   :  { %v2012_v30 = vsel %vm16_vm10, %v1970_v53, 0.0  ;;  %v921_v49 = vmax.f32.f32 %v845_v48, %v883_v31  ;;  %v1974_v53 = vld [vmem:[#allocation2 + $0x48] sm:$0xff]  ;;  %v3991_v31 = vpop.xlane.xlu0 %616  ;;  %v1870_v48 = vld [vmem:[#allocation2 + $0xc0] sm:$0xff] }
 0x2b3   :  { %1944 = vst.msk [vmem:[#allocation2 + $0xa8] sm:$0xff] %vm16_vm10, %v1905_v1  ;;  %v1222_v4 = vadd.f32 %v1184_v15, %v1108_v44  ;;  %v1793_v1 = vmul.f32 0.0016666667, %v1717_v40  ;;  %v1148_v15 = vsub.f32 %v1072_v24, %v958_v35  ;;  %v2013_v21 = vadd.f32 %v2012_v30, %v2011_v45  ;;  %v1975_v40 = vld [vmem:[#allocation2 + $0x50] sm:$0xff] }
 0x2b4   :  { %v3959_v0 = vpop.xlane.xlu1 %785  ;;  %v959_v37 = vmul.f32 2.0, %v921_v49  ;;  %v4312_v35 = vld [vmem:[#allocation34_spill] sm:$0xff]  ;;  %v2020_v34 = vsel %vm16_vm10, %v1974_v53, 0.0  ;;  %v2022_v45 = vsel %vm16_vm10, %v1975_v40, 0.0 }
 0x2b5   :  { %v1754_v43 = vmul.f32 0.00016666666, %v1222_v4  ;;  %v2236_v4 = vpop.eup %2235  ;;  %v884_v11 = vand.u32 2147483647, %v3959_v0  ;;  %v1186_v19 = vand.u32 2147483647, %v1148_v15 }
 0x2b6   :  { %v1631_v63 = vmul.f32 0.6931472, %v2236_v4  ;;  %v2238_v30 = vpop.eup %2237  ;;  %vm998_vm13 = vcmp.gt.f32.partialorder %v3959_v0, 0.0  ;;  %v1979_v53 = vld [vmem:[#allocation2 + $0x70] sm:$0xff] }
 0x2b7   :  { %v1830_v7 = vadd.f32 %v1792_v22, %v1754_v43  ;;  %v1718_v22 = vsub.f32 %v1680_v23, %v3931_v29  ;;  %v2018_v29 = vsel %vm16_vm10, %v1973_v59, 0.0  ;;  %v1633_v38 = vmul.f32 0.6931472, %v2238_v30  ;;  %v2240_v4 = vpop.eup %2239  ;;  %v4314_v30 = vld [vmem:[#allocation36_spill] sm:$0xff] }
 0x2b8   :  { %v472_v18 = vpop.xlane.xlu1 %471  ;;  %v1681_v27 = vadd.f32 %v1631_v63, %v4312_v35  ;;  %v847_v23 = vand.u32 2147483647, %v657_v58  ;;  %v1871_v63 = vld [vmem:[#allocation2 + $0xc8] sm:$0xff]  ;;  %v2242_v51 = vpop.eup %2241 }
 0x2b9   :  { %v1906_v28 = vadd.f32 %v1868_v52, %v1830_v7  ;;  %v1109_v13 = vsub.f32 %v472_v18, %v1071_v55  ;;  %v2014_v55 = vsel %vm16_vm10, %v1971_v20, 0.0  ;;  %v1794_v60 = vmul.f32 0.0016666667, %v1718_v22  ;;  %v2244_v58 = vpop.eup %2243 }
 0x2ba   :  { %v2015_v52 = vadd.f32 %v2014_v55, %v2013_v21  ;;  %v1719_v9 = vsub.f32 %v1681_v27, %v3945_v33 }
 0x2bb   :  { %1945 = vst.msk [vmem:[#allocation2 + $0xb0] sm:$0xff] %vm16_vm10, %v1906_v28  ;;  %v1223_v12 = vadd.f32 %v1185_v54, %v1109_v13  ;;  %v1149_v54 = vsub.f32 %v1073_v61, %v959_v37  ;;  %v922_v13 = vmax.f32.f32 %v846_v17, %v884_v11 }
 0x2bc   :  { %v3975_v62 = vpop.xlane.xlu1 %788  ;;  %v2017_v7 = vadd.f32 %v2016_v36, %v2015_v52  ;;  %v1795_v37 = vmul.f32 0.0016666667, %v1719_v9  ;;  %v1635_v52 = vmul.f32 0.6931472, %v2240_v4 }
 0x2bd   :  { %v1755_v44 = vmul.f32 0.00016666666, %v1223_v12  ;;  %v885_v49 = vand.u32 2147483647, %v3975_v62  ;;  %v960_v57 = vmul.f32 2.0, %v922_v13  ;;  %vm999_vm14 = vcmp.gt.f32.partialorder %v3975_v62, 0.0 }
 0x2be   :  { %v2019_v12 = vadd.f32 %v2018_v29, %v2017_v7  ;;  %v1037_v7 = vmul.f32 2.0, %v3975_v62 }
 0x2bf   :  { %v1831_v6 = vadd.f32 %v1793_v1, %v1755_v44  ;;  %v1187_v1 = vand.u32 2147483647, %v1149_v54  ;;  %v1036_v44 = vmul.f32 2.0, %v3959_v0  ;;  %v923_v22 = vmax.f32.f32 %v847_v23, %v885_v49 }
 0x2c0   :  { %v475_v43 = vpop.xlane.xlu1 %474  ;;  %v2021_v21 = vadd.f32 %v2020_v34, %v2019_v12  ;;  %v1683_v12 = vadd.f32 %v1635_v52, %v4314_v30  ;;  %v2246_v34 = vpop.eup %2245  ;;  %v1075_v9 = vsel %vm999_vm14, %v1037_v7, 0.0  ;;  %v4315_v52 = vld [vmem:[#allocation37_spill] sm:$0xff] }
 0x2c1   :  { %v1907_v32 = vadd.f32 %v1869_v5, %v1831_v6  ;;  %v1110_v56 = vsub.f32 %v475_v43, %v1072_v24  ;;  %v1976_v24 = vld [vmem:[#allocation2 + $0x58] sm:$0xff]  ;;  %v4005_v5 = vpop.xlane.xlu0 %1575  ;;  %v1977_v6 = vld [vmem:[#allocation2 + $0x60] sm:$0xff]  ;;  %v1074_v36 = vsel %vm998_vm13, %v1036_v44, 0.0  ;;  %v1978_v43 = vld [vmem:[#allocation2 + $0x68] sm:$0xff]  ;;  %v2248_v26 = vpop.eup %2247 }
 0x2c2   :  { %v2024_v55 = vsel %vm16_vm10, %v1976_v24, 0.0  ;;  %v2023_v16 = vadd.f32 %v2022_v45, %v2021_v21  ;;  %v1150_v11 = vsub.f32 %v1074_v36, %v960_v57  ;;  %v2026_v17 = vsel %vm16_vm10, %v1977_v6, 0.0  ;;  %v1872_v6 = vld [vmem:[#allocation2 + $0xd0] sm:$0xff] }
 0x2c3   :  { %1946 = vst.msk [vmem:[#allocation2 + $0xb8] sm:$0xff] %vm16_vm10, %v1907_v32  ;;  %v1224_v8 = vadd.f32 %v1186_v19, %v1110_v56  ;;  %v4313_v56 = vld [vmem:[#allocation35_spill] sm:$0xff]  ;;  %v2028_v29 = vsel %vm16_vm10, %v1978_v43, 0.0  ;;  %v2030_v45 = vsel %vm16_vm10, %v1979_v53, 0.0  ;;  %v1721_v43 = vsub.f32 %v1683_v12, %v3975_v62 }
 0x2c4   :  { %v3993_v18 = vpop.xlane.xlu1 %791  ;;  %v2025_v32 = vadd.f32 %v2024_v55, %v2023_v16  ;;  %v1682_v19 = vadd.f32 %v1633_v38, %v4313_v56  ;;  %v1641_v55 = vmul.f32 0.6931472, %v2246_v34  ;;  %v660_v53 = vmul.f32 0.1, %v3925_v50  ;;  %v1873_v50 = vld [vmem:[#allocation2 + $0xd8] sm:$0xff] }
 0x2c5   :  { %v1756_v28 = vmul.f32 0.00016666666, %v1224_v8  ;;  %v658_v8 = vmul.f32 0.1, %v3885_v25  ;;  %v4017_v40 = vpop.xlane.xlu0 %619  ;;  %v886_v13 = vand.u32 2147483647, %v3993_v18  ;;  %2257 = vlog2.f32 %v4005_v5 }
 0x2c6   :  { %v1720_v54 = vsub.f32 %v1682_v19, %v3959_v0  ;;  %v1188_v25 = vand.u32 2147483647, %v1150_v11  ;;  %vm1000_vm15 = vcmp.gt.f32.partialorder %v3993_v18, 0.0  ;;  %v1643_v30 = vmul.f32 0.6931472, %v2248_v26  ;;  %v1985_v5 = vld [vmem:[#allocation2 + $0xa0] sm:$0xff] }
 0x2c7   :  { %v1832_v20 = vadd.f32 %v1794_v60, %v1756_v28  ;;  %v961_v28 = vmul.f32 2.0, %v923_v22  ;;  %v848_v24 = vand.u32 2147483647, %v658_v8  ;;  %v4316_v8 = vld [vmem:[#allocation38_spill] sm:$0xff]  ;;  %v663_v26 = vmul.f32 0.1, %v3991_v31 }
 0x2c8   :  { %v478_v3 = vpop.xlane.xlu1 %477  ;;  %v1796_v57 = vmul.f32 0.0016666667, %v1720_v54 }
 0x2c9   :  { %v1908_v41 = vadd.f32 %v1870_v48, %v1832_v20  ;;  %v1111_v15 = vsub.f32 %v478_v3, %v1073_v61  ;;  %v2027_v48 = vadd.f32 %v2026_v17, %v2025_v32  ;;  %v1980_v20 = vld [vmem:[#allocation2 + $0x78] sm:$0xff]  ;;  %v1637_v3 = vmul.f32 0.6931472, %v2242_v51  ;;  %v4032_v16 = vpop.xlane.xlu0 %1578 }
 0x2ca   :  { %v924_v38 = vmax.f32.f32 %v848_v24, %v886_v13  ;;  %v2032_v4 = vsel %vm16_vm10, %v1980_v20, 0.0  ;;  %v1038_v32 = vmul.f32 2.0, %v3993_v18  ;;  %2259 = vlog2.f32 %v4032_v16 }
 0x2cb   :  { %1947 = vst.msk [vmem:[#allocation2 + $0xc0] sm:$0xff] %vm16_vm10, %v1908_v41  ;;  %v1225_v33 = vadd.f32 %v1187_v1, %v1111_v15  ;;  %v2029_v49 = vadd.f32 %v2028_v29, %v2027_v48  ;;  %v1981_v1 = vld [vmem:[#allocation2 + $0x80] sm:$0xff]  ;;  %v1151_v41 = vsub.f32 %v1075_v9, %v961_v28  ;;  %v1639_v15 = vmul.f32 0.6931472, %v2244_v58  ;;  %v1982_v29 = vld [vmem:[#allocation2 + $0x88] sm:$0xff] }
 0x2cc   :  { %v4009_v14 = vpop.xlane.xlu1 %794  ;;  %v962_v19 = vmul.f32 2.0, %v924_v38  ;;  %v1076_v42 = vsel %vm1000_vm15, %v1038_v32, 0.0  ;;  %v2036_v34 = vsel %vm16_vm10, %v1982_v29, 0.0  ;;  %v4318_v38 = vld [vmem:[#allocation40_spill] sm:$0xff] }
 0x2cd   :  { %v1757_v59 = vmul.f32 0.00016666666, %v1225_v33  ;;  %v2031_v23 = vadd.f32 %v2030_v45, %v2029_v49  ;;  %v659_v33 = vmul.f32 0.1, %v3905_v2  ;;  %v1189_v11 = vand.u32 2147483647, %v1151_v41  ;;  %v4051_v28 = vpop.xlane.xlu0 %622 }
 0x2ce   :  { %v4044_v62 = vadd.f32 %v1639_v15, %v4316_v8  ;;  %v1152_v48 = vsub.f32 %v1076_v42, %v962_v19  ;;  %v1039_v24 = vmul.f32 2.0, %v4009_v14  ;;  %vm1001_vm3 = vcmp.gt.f32.partialorder %v4009_v14, 0.0  ;;  %v1874_v8 = vld [vmem:[#allocation2 + $0xe0] sm:$0xff] }
 0x2cf   :  { %v1833_v61 = vadd.f32 %v1795_v37, %v1757_v59  ;;  %v887_v37 = vand.u32 2147483647, %v4009_v14  ;;  %v2033_v17 = vadd.f32 %v2032_v4, %v2031_v23  ;;  %v849_v10 = vand.u32 2147483647, %v659_v33 }
 0x2d0   :  { %v481_v60 = vpop.xlane.xlu1 %480  ;;  %v1687_v23 = vadd.f32 %v1643_v30, %v4318_v38  ;;  %v850_v4 = vand.u32 2147483647, %v660_v53 }
 0x2d1   :  { %v1909_v35 = vadd.f32 %v1871_v63, %v1833_v61  ;;  %v1112_v27 = vsub.f32 %v481_v60, %v1074_v36  ;;  %v2034_v36 = vsel %vm16_vm10, %v1981_v1, 0.0  ;;  %v1684_v63 = vadd.f32 %v1637_v3, %v4315_v52  ;;  %v4317_v61 = vld [vmem:[#allocation39_spill] sm:$0xff]  ;;  %v2250_v1 = vpop.eup %2249 }
 0x2d2   :  { %v4047_v7 = vadd.f32 %v1641_v55, %v4317_v61  ;;  %v851_v60 = vand.u32 2147483647, %v661_v47  ;;  %v925_v13 = vmax.f32.f32 %v849_v10, %v887_v37  ;;  %v496_v55 = vpop.xlane.xlu0 %495  ;;  %v1077_v47 = vsel %vm1001_vm3, %v1039_v24, 0.0  ;;  %v2252_v37 = vpop.eup %2251 }
 0x2d3   :  { %1948 = vst.msk [vmem:[#allocation2 + $0xc8] sm:$0xff] %vm16_vm10, %v1909_v35  ;;  %v1226_v0 = vadd.f32 %v1188_v25, %v1112_v27  ;;  %v2035_v35 = vadd.f32 %v2034_v36, %v2033_v17  ;;  %v1797_v27 = vmul.f32 0.0016666667, %v1721_v43  ;;  %v2038_v43 = vsel %vm16_vm10, %v1983_v46, 0.0  ;;  %v2254_v53 = vpop.eup %2253 }
 0x2d4   :  { %v4028_v44 = vpop.xlane.xlu1 %797  ;;  %v963_v3 = vmul.f32 2.0, %v925_v13  ;;  %v662_v10 = vmul.f32 0.1, %v3967_v39 }
 0x2d5   :  { %v1758_v21 = vmul.f32 0.00016666666, %v1226_v0  ;;  %v1722_v0 = vsub.f32 %v1684_v63, %v3993_v18  ;;  %v2037_v18 = vadd.f32 %v2036_v34, %v2035_v35  ;;  %vm1002_vm0 = vcmp.gt.f32.partialorder %v4028_v44, 0.0 }
 0x2d6   :  { %v4082_v13 = vpop.xlane.xlu0 %812  ;;  %v1040_v39 = vmul.f32 2.0, %v4028_v44  ;;  %v852_v34 = vand.u32 2147483647, %v662_v10 }
 0x2d7   :  { %v1834_v22 = vadd.f32 %v1796_v57, %v1758_v21  ;;  %v1190_v21 = vand.u32 2147483647, %v1152_v48  ;;  %v2039_v61 = vadd.f32 %v2038_v43, %v2037_v18  ;;  %vm1007_vm7 = vcmp.gt.f32.partialorder %v4082_v13, 0.0 }
 0x2d8   :  { %v484_v59 = vpop.xlane.xlu1 %483 }
 0x2d9   :  { %v1910_v56 = vadd.f32 %v1872_v6, %v1834_v22  ;;  %v1113_v2 = vsub.f32 %v484_v59, %v1075_v9  ;;  %v888_v9 = vand.u32 2147483647, %v4028_v44  ;;  %v1984_v22 = vld [vmem:[#allocation2 + $0x98] sm:$0xff]  ;;  %v1645_v59 = vmul.f32 0.6931472, %v2250_v1 }
 0x2da   :  { %v2040_v29 = vsel %vm16_vm10, %v1984_v22, 0.0  ;;  %v4091_v46 = vpop.xlane.xlu0 %628 }
 0x2db   :  { %1949 = vst.msk [vmem:[#allocation2 + $0xd0] sm:$0xff] %vm16_vm10, %v1910_v56  ;;  %v1227_v54 = vadd.f32 %v1189_v11, %v1113_v2  ;;  %v1798_v11 = vmul.f32 0.0016666667, %v1722_v0  ;;  %v1153_v56 = vsub.f32 %v1077_v47, %v963_v3  ;;  %v926_v2 = vmax.f32.f32 %v850_v4, %v888_v9  ;;  %v4320_v4 = vld [vmem:[#allocation42_spill] sm:$0xff] }
 0x2dc   :  { %v4053_v51 = vpop.xlane.xlu1 %800  ;;  %v2041_v9 = vadd.f32 %v2040_v29, %v2039_v61 }
 0x2dd   :  { %v1759_v25 = vmul.f32 0.00016666666, %v1227_v54  ;;  %v889_v58 = vand.u32 2147483647, %v4053_v51  ;;  %v1041_v12 = vmul.f32 2.0, %v4053_v51  ;;  %vm1003_vm2 = vcmp.gt.f32.partialorder %v4053_v51, 0.0 }
 0x2de   :  { %v1725_v63 = vsub.f32 %v1687_v23, %v4053_v51  ;;  %v1723_v54 = vsub.f32 %v4044_v62, %v4009_v14  ;;  %v1191_v35 = vand.u32 2147483647, %v1153_v56  ;;  %v964_v31 = vmul.f32 2.0, %v926_v2  ;;  %v502_v61 = vpop.xlane.xlu0 %501 }
 0x2df   :  { %v1835_v45 = vadd.f32 %v1797_v27, %v1759_v25  ;;  %v927_v20 = vmax.f32.f32 %v851_v60, %v889_v58  ;;  %v1079_v33 = vsel %vm1003_vm2, %v1041_v12, 0.0  ;;  %v1877_v58 = vld [vmem:[#allocation2 + $0xf8] sm:$0xff]  ;;  %v1647_v14 = vmul.f32 0.6931472, %v2252_v37 }
 0x2e0   :  { %v487_v49 = vpop.xlane.xlu1 %486  ;;  %v1117_v19 = vsub.f32 %v496_v55, %v1079_v33  ;;  %v1801_v25 = vmul.f32 0.0016666667, %v1725_v63  ;;  %v1649_v62 = vmul.f32 0.6931472, %v2254_v53  ;;  %v1724_v56 = vsub.f32 %v4047_v7, %v4028_v44  ;;  %v1987_v44 = vld [vmem:[#allocation2 + $0xb0] sm:$0xff] }
 0x2e1   :  { %v1911_v41 = vadd.f32 %v1873_v50, %v1835_v45  ;;  %v965_v15 = vmul.f32 2.0, %v927_v20  ;;  %v1114_v57 = vsub.f32 %v487_v49, %v1076_v42  ;;  %v4319_v50 = vld [vmem:[#allocation41_spill] sm:$0xff]  ;;  %v2256_v45 = vpop.eup %2255  ;;  %v853_v20 = vand.u32 2147483647, %v663_v26 }
 0x2e2   :  { %v4087_v12 = vadd.f32 %v1645_v59, %v4319_v50  ;;  %v1799_v49 = vmul.f32 0.0016666667, %v1723_v54  ;;  %v1689_v55 = vadd.f32 %v1647_v14, %v4320_v4  ;;  %v4107_v59 = vmul.f32 0.6931472, %v2256_v45  ;;  %v2258_v54 = vpop.eup %2257 }
 0x2e3   :  { %1950 = vst.msk [vmem:[#allocation2 + $0xd8] sm:$0xff] %vm16_vm10, %v1911_v41  ;;  %v1155_v6 = vsub.f32 %v1079_v33, %v965_v15  ;;  %v1228_v36 = vadd.f32 %v1190_v21, %v1114_v57  ;;  %v1078_v41 = vsel %vm1002_vm0, %v1040_v39, 0.0  ;;  %v2042_v15 = vsel %vm16_vm10, %v1985_v5, 0.0  ;;  %v4321_v33 = vld [vmem:[#allocation43_spill] sm:$0xff] }
 0x2e4   :  { %v4073_v32 = vpop.xlane.xlu1 %803  ;;  %v1154_v23 = vsub.f32 %v1078_v41, %v964_v31  ;;  %v4101_v18 = vadd.f32 %v1649_v62, %v4321_v33  ;;  %v2043_v37 = vadd.f32 %v2042_v15, %v2041_v9  ;;  %v2046_v50 = vsel %vm16_vm10, %v1987_v44, 0.0  ;;  %v1989_v9 = vld [vmem:[#allocation2 + $0xc0] sm:$0xff] }
 0x2e5   :  { %v1193_v52 = vand.u32 2147483647, %v1155_v6  ;;  %v1760_v17 = vmul.f32 0.00016666666, %v1228_v36  ;;  %v890_v3 = vand.u32 2147483647, %v4073_v32 }
 0x2e6   :  { %v664_v6 = vmul.f32 0.1, %v4017_v40  ;;  %v1875_v36 = vld [vmem:[#allocation2 + $0xe8] sm:$0xff]  ;;  %v1192_v10 = vand.u32 2147483647, %v1154_v23  ;;  %v1042_v29 = vmul.f32 2.0, %v4073_v32 }
 0x2e7   :  { %v1231_v60 = vadd.f32 %v1193_v52, %v1117_v19  ;;  %v1836_v42 = vadd.f32 %v1798_v11, %v1760_v17  ;;  %v665_v11 = vmul.f32 0.1, %v4051_v28  ;;  %v928_v19 = vmax.f32.f32 %v852_v34, %v890_v3  ;;  %v1986_v40 = vld [vmem:[#allocation2 + $0xa8] sm:$0xff] }
 0x2e8   :  { %v490_v51 = vpop.xlane.xlu1 %489  ;;  %v854_v26 = vand.u32 2147483647, %v664_v6  ;;  %vm1004_vm5 = vcmp.gt.f32.partialorder %v4073_v32, 0.0  ;;  %v2044_v7 = vsel %vm16_vm10, %v1986_v40, 0.0  ;;  %v4122_v45 = vmul.f32 0.6931472, %v2258_v54 }
 0x2e9   :  { %v1763_v27 = vmul.f32 0.00016666666, %v1231_v60  ;;  %v1912_v48 = vadd.f32 %v1874_v8, %v1836_v42  ;;  %v1115_v30 = vsub.f32 %v490_v51, %v1077_v47  ;;  %v855_v60 = vand.u32 2147483647, %v665_v11 }
 0x2ea   :  { %v1800_v42 = vmul.f32 0.0016666667, %v1724_v56  ;;  %v966_v16 = vmul.f32 2.0, %v928_v19  ;;  %v1080_v5 = vsel %vm1004_vm5, %v1042_v29, 0.0  ;;  %v1045_v4 = vmul.f32 2.0, %v4082_v13  ;;  %v1991_v19 = vld [vmem:[#allocation2 + $0xd0] sm:$0xff] }
 0x2eb   :  { %v1839_v24 = vadd.f32 %v1801_v25, %v1763_v27  ;;  %1951 = vst.msk [vmem:[#allocation2 + $0xe0] sm:$0xff] %vm16_vm10, %v1912_v48  ;;  %v1229_v0 = vadd.f32 %v1191_v35, %v1115_v30  ;;  %v1876_v48 = vld [vmem:[#allocation2 + $0xf0] sm:$0xff]  ;;  %v1992_v29 = vld [vmem:[#allocation2 + $0xd8] sm:$0xff] }
 0x2ec   :  { %v4093_v1 = vpop.xlane.xlu1 %806 }
 0x2ed   :  { %v1915_v57 = vadd.f32 %v1877_v58, %v1839_v24  ;;  %v1761_v21 = vmul.f32 0.00016666666, %v1229_v0  ;;  %v891_v38 = vand.u32 2147483647, %v4093_v1  ;;  %v1043_v47 = vmul.f32 2.0, %v4093_v1  ;;  %v1988_v0 = vld [vmem:[#allocation2 + $0xb8] sm:$0xff] }
 0x2ee   :  { %vm1005_vm1 = vcmp.gt.f32.partialorder %v4093_v1, 0.0  ;;  %v1727_v51 = vsub.f32 %v1689_v55, %v4093_v1  ;;  %v893_v58 = vand.u32 2147483647, %v4082_v13  ;;  %v1156_v24 = vsub.f32 %v1080_v5, %v966_v16 }
 0x2ef   :  { %1954 = vst.msk [vmem:[#allocation2 + $0xf8] sm:$0xff] %vm16_vm10, %v1915_v57  ;;  %v1837_v22 = vadd.f32 %v1799_v49, %v1761_v21  ;;  %v929_v43 = vmax.f32.f32 %v853_v20, %v891_v38  ;;  %v1081_v8 = vsel %vm1005_vm1, %v1043_v47, 0.0  ;;  %v2045_v49 = vadd.f32 %v2044_v7, %v2043_v37  ;;  %v1879_v57 = vld [vmem:[#allocation2 + $0x108] sm:$0xff]  ;;  %v505_v38 = vpop.xlane.xlu0 %504 }
 0x2f0   :  { %v493_v2 = vpop.xlane.xlu1 %492  ;;  %v1119_v31 = vsub.f32 %v502_v61, %v1081_v8  ;;  %v1803_v3 = vmul.f32 0.0016666667, %v1727_v51  ;;  %v931_v23 = vmax.f32.f32 %v855_v60, %v893_v58  ;;  %v2050_v47 = vsel %vm16_vm10, %v1989_v9, 0.0 }
 0x2f1   :  { %v1913_v52 = vadd.f32 %v1875_v36, %v1837_v22  ;;  %v967_v63 = vmul.f32 2.0, %v929_v43  ;;  %v1116_v17 = vsub.f32 %v493_v2, %v1078_v41  ;;  %v2047_v55 = vadd.f32 %v2046_v50, %v2045_v49  ;;  %v1990_v2 = vld [vmem:[#allocation2 + $0xc8] sm:$0xff] }
 0x2f2   :  { %v2048_v36 = vsel %vm16_vm10, %v1988_v0, 0.0  ;;  %v1726_v22 = vsub.f32 %v4087_v12, %v4073_v32  ;;  %v1194_v56 = vand.u32 2147483647, %v1156_v24  ;;  %v2260_v32 = vpop.eup %2259 }
 0x2f3   :  { %1952 = vst.msk [vmem:[#allocation2 + $0xe8] sm:$0xff] %vm16_vm10, %v1913_v52  ;;  %v1157_v28 = vsub.f32 %v1081_v8, %v967_v63  ;;  %v1230_v53 = vadd.f32 %v1192_v10, %v1116_v17  ;;  %v667_v10 = vmul.f32 0.1, %v4091_v46  ;;  %v4135_v8 = vsel %vm1007_vm7, %v1045_v4, 0.0 }
 0x2f4   :  { %v810_v35 = vpop.xlane.xlu1 %809  ;;  %v2049_v61 = vadd.f32 %v2048_v36, %v2047_v55  ;;  %v1802_v44 = vmul.f32 0.0016666667, %v1726_v22 }
 0x2f5   :  { %v1195_v39 = vand.u32 2147483647, %v1157_v28  ;;  %v1762_v27 = vmul.f32 0.00016666666, %v1230_v53  ;;  %v892_v25 = vand.u32 2147483647, %v810_v35  ;;  %v1728_v43 = vsub.f32 %v4101_v18, %v810_v35 }
 0x2f6   :  { %v1044_v30 = vmul.f32 2.0, %v810_v35  ;;  %vm1006_vm6 = vcmp.gt.f32.partialorder %v810_v35, 0.0  ;;  %v2052_v28 = vsel %vm16_vm10, %v1990_v2, 0.0  ;;  %v2054_v53 = vsel %vm16_vm10, %v1991_v19, 0.0 }
 0x2f7   :  { %v1233_v14 = vadd.f32 %v1195_v39, %v1119_v31  ;;  %v1838_v62 = vadd.f32 %v1800_v42, %v1762_v27  ;;  %v930_v34 = vmax.f32.f32 %v854_v26, %v892_v25  ;;  %v969_v26 = vmul.f32 2.0, %v931_v23  ;;  %v4322_v42 = vld [vmem:[#allocation44_spill] sm:$0xff]  ;;  %v1880_v31 = vld [vmem:[#allocation2 + $0x110] sm:$0xff] }
 0x2f8   :  { %v626_v20 = vpop.xlane.xlu1 %625  ;;  %v1082_v21 = vsel %vm1006_vm6, %v1044_v30, 0.0  ;;  %v1804_v7 = vmul.f32 0.0016666667, %v1728_v43  ;;  %v2051_v60 = vadd.f32 %v2050_v47, %v2049_v61  ;;  %v1691_v51 = vadd.f32 %v4107_v59, %v4322_v42  ;;  %v1878_v27 = vld [vmem:[#allocation2 + $0x100] sm:$0xff] }
 0x2f9   :  { %v1765_v1 = vmul.f32 0.00016666666, %v1233_v14  ;;  %v1914_v41 = vadd.f32 %v1876_v48, %v1838_v62  ;;  %v968_v15 = vmul.f32 2.0, %v930_v34  ;;  %v666_v37 = vmul.f32 0.1, %v626_v20  ;;  %v1993_v48 = vld [vmem:[#allocation2 + $0xe0] sm:$0xff] }
 0x2fa   :  { %v1120_v63 = vsub.f32 %v505_v38, %v1082_v21  ;;  %v1159_v58 = vsub.f32 %v4135_v8, %v969_v26  ;;  %v2053_v30 = vadd.f32 %v2052_v28, %v2051_v60  ;;  %v4323_v34 = vld [vmem:[#allocation45_spill] sm:$0xff]  ;;  %v1655_v59 = vmul.f32 0.6931472, %v2260_v32  ;;  %v511_v38 = vpop.xlane.xlu0 %510 }
 0x2fb   :  { %v1841_v33 = vadd.f32 %v1803_v3, %v1765_v1  ;;  %1953 = vst.msk [vmem:[#allocation2 + $0xf0] sm:$0xff] %vm16_vm10, %v1914_v41  ;;  %v1158_v6 = vsub.f32 %v1082_v21, %v968_v15  ;;  %v856_v54 = vand.u32 2147483647, %v666_v37  ;;  %v1692_v20 = vadd.f32 %v4122_v45, %v4323_v34  ;;  %v1994_v9 = vld [vmem:[#allocation2 + $0xe8] sm:$0xff] }
 0x2fc   :  { %v499_v11 = vpop.xlane.xlu1 %498  ;;  %v1729_v24 = vsub.f32 %v1691_v51, %v4082_v13  ;;  %v2055_v49 = vadd.f32 %v2054_v53, %v2053_v30  ;;  %v2058_v15 = vsel %vm16_vm10, %v1993_v48, 0.0  ;;  %v1197_v13 = vand.u32 2147483647, %v1159_v58 }
 0x2fd   :  { %v1917_v40 = vadd.f32 %v1879_v57, %v1841_v33  ;;  %v1196_v52 = vand.u32 2147483647, %v1158_v6  ;;  %v1118_v17 = vsub.f32 %v499_v11, %v1080_v5  ;;  %v2056_v5 = vsel %vm16_vm10, %v1992_v29, 0.0 }
 0x2fe   :  { %v857_v57 = vand.u32 2147483647, %v667_v10  ;;  %v2057_v55 = vadd.f32 %v2056_v5, %v2055_v49  ;;  %v2060_v6 = vsel %vm16_vm10, %v1994_v9, 0.0  ;;  %v4324_v10 = vld [vmem:[#allocation46_spill] sm:$0xff]  ;;  %v1805_v61 = vmul.f32 0.0016666667, %v1729_v24 }
 0x2ff   :  { %1956 = vst.msk [vmem:[#allocation2 + $0x108] sm:$0xff] %vm16_vm10, %v1917_v40  ;;  %v1234_v12 = vadd.f32 %v1196_v52, %v1120_v63  ;;  %v1232_v18 = vadd.f32 %v1194_v56, %v1118_v17  ;;  %v1693_v26 = vadd.f32 %v1655_v59, %v4324_v10 }
 0x300   :  { %v816_v46 = vpop.xlane.xlu1 %815  ;;  %v2059_v43 = vadd.f32 %v2058_v15, %v2057_v55 }
 0x301   :  { %v1766_v35 = vmul.f32 0.00016666666, %v1234_v12  ;;  %v1764_v16 = vmul.f32 0.00016666666, %v1232_v18  ;;  %v894_v39 = vand.u32 2147483647, %v816_v46  ;;  %v1730_v36 = vsub.f32 %v1692_v20, %v816_v46 }
 0x302   :  { %v1046_v25 = vmul.f32 2.0, %v816_v46  ;;  %vm1008_vm8 = vcmp.gt.f32.partialorder %v816_v46, 0.0  ;;  %v1995_v4 = vld [vmem:[#allocation2 + $0xf0] sm:$0xff]  ;;  %v2061_v40 = vadd.f32 %v2060_v6, %v2059_v43  ;;  %v1996_v18 = vld [vmem:[#allocation2 + $0xf8] sm:$0xff] }
 0x303   :  { %v1842_v50 = vadd.f32 %v1804_v7, %v1766_v35  ;;  %v1840_v14 = vadd.f32 %v1802_v44, %v1764_v16  ;;  %v932_v62 = vmax.f32.f32 %v856_v54, %v894_v39  ;;  %v2062_v2 = vsel %vm16_vm10, %v1995_v4, 0.0  ;;  %v1882_v54 = vld [vmem:[#allocation2 + $0x120] sm:$0xff]  ;;  %v1881_v46 = vld [vmem:[#allocation2 + $0x118] sm:$0xff] }
 0x304   :  { %v819_v0 = vpop.xlane.xlu1 %818  ;;  %v1084_v21 = vsel %vm1008_vm8, %v1046_v25, 0.0  ;;  %v2063_v29 = vadd.f32 %v2062_v2, %v2061_v40  ;;  %v1806_v28 = vmul.f32 0.0016666667, %v1730_v36  ;;  %v2064_v16 = vsel %vm16_vm10, %v1996_v18, 0.0 }
 0x305   :  { %v1918_v3 = vadd.f32 %v1880_v31, %v1842_v50  ;;  %v1916_v1 = vadd.f32 %v1878_v27, %v1840_v14  ;;  %v970_v41 = vmul.f32 2.0, %v932_v62  ;;  %v895_v23 = vand.u32 2147483647, %v819_v0  ;;  %v1883_v14 = vld [vmem:[#allocation2 + $0x128] sm:$0xf] }
 0x306   :  { %v1047_v33 = vmul.f32 2.0, %v819_v0  ;;  %vm1009_vm9 = vcmp.gt.f32.partialorder %v819_v0, 0.0  ;;  %v1122_v11 = vsub.f32 %v511_v38, %v1084_v21  ;;  %v2065_v27 = vadd.f32 %v2064_v16, %v2063_v29  ;;  %v1998_v5 = vld [vmem:[#allocation2 + $0x108] sm:$0xff] }
 0x307   :  { %1957 = vst.msk [vmem:[#allocation2 + $0x110] sm:$0xff] %vm16_vm10, %v1918_v3  ;;  %1955 = vst.msk [vmem:[#allocation2 + $0x100] sm:$0xff] %vm16_vm10, %v1916_v1  ;;  %v1160_v45 = vsub.f32 %v1084_v21, %v970_v41  ;;  %v933_v22 = vmax.f32.f32 %v857_v57, %v895_v23  ;;  %v2068_v34 = vsel %vm16_vm10, %v1998_v5, 0.0 }
 0x308   :  { %v508_v47 = vpop.xlane.xlu1 %507  ;;  %v1085_v17 = vsel %vm1009_vm9, %v1047_v33, 0.0 }
 0x309   :  { %v1198_v37 = vand.u32 2147483647, %v1160_v45  ;;  %v1121_v56 = vsub.f32 %v508_v47, %v4135_v8  ;;  %v971_v19 = vmul.f32 2.0, %v933_v22  ;;  %v1731_v8 = vsub.f32 %v1693_v26, %v819_v0 }
 0x30b   :  { %v1236_v52 = vadd.f32 %v1198_v37, %v1122_v11  ;;  %v1235_v63 = vadd.f32 %v1197_v13, %v1121_v56  ;;  %v1161_v12 = vsub.f32 %v1085_v17, %v971_v19  ;;  %v1807_v48 = vmul.f32 0.0016666667, %v1731_v8 }
 0x30c   :  { %v515_v32 = vpop.xlane.xlu1 %514 }
 0x30d   :  { %v1768_v53 = vmul.f32 0.00016666666, %v1236_v52  ;;  %v1767_v44 = vmul.f32 0.00016666666, %v1235_v63  ;;  %v1123_v7 = vsub.f32 %v515_v32, %v1085_v17  ;;  %v1199_v60 = vand.u32 2147483647, %v1161_v12 }
 0x30e   :  { %v1997_v42 = vld [vmem:[#allocation2 + $0x100] sm:$0xff]  ;;  %v1999_v59 = vld [vmem:[#allocation2 + $0x110] sm:$0xff] }
 0x30f   :  { %v1844_v51 = vadd.f32 %v1806_v28, %v1768_v53  ;;  %v1843_v35 = vadd.f32 %v1805_v61, %v1767_v44  ;;  %v2066_v39 = vsel %vm16_vm10, %v1997_v42, 0.0  ;;  %v1237_v31 = vadd.f32 %v1199_v60, %v1123_v7 }
 0x310   :  { %v2067_v50 = vadd.f32 %v2066_v39, %v2065_v27  ;;  %v2070_v0 = vsel %vm16_vm10, %v1999_v59, 0.0 }
 0x311   :  { %v1920_v25 = vadd.f32 %v1882_v54, %v1844_v51  ;;  %v1919_v58 = vadd.f32 %v1881_v46, %v1843_v35  ;;  %v1769_v30 = vmul.f32 0.00016666666, %v1237_v31 }
 0x312   :  { %v2069_v24 = vadd.f32 %v2068_v34, %v2067_v50 }
 0x313   :  { %1959 = vst.msk [vmem:[#allocation2 + $0x120] sm:$0xff] %vm16_vm10, %v1920_v25  ;;  %1958 = vst.msk [vmem:[#allocation2 + $0x118] sm:$0xff] %vm16_vm10, %v1919_v58  ;;  %v1845_v62 = vadd.f32 %v1807_v48, %v1769_v30 }
 0x314   :  { %v2071_v3 = vadd.f32 %v2070_v0, %v2069_v24 }
 0x315   :  { %v1921_v20 = vadd.f32 %v1883_v14, %v1845_v62 }
 0x317   :  { %1961 = vst.msk [vmem:[#allocation2 + $0x128] sm:$0xf] %vm54_vm4, %v1921_v20 }
 0x31a   :  { %v2000_v9 = vld [vmem:[#allocation2 + $0x118] sm:$0xff]  ;;  %v2001_v49 = vld [vmem:[#allocation2 + $0x120] sm:$0xff] }
 0x31b   :  { %v2072_v1 = vsel %vm16_vm10, %v2000_v9, 0.0  ;;  %v2074_v15 = vsel %vm16_vm10, %v2001_v49, 0.0 }
 0x31c   :  { %v2073_v41 = vadd.f32 %v2072_v1, %v2071_v3 }
 0x31e   :  { %v2075_v57 = vadd.f32 %v2074_v15, %v2073_v41  ;;  %v2002_v21 = vld [vmem:[#allocation2 + $0x128] sm:$0xf] }
 0x31f   :  { %v2076_v38 = vsel %vm54_vm4, %v2002_v21, 0.0 }
 0x320   :  { %v2077_v23 = vadd.f32 %v2076_v38, %v2075_v57 }
 0x322   :  { %2078 = vadd.xlane.f32.xlu0 %v2077_v23 }
 0x3ab   :  { %v2079_v4 = vpop.xlane.xlu0 %2078 }
 0x3ac   :  { %v2080_v55 = vrot.slane %v2079_v4, 4 }
 0x3ae   :  { %v2081_v45 = vadd.f32 %v2080_v55, %v2079_v4 }
 0x3b0   :  { %v2082_v13 = vrot.slane %v2081_v45, 2 }
 0x3b2   :  { %v2083_v33 = vadd.f32 %v2082_v13, %v2081_v45 }
 0x3b4   :  { %v2084_v6 = vrot.slane %v2083_v33, 1 }
 0x3b6   :  { %v2085_v36 = vadd.f32 %v2084_v6, %v2083_v33 }
 0x3b8   :  { %2102 = vpush %v2085_v36 }
 0x3e9   :  { %s2103_s0 = spop %2102 }
 0x3ea   :  { %2088 = sst [smem:[#allocation3]] %s2103_s0 }
 0x3eb   :  { %2096 = dma.smem_to_hbm %s2303_s22, 16, %s4169_s2, [#allocation4]  }
 0x3ec   :  { %2299 = dma.done.wait [#allocation4], 16  }
 0x3ed   :  { %2300 = vsyncadd [#allocation4], 4294967280 }
 0x3ee   :  { %2100 = sfence }
 0x3ef   :  { %2101 = vsyncpa [#allocation4], 1 }

</bundles_post_ra>
